<compile_context>
chip_gen: v6e
topology: v6e:2x2x1
jax: 0.10.0
libtpu: 0.0.40
codegen_flags: <defaults>
</compile_context>

<pallas_src>
import numpy as np
import jax
import jax.numpy as jnp
from jax.experimental import pallas as pl
from jax.experimental.pallas import tpu as pltpu


def make_relu_pe_kernel(in_features: int, num_linear: int):
    """Kernel body.

    Args: (x_ref, hf_ref, w0_x, b0, w0_sin_0, w0_cos_0, ..., w1, b1, ..., o_ref)
      x_ref:    (in_features, tm)   batch on the 128-lane axis
      hf_ref:   (F, 1)              half frequencies 2^(k-1)
      w0_x:     (hidden, in_features)
      b0:       (hidden, 1)
      w0_sin_i / w0_cos_i: (hidden, F) column slabs of the torch W0
      w_l, b_l: torch layout (fan_out, fan_in) / (fan_out, 1)
      o_ref:    (out_features, tm)
    """
    TWO_PI = 6.283185307179586

    def kernel(x_ref, hf_ref, *refs):
        o_ref = refs[-1]
        prefs = refs[:-1]
        w0x_ref, b0_ref = prefs[0], prefs[1]
        pe_refs = prefs[2:2 + 2 * in_features]
        tail_refs = prefs[2 + 2 * in_features:]

        xt = x_ref[...]                                   # (in, tm) f32
        hf = hf_ref[...]                                  # (F, 1)   2^(k-1)

        # ---- Layer 0 as accumulated partial matmuls (no PE concat/relayout) ----
        h = jnp.dot(w0x_ref[...], xt, preferred_element_type=jnp.float32) + b0_ref[...]
        for i in range(in_features):                      # tiny, unrolled
            t = hf * xt[i:i + 1, :]                       # (F, tm); exact pow2 scale
            r = t - jnp.floor(t + 0.5)                    # frac range-reduce, r in [-0.5, 0.5]
            arg = TWO_PI * r                              # sin(2^k*pi*x) == sin(2*pi*r)
            h = h + jnp.dot(pe_refs[2 * i][...], jnp.sin(arg),
                            preferred_element_type=jnp.float32)
            h = h + jnp.dot(pe_refs[2 * i + 1][...], jnp.cos(arg),
                            preferred_element_type=jnp.float32)
        h = jnp.maximum(h, 0.0)                           # layer 0 is a LinearBlock

        # ---- Remaining layers: LinearBlocks then a final plain Linear ----
        n_tail = num_linear - 1
        for l in range(n_tail):
            w = tail_refs[2 * l][...]
            b = tail_refs[2 * l + 1][...]
            h = jnp.dot(w, h, preferred_element_type=jnp.float32) + b
            if l < n_tail - 1:                            # no ReLU after the last layer
                h = jnp.maximum(h, 0.0)

        o_ref[...] = h.astype(o_ref.dtype)

    return kernel


def _default_tile(B: int) -> int:
    """Largest lane-aligned divisor of B up to a v7x-safe cap, preferring grid >= 2."""
    if B % 128 != 0:
        return B                      # single un-tiled block (block dim == full dim)
    cap = 4096                        # comfortably under the 32 MiB scoped-VMEM default
    best = 128
    t = 128
    while t <= min(cap, B):
        if B % t == 0:
            best = t
        t += 128
    if best == B and B >= 256 and (B // 2) % 128 == 0:
        best = B // 2                 # keep both v7x TensorCores busy
    return best


def relu_pe_forward_t(x_t, params, num_frequencies, *, tm=None):
    """Transposed-layout forward: x_t is (in_features, B), returns (out_features, B)."""
    in_features, B = x_t.shape
    F = num_frequencies
    num_linear = len(params)
    hidden = params[0][0].shape[0]
    out_features = params[-1][0].shape[0]
    pe_dim = in_features * (1 + 2 * F)
    assert params[0][0].shape[1] == pe_dim

    if tm is None:
        tm = _default_tile(B)
    tm = min(tm, B)
    assert B % tm == 0, "batch must be divisible by the tile size"
    assert tm % 128 == 0 or tm == B, "tile last dim must be lane-aligned"
    grid = (B // tm,)

    # ---- Host-side split of W0 into [x | per-feature sin | per-feature cos] slabs ----
    stride = 1 + 2 * F
    w0 = jnp.asarray(params[0][0], jnp.float32)
    b0 = jnp.asarray(params[0][1], jnp.float32).reshape(-1, 1)
    w0_x = w0[:, np.asarray([i * stride for i in range(in_features)], dtype=np.int32)]
    pe_slabs = []
    for i in range(in_features):
        base = i * stride
        pe_slabs.append(w0[:, base + 1:base + 1 + F])            # sin slab, feature i
        pe_slabs.append(w0[:, base + 1 + F:base + 1 + 2 * F])    # cos slab, feature i
    tail_params = []
    for (w, b) in params[1:]:
        tail_params.append(jnp.asarray(w, jnp.float32))
        tail_params.append(jnp.asarray(b, jnp.float32).reshape(-1, 1))
    flat = [w0_x, b0] + pe_slabs + tail_params

    # Half frequencies 2^(k-1) (exact powers of two); the kernel multiplies by 2*pi
    # only after the frac() range reduction.
    half_freqs = (2.0 ** (jnp.arange(F, dtype=jnp.float32) - 1.0)).reshape(F, 1)

    def _const_spec(a):
        return pl.BlockSpec(a.shape, lambda i: (0, 0))            # whole-array resident

    in_specs = [pl.BlockSpec((in_features, tm), lambda i: (0, i)),  # x tile, batch on lanes
                _const_spec(half_freqs)] + [_const_spec(a) for a in flat]

    # Cost estimate: ~2*MAC flops, 2*in*F transcendentals per point, streaming bytes.
    macs = in_features * hidden + 2 * in_features * F * hidden
    for (w, _) in params[1:]:
        macs += int(w.shape[0]) * int(w.shape[1])
    cost = pl.CostEstimate(
        flops=2 * macs * B,
        transcendentals=2 * in_features * F * B,
        bytes_accessed=4 * B * (in_features + out_features),
    )

    kernel = make_relu_pe_kernel(in_features, num_linear)

    out_t = pl.pallas_call(
        kernel,
        out_shape=jax.ShapeDtypeStruct((out_features, B), jnp.float32),
        grid=grid,
        in_specs=in_specs,
        out_specs=pl.BlockSpec((out_features, tm), lambda i: (0, i)),
        compiler_params=pltpu.CompilerParams(dimension_semantics=("parallel",)),
        cost_estimate=cost,
    )(x_t, half_freqs, *flat)
    return out_t


def relu_pe_forward(x, params, num_frequencies, *, tm=None):
    """Torch-interface wrapper: x (B, in_features) -> (B, out_features).

    For rendering-scale batches prefer relu_pe_forward_t and keep the
    (features, batch) orientation end-to-end (saves two extra HBM passes).
    """
    out_t = relu_pe_forward_t(jnp.asarray(x, jnp.float32).T, params, num_frequencies, tm=tm)
    return out_t.T


def reference_forward_np(x, params, num_frequencies):
    """float64 numpy reference matching the PyTorch module semantics exactly."""
    x = np.asarray(x, np.float64)
    F = num_frequencies
    freqs = (2.0 ** np.arange(F, dtype=np.float64)) * np.pi                 # (F,)
    xe = x[:, :, None]                                                      # (B, in, 1)
    pe = np.concatenate([xe, np.sin(xe * freqs), np.cos(xe * freqs)], axis=-1)
    h = pe.reshape(x.shape[0], -1)                                          # torch interleave
    for l, (w, b) in enumerate(params):
        w = np.asarray(w, np.float64)
        b = np.asarray(b, np.float64)
        h = h @ w.T + b
        if l < len(params) - 1:
            h = np.maximum(h, 0.0)
    return h


def init_params(key, in_features, hidden_features, hidden_layers, out_features, num_frequencies):
    """Deterministic init, torch layout: W (fan_out, fan_in), b (fan_out,)."""
    pe_dim = in_features * (1 + 2 * num_frequencies)
    dims = [pe_dim] + [hidden_features] * (hidden_layers + 1) + [out_features]
    params = []
    for l in range(len(dims) - 1):
        fan_in, fan_out = dims[l], dims[l + 1]
        key, kw, kb = jax.random.split(key, 3)
        if l < len(dims) - 2:
            # kaiming_normal_(a=0, nonlinearity='relu', mode='fan_in') for LinearBlocks
            w = jax.random.normal(kw, (fan_out, fan_in), jnp.float32) * np.sqrt(2.0 / fan_in)
        else:
            bound = 1.0 / np.sqrt(fan_in)
            w = jax.random.uniform(kw, (fan_out, fan_in), jnp.float32, -bound, bound)
        bound = 1.0 / np.sqrt(fan_in)
        b = jax.random.uniform(kb, (fan_out,), jnp.float32, -bound, bound)
        params.append((w, b))
    return params


if __name__ == "__main__":
    # Small INR-style config: 2-D coordinates -> 3 output channels.
    B = 1024                  # tiled as 2 x 512 (keeps both v7x TensorCores busy)
    in_features = 2
    hidden_features = 32
    hidden_layers = 2
    out_features = 3
    num_frequencies = 10

    key = jax.random.PRNGKey(0)
    key, kx = jax.random.split(key)
    x = jax.random.uniform(kx, (B, in_features), jnp.float32, -1.0, 1.0)

    params = init_params(key, in_features, hidden_features, hidden_layers,
                         out_features, num_frequencies)

    out = relu_pe_forward(x, params, num_frequencies, tm=512)
    out = jax.block_until_ready(out)

    # float64 reference: the range-reduced PE is now accurate to ~1e-7; the remaining
    # tolerance budget only covers MXU f32 matmul pass precision.
    ref = reference_forward_np(np.asarray(x),
                               [(np.asarray(w), np.asarray(b)) for w, b in params],
                               num_frequencies)
    np.testing.assert_allclose(np.asarray(out), ref, rtol=1e-2, atol=1e-2)

    print("KERNEL_OK")
</pallas_src>

<mosaic_0001>
module attributes {stable_mosaic.version = 11 : i64} {
  func.func @kernel(%arg0: i32, %arg1: memref<2x512xf32, #tpu.memory_space<vmem>>, %arg2: memref<10x1xf32, #tpu.memory_space<vmem>>, %arg3: memref<32x2xf32, #tpu.memory_space<vmem>>, %arg4: memref<32x1xf32, #tpu.memory_space<vmem>>, %arg5: memref<32x10xf32, #tpu.memory_space<vmem>>, %arg6: memref<32x10xf32, #tpu.memory_space<vmem>>, %arg7: memref<32x10xf32, #tpu.memory_space<vmem>>, %arg8: memref<32x10xf32, #tpu.memory_space<vmem>>, %arg9: memref<32x32xf32, #tpu.memory_space<vmem>>, %arg10: memref<32x1xf32, #tpu.memory_space<vmem>>, %arg11: memref<32x32xf32, #tpu.memory_space<vmem>>, %arg12: memref<32x1xf32, #tpu.memory_space<vmem>>, %arg13: memref<3x32xf32, #tpu.memory_space<vmem>>, %arg14: memref<3x1xf32, #tpu.memory_space<vmem>>, %arg15: memref<3x512xf32, #tpu.memory_space<vmem>>) attributes {dimension_semantics = [#tpu.dimension_semantics<parallel>], iteration_bounds = array<i64: 2>, scalar_prefetch = 0 : i64, scratch_operands = 0 : i64, tpu.core_type = #tpu.core_type<tc>, window_params = [{transform_indices = @transform_0, window_bounds = array<i64: 2, 512>}, {pipeline_mode = #tpu.pipeline_mode<synchronous>, transform_indices = @transform_1, window_bounds = array<i64: 10, 1>}, {pipeline_mode = #tpu.pipeline_mode<synchronous>, transform_indices = @transform_2, window_bounds = array<i64: 32, 2>}, {pipeline_mode = #tpu.pipeline_mode<synchronous>, transform_indices = @transform_3, window_bounds = array<i64: 32, 1>}, {pipeline_mode = #tpu.pipeline_mode<synchronous>, transform_indices = @transform_4, window_bounds = array<i64: 32, 10>}, {pipeline_mode = #tpu.pipeline_mode<synchronous>, transform_indices = @transform_5, window_bounds = array<i64: 32, 10>}, {pipeline_mode = #tpu.pipeline_mode<synchronous>, transform_indices = @transform_6, window_bounds = array<i64: 32, 10>}, {pipeline_mode = #tpu.pipeline_mode<synchronous>, transform_indices = @transform_7, window_bounds = array<i64: 32, 10>}, {pipeline_mode = #tpu.pipeline_mode<synchronous>, transform_indices = @transform_8, window_bounds = array<i64: 32, 32>}, {pipeline_mode = #tpu.pipeline_mode<synchronous>, transform_indices = @transform_9, window_bounds = array<i64: 32, 1>}, {pipeline_mode = #tpu.pipeline_mode<synchronous>, transform_indices = @transform_10, window_bounds = array<i64: 32, 32>}, {pipeline_mode = #tpu.pipeline_mode<synchronous>, transform_indices = @transform_11, window_bounds = array<i64: 32, 1>}, {pipeline_mode = #tpu.pipeline_mode<synchronous>, transform_indices = @transform_12, window_bounds = array<i64: 3, 32>}, {pipeline_mode = #tpu.pipeline_mode<synchronous>, transform_indices = @transform_13, window_bounds = array<i64: 3, 1>}, {transform_indices = @transform_14, window_bounds = array<i64: 3, 512>}]} {
    %c0 = arith.constant 0 : index
    %c0_0 = arith.constant 0 : index
    %0 = vector.load %arg1[%c0, %c0_0] : memref<2x512xf32, #tpu.memory_space<vmem>>, vector<2x512xf32>
    %c0_1 = arith.constant 0 : index
    %c0_2 = arith.constant 0 : index
    %1 = vector.load %arg2[%c0_1, %c0_2] : memref<10x1xf32, #tpu.memory_space<vmem>>, vector<10x1xf32>
    %c0_3 = arith.constant 0 : index
    %c0_4 = arith.constant 0 : index
    %2 = vector.load %arg3[%c0_3, %c0_4] : memref<32x2xf32, #tpu.memory_space<vmem>>, vector<32x2xf32>
    %cst = arith.constant dense<0.000000e+00> : vector<32x512xf32>
    %3 = tpu.matmul %2, %0, %cst {dimension_numbers = #tpu.dot_dimension_numbers<[1], [0], [0], [1], [0, 0, 1, 1], [], []>} : vector<32x2xf32>, vector<2x512xf32>, vector<32x512xf32> -> vector<32x512xf32>
    %c0_5 = arith.constant 0 : index
    %c0_6 = arith.constant 0 : index
    %4 = vector.load %arg4[%c0_5, %c0_6] : memref<32x1xf32, #tpu.memory_space<vmem>>, vector<32x1xf32>
    %5 = vector.broadcast %4 : vector<32x1xf32> to vector<32x512xf32>
    %6 = arith.addf %3, %5 : vector<32x512xf32>
    %7 = vector.extract_strided_slice %0 {offsets = [0, 0], sizes = [1, 512], strides = [1, 1]} : vector<2x512xf32> to vector<1x512xf32>
    %8 = vector.broadcast %1 : vector<10x1xf32> to vector<10x512xf32>
    %9 = vector.broadcast %7 : vector<1x512xf32> to vector<10x512xf32>
    %10 = arith.mulf %8, %9 : vector<10x512xf32>
    %cst_7 = arith.constant 5.000000e-01 : f32
    %11 = vector.broadcast %cst_7 : f32 to vector<10x512xf32>
    %12 = arith.addf %10, %11 : vector<10x512xf32>
    %13 = math.floor %12 : vector<10x512xf32>
    %14 = arith.subf %10, %13 : vector<10x512xf32>
    %cst_8 = arith.constant 6.28318548 : f32
    %15 = vector.broadcast %cst_8 : f32 to vector<10x512xf32>
    %16 = arith.mulf %15, %14 : vector<10x512xf32>
    %c0_9 = arith.constant 0 : index
    %c0_10 = arith.constant 0 : index
    %17 = vector.load %arg5[%c0_9, %c0_10] : memref<32x10xf32, #tpu.memory_space<vmem>>, vector<32x10xf32>
    %18 = math.sin %16 : vector<10x512xf32>
    %cst_11 = arith.constant dense<0.000000e+00> : vector<32x512xf32>
    %19 = tpu.matmul %17, %18, %cst_11 {dimension_numbers = #tpu.dot_dimension_numbers<[1], [0], [0], [1], [0, 0, 1, 1], [], []>} : vector<32x10xf32>, vector<10x512xf32>, vector<32x512xf32> -> vector<32x512xf32>
    %20 = arith.addf %6, %19 : vector<32x512xf32>
    %c0_12 = arith.constant 0 : index
    %c0_13 = arith.constant 0 : index
    %21 = vector.load %arg6[%c0_12, %c0_13] : memref<32x10xf32, #tpu.memory_space<vmem>>, vector<32x10xf32>
    %22 = math.cos %16 : vector<10x512xf32>
    %cst_14 = arith.constant dense<0.000000e+00> : vector<32x512xf32>
    %23 = tpu.matmul %21, %22, %cst_14 {dimension_numbers = #tpu.dot_dimension_numbers<[1], [0], [0], [1], [0, 0, 1, 1], [], []>} : vector<32x10xf32>, vector<10x512xf32>, vector<32x512xf32> -> vector<32x512xf32>
    %24 = arith.addf %20, %23 : vector<32x512xf32>
    %25 = vector.extract_strided_slice %0 {offsets = [1, 0], sizes = [1, 512], strides = [1, 1]} : vector<2x512xf32> to vector<1x512xf32>
    %26 = vector.broadcast %1 : vector<10x1xf32> to vector<10x512xf32>
    %27 = vector.broadcast %25 : vector<1x512xf32> to vector<10x512xf32>
    %28 = arith.mulf %26, %27 : vector<10x512xf32>
    %cst_15 = arith.constant 5.000000e-01 : f32
    %29 = vector.broadcast %cst_15 : f32 to vector<10x512xf32>
    %30 = arith.addf %28, %29 : vector<10x512xf32>
    %31 = math.floor %30 : vector<10x512xf32>
    %32 = arith.subf %28, %31 : vector<10x512xf32>
    %cst_16 = arith.constant 6.28318548 : f32
    %33 = vector.broadcast %cst_16 : f32 to vector<10x512xf32>
    %34 = arith.mulf %33, %32 : vector<10x512xf32>
    %c0_17 = arith.constant 0 : index
    %c0_18 = arith.constant 0 : index
    %35 = vector.load %arg7[%c0_17, %c0_18] : memref<32x10xf32, #tpu.memory_space<vmem>>, vector<32x10xf32>
    %36 = math.sin %34 : vector<10x512xf32>
    %cst_19 = arith.constant dense<0.000000e+00> : vector<32x512xf32>
    %37 = tpu.matmul %35, %36, %cst_19 {dimension_numbers = #tpu.dot_dimension_numbers<[1], [0], [0], [1], [0, 0, 1, 1], [], []>} : vector<32x10xf32>, vector<10x512xf32>, vector<32x512xf32> -> vector<32x512xf32>
    %38 = arith.addf %24, %37 : vector<32x512xf32>
    %c0_20 = arith.constant 0 : index
    %c0_21 = arith.constant 0 : index
    %39 = vector.load %arg8[%c0_20, %c0_21] : memref<32x10xf32, #tpu.memory_space<vmem>>, vector<32x10xf32>
    %40 = math.cos %34 : vector<10x512xf32>
    %cst_22 = arith.constant dense<0.000000e+00> : vector<32x512xf32>
    %41 = tpu.matmul %39, %40, %cst_22 {dimension_numbers = #tpu.dot_dimension_numbers<[1], [0], [0], [1], [0, 0, 1, 1], [], []>} : vector<32x10xf32>, vector<10x512xf32>, vector<32x512xf32> -> vector<32x512xf32>
    %42 = arith.addf %38, %41 : vector<32x512xf32>
    %cst_23 = arith.constant 0.000000e+00 : f32
    %43 = vector.broadcast %cst_23 : f32 to vector<32x512xf32>
    %44 = arith.maximumf %42, %43 : vector<32x512xf32>
    %c0_24 = arith.constant 0 : index
    %c0_25 = arith.constant 0 : index
    %45 = vector.load %arg9[%c0_24, %c0_25] : memref<32x32xf32, #tpu.memory_space<vmem>>, vector<32x32xf32>
    %c0_26 = arith.constant 0 : index
    %c0_27 = arith.constant 0 : index
    %46 = vector.load %arg10[%c0_26, %c0_27] : memref<32x1xf32, #tpu.memory_space<vmem>>, vector<32x1xf32>
    %cst_28 = arith.constant dense<0.000000e+00> : vector<32x512xf32>
    %47 = tpu.matmul %45, %44, %cst_28 {dimension_numbers = #tpu.dot_dimension_numbers<[1], [0], [0], [1], [0, 0, 1, 1], [], []>} : vector<32x32xf32>, vector<32x512xf32>, vector<32x512xf32> -> vector<32x512xf32>
    %48 = vector.broadcast %46 : vector<32x1xf32> to vector<32x512xf32>
    %49 = arith.addf %47, %48 : vector<32x512xf32>
    %cst_29 = arith.constant 0.000000e+00 : f32
    %50 = vector.broadcast %cst_29 : f32 to vector<32x512xf32>
    %51 = arith.maximumf %49, %50 : vector<32x512xf32>
    %c0_30 = arith.constant 0 : index
    %c0_31 = arith.constant 0 : index
    %52 = vector.load %arg11[%c0_30, %c0_31] : memref<32x32xf32, #tpu.memory_space<vmem>>, vector<32x32xf32>
    %c0_32 = arith.constant 0 : index
    %c0_33 = arith.constant 0 : index
    %53 = vector.load %arg12[%c0_32, %c0_33] : memref<32x1xf32, #tpu.memory_space<vmem>>, vector<32x1xf32>
    %cst_34 = arith.constant dense<0.000000e+00> : vector<32x512xf32>
    %54 = tpu.matmul %52, %51, %cst_34 {dimension_numbers = #tpu.dot_dimension_numbers<[1], [0], [0], [1], [0, 0, 1, 1], [], []>} : vector<32x32xf32>, vector<32x512xf32>, vector<32x512xf32> -> vector<32x512xf32>
    %55 = vector.broadcast %53 : vector<32x1xf32> to vector<32x512xf32>
    %56 = arith.addf %54, %55 : vector<32x512xf32>
    %cst_35 = arith.constant 0.000000e+00 : f32
    %57 = vector.broadcast %cst_35 : f32 to vector<32x512xf32>
    %58 = arith.maximumf %56, %57 : vector<32x512xf32>
    %c0_36 = arith.constant 0 : index
    %c0_37 = arith.constant 0 : index
    %59 = vector.load %arg13[%c0_36, %c0_37] : memref<3x32xf32, #tpu.memory_space<vmem>>, vector<3x32xf32>
    %c0_38 = arith.constant 0 : index
    %c0_39 = arith.constant 0 : index
    %60 = vector.load %arg14[%c0_38, %c0_39] : memref<3x1xf32, #tpu.memory_space<vmem>>, vector<3x1xf32>
    %cst_40 = arith.constant dense<0.000000e+00> : vector<3x512xf32>
    %61 = tpu.matmul %59, %58, %cst_40 {dimension_numbers = #tpu.dot_dimension_numbers<[1], [0], [0], [1], [0, 0, 1, 1], [], []>} : vector<3x32xf32>, vector<32x512xf32>, vector<3x512xf32> -> vector<3x512xf32>
    %62 = vector.broadcast %60 : vector<3x1xf32> to vector<3x512xf32>
    %63 = arith.addf %61, %62 : vector<3x512xf32>
    %c0_41 = arith.constant 0 : index
    %c0_42 = arith.constant 0 : index
    %64 = vector.load %arg15[%c0_41, %c0_42] : memref<3x512xf32, #tpu.memory_space<vmem>>, vector<3x512xf32>
    tpu.vector_store %arg15[%c0_41, %c0_42], %63 {strides = array<i32>} : memref<3x512xf32, #tpu.memory_space<vmem>>, vector<3x512xf32>,
    return
  }
  func.func @transform_0(%arg0: i32) -> (i32, i32) {
    %c0_i32 = arith.constant 0 : i32
    %c0_i32_0 = arith.constant 0 : i32
    return %c0_i32, %arg0 : i32, i32
  }
  func.func @transform_1(%arg0: i32) -> (i32, i32) {
    %c0_i32 = arith.constant 0 : i32
    %c0_i32_0 = arith.constant 0 : i32
    %c0_i32_1 = arith.constant 0 : i32
    return %c0_i32, %c0_i32_0 : i32, i32
  }
  func.func @transform_2(%arg0: i32) -> (i32, i32) {
    %c0_i32 = arith.constant 0 : i32
    %c0_i32_0 = arith.constant 0 : i32
    %c0_i32_1 = arith.constant 0 : i32
    return %c0_i32, %c0_i32_0 : i32, i32
  }
  func.func @transform_3(%arg0: i32) -> (i32, i32) {
    %c0_i32 = arith.constant 0 : i32
    %c0_i32_0 = arith.constant 0 : i32
    %c0_i32_1 = arith.constant 0 : i32
    return %c0_i32, %c0_i32_0 : i32, i32
  }
  func.func @transform_4(%arg0: i32) -> (i32, i32) {
    %c0_i32 = arith.constant 0 : i32
    %c0_i32_0 = arith.constant 0 : i32
    %c0_i32_1 = arith.constant 0 : i32
    return %c0_i32, %c0_i32_0 : i32, i32
  }
  func.func @transform_5(%arg0: i32) -> (i32, i32) {
    %c0_i32 = arith.constant 0 : i32
    %c0_i32_0 = arith.constant 0 : i32
    %c0_i32_1 = arith.constant 0 : i32
    return %c0_i32, %c0_i32_0 : i32, i32
  }
  func.func @transform_6(%arg0: i32) -> (i32, i32) {
    %c0_i32 = arith.constant 0 : i32
    %c0_i32_0 = arith.constant 0 : i32
    %c0_i32_1 = arith.constant 0 : i32
    return %c0_i32, %c0_i32_0 : i32, i32
  }
  func.func @transform_7(%arg0: i32) -> (i32, i32) {
    %c0_i32 = arith.constant 0 : i32
    %c0_i32_0 = arith.constant 0 : i32
    %c0_i32_1 = arith.constant 0 : i32
    return %c0_i32, %c0_i32_0 : i32, i32
  }
  func.func @transform_8(%arg0: i32) -> (i32, i32) {
    %c0_i32 = arith.constant 0 : i32
    %c0_i32_0 = arith.constant 0 : i32
    %c0_i32_1 = arith.constant 0 : i32
    return %c0_i32, %c0_i32_0 : i32, i32
  }
  func.func @transform_9(%arg0: i32) -> (i32, i32) {
    %c0_i32 = arith.constant 0 : i32
    %c0_i32_0 = arith.constant 0 : i32
    %c0_i32_1 = arith.constant 0 : i32
    return %c0_i32, %c0_i32_0 : i32, i32
  }
  func.func @transform_10(%arg0: i32) -> (i32, i32) {
    %c0_i32 = arith.constant 0 : i32
    %c0_i32_0 = arith.constant 0 : i32
    %c0_i32_1 = arith.constant 0 : i32
    return %c0_i32, %c0_i32_0 : i32, i32
  }
  func.func @transform_11(%arg0: i32) -> (i32, i32) {
    %c0_i32 = arith.constant 0 : i32
    %c0_i32_0 = arith.constant 0 : i32
    %c0_i32_1 = arith.constant 0 : i32
    return %c0_i32, %c0_i32_0 : i32, i32
  }
  func.func @transform_12(%arg0: i32) -> (i32, i32) {
    %c0_i32 = arith.constant 0 : i32
    %c0_i32_0 = arith.constant 0 : i32
    %c0_i32_1 = arith.constant 0 : i32
    return %c0_i32, %c0_i32_0 : i32, i32
  }
  func.func @transform_13(%arg0: i32) -> (i32, i32) {
    %c0_i32 = arith.constant 0 : i32
    %c0_i32_0 = arith.constant 0 : i32
    %c0_i32_1 = arith.constant 0 : i32
    return %c0_i32, %c0_i32_0 : i32, i32
  }
  func.func @transform_14(%arg0: i32) -> (i32, i32) {
    %c0_i32 = arith.constant 0 : i32
    %c0_i32_0 = arith.constant 0 : i32
    return %c0_i32, %arg0 : i32, i32
  }
}

</mosaic_0001>

<bundles_post_ra>
// kernel: tpu_custom_call.1
= control target key start
LH: loop header
LB: loop body
LE: loop exit
PB: predicated region body
PF: predicated region fallthrough
CT: control target
= control target key end

     0   :  { %s8656_s0 = inlined_call_operand.vmem [shape: f32[2,1024], index: 0, kind: input, shape index: {}]   ;;  %s8657_s1 = inlined_call_operand.vmem [shape: f32[10,1], index: 1, kind: input, shape index: {}]   ;;  %s8658_s2 = inlined_call_operand.vmem [shape: f32[32,2], index: 2, kind: input, shape index: {}]   ;;  %s8659_s3 = inlined_call_operand.vmem [shape: f32[32,1], index: 3, kind: input, shape index: {}]   ;;  %s8660_s4 = inlined_call_operand.vmem [shape: f32[32,10], index: 4, kind: input, shape index: {}]   ;;  %s8661_s5 = inlined_call_operand.vmem [shape: f32[32,10], index: 5, kind: input, shape index: {}]   ;;  %s8662_s6 = inlined_call_operand.vmem [shape: f32[32,10], index: 6, kind: input, shape index: {}]   ;;  %s8663_s7 = inlined_call_operand.vmem [shape: f32[32,10], index: 7, kind: input, shape index: {}]   ;;  %s8664_s8 = inlined_call_operand.vmem [shape: f32[32,32], index: 8, kind: input, shape index: {}]   ;;  %s8665_s9 = inlined_call_operand.vmem [shape: f32[32,1], index: 9, kind: input, shape index: {}]   ;;  %s8666_s10 = inlined_call_operand.vmem [shape: f32[32,32], index: 10, kind: input, shape index: {}]   ;;  %s8667_s11 = inlined_call_operand.vmem [shape: f32[32,1], index: 11, kind: input, shape index: {}]   ;;  %s8668_s12 = inlined_call_operand.vmem [shape: f32[3,32], index: 12, kind: input, shape index: {}]   ;;  %s8669_s13 = inlined_call_operand.vmem [shape: f32[3,1], index: 13, kind: input, shape index: {}]   ;;  %s8670_s14 = inlined_call_operand.hbm [shape: f32[3,1024], index: 14, kind: output, shape index: {}]  }
   0x1   :  { %8698 = sst [smem:[#allocation20_spill]] %s8656_s0 }
   0x2   :  { %8699 = sst [smem:[#allocation21_spill]] %s8657_s1 }
   0x3   :  { %8700 = sst [smem:[#allocation22_spill]] %s8658_s2 }
   0x4   :  { %19 = vsyncpa [#allocation3], 0 }
   0x5   :  { %21 = vsyncpa [#allocation3 + $0x1], 0  ;;  %s6348_s29 = smov 0   ;;  %s6350_s30 = smov 0  }
   0x6   :  { %s6352_s15 = smov 0   ;;  %s6354_s16 = smov 0  }
   0x7 LB: > { %8701 = sst [smem:[#allocation5_spill]] %s6257_s15  ;;  %s6369_s17 = sadd.s32 4294967295, %s6261_s16   ;;  %s6261_s16 = sphi %s6354_s16, %s8786_s16   ;;  %s6257_s15 = sphi %s6352_s15, %s8783_s15   ;;  %s6253_s30 = sphi %s6350_s30, %s8785_s30   ;;  %s6249_s29 = sphi %s6348_s29, %s8784_s29  }
   0x8   : > { %s5802_s18 = sadd.s32 4294967294, %s6261_s16   ;;  %s6373_s19 = sadd.s32 1, %s6261_s16  }
   0x9   : > { %s333_s20 = sadd.s32 1, %s6257_s15  ;;  %s330_s21 = ssub.s32 %s6261_s16, %s6373_s19 }
   0xa   : > { %p343_p0 = scmp.ne.s32.totalorder %s6257_s15, %s6253_s30  ;;  %p331_p1 = scmp.eq.s32.totalorder %s330_s21, 0 }
   0xb   : > { %p344_p2 = scmp.eq.s32.totalorder %s6369_s17, 1  ;;  %p349_p3 = scmp.ne.s32.totalorder %s6253_s30, %s6249_s29 }
   0xc   : > { %p350_p4 = scmp.eq.s32.totalorder %s5802_s18, 1  ;;  %p5805_p7 = scmp.ge.s32.totalorder %s6261_s16, 1 }
   0xd   : > { %s6384_s22 = scalar_select %p331_p1, %s6257_s15, %s333_s20  }
   0xe   : > { %p6386_p5 = por %p344_p2, %p343_p0  ;;  %p6390_p6 = por %p350_p4, %p349_p3 }
   0xf   : > { %8702 = sst [smem:[#allocation6_spill]] %s6384_s22  ;;  %p416_p8 = scmp.lt.s32.totalorder %s6261_s16, 3 }
  0x11   : > { %p417_p9 = pnand %p5805_p7, %p416_p8 }
  0x13   : > { %420 = sbr.rel (%p417_p9) target bundleno = 1524 (0x5f4), region = 76 }
  0x18   : > { %s8705_s1 = sld [smem:[#allocation21_spill]]  ;;  %s5807_s27 = sshll.u32 %s6369_s17, 2  ;;  %v505_v1 = vlaneseq  ;;  %v6263_v2 = vmov 0   ;;  %v6264_v3 = vmov 1983009808   ;;  %v8672_v6 = vmov 0.0  }
  0x19   : > { %6133 = vset.pattern.permute.xlu0 %v6263_v2  ;;  %p463_p10 = scmp.lt.s32.totalorder %s5807_s27, 7  ;;  %6134 = vset.pattern.permute.xlu1 %v6263_v2  ;;  %v503_v4 = vunpack.c.l.s4 %v6264_v3  ;;  %s8706_s0 = sld [smem:[#allocation20_spill]]  ;;  %v477_v10 = vld [vmem:[%s8659_s3 + $0x8] sm:$0xff]  ;;  %vm531_vm0 = vcmask 1041408   ;;  %v5104_v16 = vld [vmem:[%s8665_s9 + $0x18] sm:$0xff]  ;;  %vm518_vm1 = vcmask 15360  }
  0x1a   : > { %v6400_v5 = vshrl.u32 %v505_v1, 7  ;;  %604 = vmatprep.mubr.f32.mxu0 %v8672_v6  ;;  %693 = vmatprep.mubr.f32.mxu1 %v8672_v6  ;;  %s8707_s2 = sld [smem:[#allocation22_spill]]  ;;  %v5102_v19 = vld [vmem:[%s8665_s9 + $0x8] sm:$0xff]  ;;  %v5339_v21 = vld [vmem:[%s8667_s11 + $0x18] sm:$0xff]  ;;  %v5567_v23 = vld [vmem:[%s8669_s13] sm:$0x7] }
  0x1b   : > { %s8788_s27 = smov (!%p463_p10, %s5807_s27), 7  ;;  %v504_v8 = vunpack.c.0.s8 %v503_v4  ;;  %v5337_v22 = vld [vmem:[%s8667_s11 + $0x8] sm:$0xff]  ;;  %s459_s18 = sand.u32 1, %s6253_s30  }
  0x1c   : > { %s5808_s20 = sshll.u32 %s8788_s27, 1  ;;  %v730_v25 = vsub.s32 0, %v6400_v5  ;;  %v734_v26 = vsub.s32 2, %v6400_v5  ;;  %v742_v27 = vsub.s32 6, %v6400_v5  ;;  %v738_v31 = vsub.s32 4, %v6400_v5  ;;  %s6020_s22 = sshll.u32 %s6369_s17, 8 }
  0x1d   : > { %v507_v9 = vsub.s32 %v504_v8, %v6400_v5  ;;  %s5741_s28 = scalar_lea.hbm %s8670_s14, %s6020_s22 }
  0x1e   : > { %v471_v0 = vld [vmem:[%s8705_s1 + $0x8] sm:$0x3]  ;;  %v470_v7 = vld [vmem:[%s8705_s1] sm:$0xff] }
  0x1f   : > { %725 = vperm.xlu0 %6133, %v471_v0   ;;  %s6410_s26 = scalar_lea.vmem %s8706_s0, %s5808_s20  ;;  %s5806_s20 = sshll.u32 %s459_s18, 4 }
  0x20   : > { %v469_v11 = vld [vmem:[%s6410_s26] sm:$0xff]  ;;  %v473_v20 = vld [vmem:[%s8707_s2 + $0x8] sm:$0xff]  ;;  %v474_v24 = vld [vmem:[%s8707_s2 + $0x10] sm:$0xff]  ;;  %s461_s15 = scalar_lea.vmem [#allocation2], %s5806_s20  ;;  %s6272_s20 = smov [#allocation2]  }
  0x21   : > { %v508_v12 = vrot.slane %v469_v11, %v507_v9  ;;  %v501_v13 = vcombine.high %v469_v11, %v469_v11  ;;  %v472_v17 = vld [vmem:[%s8707_s2] sm:$0xff]  ;;  %v731_v28 = vrot.slane %v469_v11, %v730_v25  ;;  %v735_v29 = vrot.slane %v469_v11, %v734_v26  ;;  %s5743_s21 = sshll.u32 %s461_s15, 4  ;;  %s6205_s1 = sshll.u32 %s6272_s20, 4  ;;  %s5744_s21 = int_to_ptr.vmem [resolvable:$true] %s5743_s21  ;;  %s6206_s1 = int_to_ptr.vmem [resolvable:$false] %s6205_s1 }
  0x22   : > { %v743_v30 = vrot.slane %v469_v11, %v742_v27  ;;  %v739_v36 = vrot.slane %v469_v11, %v738_v31  ;;  %s6201_s0 = scalar_lea.vmem %s5744_s21, 256  ;;  %s6207_s17 = scalar_lea.vmem %s6206_s1, 512 }
  0x23   : > { %720 = vperm.xlu0 %6133, %v470_v7   ;;  %v516_v14 = vcombine.high %v508_v12, %v508_v12  ;;  %v515_v15 = vrot.slane %v501_v13, %v507_v9  ;;  %v751_v32 = vrot.slane %v731_v28, %v730_v25  ;;  %v755_v33 = vrot.slane %v735_v29, %v730_v25  ;;  %p6202_p11 = scmp.ne.s32.totalorder %s5744_s21, %s6201_s0  ;;  %p6208_p0 = scmp.lt.s32.totalorder %s5744_s21, %s6206_s1 }
  0x24   : > { %v763_v34 = vrot.slane %v743_v30, %v730_v25  ;;  %v6466_v43 = vrot.slane %v739_v36, %v730_v25  ;;  %v6266_v28 = vmov 683565275   ;;  %v8683_v30 = vmov 2475754826   ;;  %p6209_p1 = scmp.lt.s32.totalorder %s6207_s17, %s6201_s0 }
  0x25   : > { %5809 = vmatprep.subr.msk.mxu0 %vm531_vm0, %v516_v14  ;;  %v517_v18 = vcombine.high %v515_v15, %v515_v15  ;;  %p6203_p12 = pnand %p6202_p11, %p6386_p5 }
  0x26   : > { %5810 = vmatpush1.msk.msra.mxu0 %vm531_vm0, %v508_v12  ;;  %p6210_p2 = por %p6209_p1, %p6208_p0 }
  0x27   : > { %487 = vperm.xlu0 %6133, %v477_v10   ;;  %5811 = vmatmul.mubr.msk.f32.vlgmr.msra.gmra.mxu0 %vm518_vm1, %v472_v17  ;;  %p6204_p13 = pneg %p6203_p12 }
  0x28   : > { %5815 = vmatprep.subr.msk.mxu1 %vm531_vm0, %v517_v18  ;;  %610 = vmatprep.mubr.f32.mxu0 %v8672_v6 }
  0x29   : > { %5816 = vmatpush1.msk.msra.mxu1 %vm531_vm0, %v515_v15  ;;  %p6211_p3 = pnand %p6210_p2, %p6204_p13 }
  0x2a   : > { %5817 = vmatmul.mubr.msk.f32.vlgmr.msra.gmra.mxu1 %vm518_vm1, %v472_v17 }
  0x2b   : > { %5122 = vperm.xlu0 %6133, %v5104_v16   ;;  %5812 = vmatmul.mubr.msk.f32.gmra.mxu0 %vm518_vm1, %v473_v20 }
  0x2c   : > { %699 = vmatprep.mubr.f32.mxu1 %v8672_v6  ;;  %616 = vmatprep.mubr.f32.mxu0 %v8672_v6 }
  0x2e   : > { %5818 = vmatmul.mubr.msk.f32.gmra.mxu1 %vm518_vm1, %v473_v20 }
  0x2f   : > { %5112 = vperm.xlu0 %6133, %v5102_v19   ;;  %705 = vmatprep.mubr.f32.mxu1 %v8672_v6 }
  0x30   : > { %5813 = vmatmul.mubr.msk.f32.gmra.mxu0 %vm518_vm1, %v474_v24 }
  0x31   : > { %622 = vmatprep.mubr.f32.mxu0 %v8672_v6 }
  0x32   : > { %5819 = vmatmul.mubr.msk.f32.gmra.mxu1 %vm518_vm1, %v474_v24 }
  0x33   : > { %5357 = vperm.xlu0 %6133, %v5339_v21   ;;  %711 = vmatprep.mubr.f32.mxu1 %v8672_v6 }
  0x37   : > { %5347 = vperm.xlu0 %6133, %v5337_v22  }
  0x3b   : > { %5570 = vperm.xlu0 %6133, %v5567_v23  }
  0x9a   : > { %v6461_v35 = vpop.permute.xlu0 %725 }
  0x9b   : > { %v768_v37 = vmul.f32 %v751_v32, %v6461_v35  ;;  %v769_v38 = vmul.f32 %v755_v33, %v6461_v35  ;;  %v771_v39 = vmul.f32 %v763_v34, %v6461_v35  ;;  %v770_v50 = vmul.f32 %v6466_v43, %v6461_v35 }
  0x9d   : > { %v776_v40 = vadd.f32 0.5, %v768_v37  ;;  %v777_v41 = vadd.f32 0.5, %v769_v38  ;;  %v779_v42 = vadd.f32 0.5, %v771_v39  ;;  %v778_v57 = vadd.f32 0.5, %v770_v50 }
  0x9e   : > { %v6485_v1 = vpop.permute.xlu0 %720 }
  0x9f   : > { %v784_v44 = vfloor.f32 %v776_v40  ;;  %v785_v45 = vfloor.f32 %v777_v41  ;;  %v787_v46 = vfloor.f32 %v779_v42  ;;  %v786_v7 = vfloor.f32 %v778_v57 }
  0xa0   : > { %v6488_v13 = vmul.f32 %v755_v33, %v6485_v1  ;;  %v6491_v14 = vmul.f32 %v763_v34, %v6485_v1  ;;  %v6494_v15 = vmul.f32 %v751_v32, %v6485_v1  ;;  %v475_v33 = vld [vmem:[%s8707_s2 + $0x18] sm:$0xff]  ;;  %v8686_v34 = vmov 2131351028  }
  0xa1   : > { %v792_v47 = vsub.f32 %v768_v37, %v784_v44  ;;  %v793_v48 = vsub.f32 %v769_v38, %v785_v45  ;;  %v795_v49 = vsub.f32 %v771_v39, %v787_v46  ;;  %v6498_v18 = vsub.f32 %v770_v50, %v786_v7  ;;  %5814 = vmatmul.mubr.msk.f32.gmra.mxu0 %vm518_vm1, %v475_v33 }
  0xa2   : > { %v6269_v37 = vmov 2102212464   ;;  %v6270_v39 = vmov 920167782   ;;  %5820 = vmatmul.mubr.msk.f32.gmra.mxu1 %vm518_vm1, %v475_v33  ;;  %1729 = vmatprep.mubr.f32.mxu0 %v8672_v6 }
  0xa3   : > { %v6470_v51 = vmul.f32 6.2831855, %v792_v47  ;;  %v6472_v52 = vmul.f32 6.2831855, %v793_v48  ;;  %v6474_v53 = vmul.f32 6.2831855, %v795_v49  ;;  %1818 = vmatprep.mubr.f32.mxu1 %v8672_v6 }
  0xa4   : > { %v8690_v47 = vmov 1326507024  }
  0xa5   : > { %v1227_v54 = vand.u32 2139095040, %v6470_v51  ;;  %v1328_v55 = vand.u32 2147483647, %v6472_v52  ;;  %v1331_v56 = vand.u32 2139095040, %v6472_v52  ;;  %v1536_v58 = vand.u32 2147483647, %v6474_v53 }
  0xa6   : > { %v1539_v59 = vand.u32 2139095040, %v6474_v53  ;;  %v1224_v22 = vand.u32 2147483647, %v6470_v51  ;;  %vm1330_vm1 = vcmp.lt.s32.totalorder %v6472_v52, 0 }
  0xa7   : > { %v1332_v60 = vshrl.u32 %v1331_v56, 23  ;;  %v1228_v61 = vshrl.u32 %v1227_v54, 23  ;;  %v1335_v62 = vand.u32 8388607, %v1328_v55  ;;  %v1543_v0 = vand.u32 8388607, %v1536_v58 }
  0xa8   : > { %v1540_v63 = vshrl.u32 %v1539_v59, 23 }
  0xa9   : > { %v5841_v2 = vadd.s32 4294967169, %v1332_v60  ;;  %v5837_v3 = vadd.s32 4294967169, %v1228_v61  ;;  %v1336_v10 = vor.u32 8388608, %v1335_v62  ;;  %v1544_v11 = vor.u32 8388608, %v1543_v0 }
  0xaa   : > { %v5849_v4 = vadd.s32 4294967169, %v1540_v63 }
  0xab   : > { %v1338_v8 = vadd.s32 1, %v5841_v2  ;;  %v1234_v9 = vadd.s32 1, %v5837_v3  ;;  %v6501_v23 = vshll.u32 %v1336_v10, 8  ;;  %v6507_v26 = vshll.u32 %v1544_v11, 8 }
  0xac   : > { %v1546_v12 = vadd.s32 1, %v5849_v4 }
  0xad   : > { %vm1339_vm2 = vcmp.gt.s32.totalorder %v1338_v8, 0  ;;  %vm1235_vm3 = vcmp.gt.s32.totalorder %v1234_v9, 0 }
  0xae   : > { %v1340_v16 = vsel %vm1339_vm2, %v1338_v8, 0  ;;  %vm1547_vm4 = vcmp.gt.s32.totalorder %v1546_v12, 0  ;;  %v6496_v17 = vsel %vm1235_vm3, %v1234_v9, 0 }
  0xaf   : > { %v1341_v19 = vshrl.u32 %v1340_v16, 5  ;;  %v1342_v20 = vand.u32 31, %v1340_v16  ;;  %v1548_v21 = vsel %vm1547_vm4, %v1546_v12, 0  ;;  %v6512_v32 = vand.u32 31, %v6496_v17 }
  0xb0   : > { %v6503_v24 = vshrl.u32 %v1548_v21, 5  ;;  %v6505_v25 = vand.u32 31, %v1548_v21 }
  0xb1   : > { %v1343_v27 = vsub.s32 32, %v1342_v20  ;;  %v1345_v29 = vshll.u32 %v6266_v28, %v1342_v20  ;;  %v1348_v31 = vshll.u32 %v8683_v30, %v1342_v20  ;;  %v1351_v36 = vshll.u32 %v8686_v34, %v1342_v20 }
  0xb2   : > { %v1354_v38 = vshll.u32 %v6269_v37, %v1342_v20  ;;  %v1357_v40 = vshll.u32 %v6270_v39, %v1342_v20  ;;  %vm1360_vm5 = vcmp.lt.s32.totalorder %v1341_v19, 1  ;;  %vm1361_vm6 = vcmp.lt.s32.totalorder %v1341_v19, 2 }
  0xb3   : > { %v1346_v41 = vshrl.u32 %v8683_v30, %v1343_v27  ;;  %v1349_v42 = vshrl.u32 %v8686_v34, %v1343_v27  ;;  %v1352_v44 = vshrl.u32 %v6269_v37, %v1343_v27  ;;  %v1344_v45 = vshrl.u32 %v6266_v28, %v1343_v27 }
  0xb4   : > { %v1355_v46 = vshrl.u32 %v6270_v39, %v1343_v27  ;;  %v1358_v48 = vshrl.u32 %v8690_v47, %v1343_v27  ;;  %vm1362_vm7 = vcmp.lt.s32.totalorder %v1341_v19, 3  ;;  %v1551_v56 = vsub.s32 32, %v6505_v25 }
  0xb5   : > { %v1347_v49 = vor.u32 %v1346_v41, %v1345_v29  ;;  %v1350_v50 = vor.u32 %v1349_v42, %v1348_v31  ;;  %v1353_v54 = vor.u32 %v1352_v44, %v1351_v36  ;;  %vm1363_vm8 = vcmp.lt.s32.totalorder %v1341_v19, 4 }
  0xb6   : > { %v1356_v57 = vor.u32 %v1355_v46, %v1354_v38  ;;  %v1359_v59 = vor.u32 %v1358_v48, %v1357_v40  ;;  %v1553_v60 = vshll.u32 %v6266_v28, %v6505_v25  ;;  %v1556_v7 = vshll.u32 %v8683_v30, %v6505_v25 }
  0xb7   : > { %v1364_v61 = vsel %vm1360_vm5, %v1344_v45, %v1347_v49  ;;  %v1365_v62 = vsel %vm1363_vm8, %v1353_v54, 2102212464  ;;  %v1368_v63 = vsel %vm1360_vm5, %v1347_v49, %v1350_v50  ;;  %v1372_v0 = vsel %vm1360_vm5, %v1350_v50, %v1353_v54 }
  0xb8   : > { %v1366_v2 = vsel %vm1362_vm7, %v1350_v50, %v1365_v62  ;;  %v1369_v3 = vsel %vm1363_vm8, %v1356_v57, 920167782  ;;  %v1373_v4 = vsel %vm1363_vm8, %v1359_v59, 1326507024  ;;  %v1552_v10 = vshrl.u32 %v6266_v28, %v1551_v56 }
  0xb9   : > { %v1370_v8 = vsel %vm1362_vm7, %v1353_v54, %v1369_v3  ;;  %v1374_v9 = vsel %vm1362_vm7, %v1356_v57, %v1373_v4  ;;  %v1554_v11 = vshrl.u32 %v8683_v30, %v1551_v56  ;;  %v1367_v12 = vsel %vm1361_vm6, %v1364_v61, %v1366_v2 }
  0xba   : > { %v1371_v16 = vsel %vm1361_vm6, %v1368_v63, %v1370_v8  ;;  %v1375_v20 = vsel %vm1361_vm6, %v1372_v0, %v1374_v9  ;;  %v1557_v21 = vshrl.u32 %v8686_v34, %v1551_v56  ;;  %v1559_v40 = vshll.u32 %v8686_v34, %v6505_v25 }
  0xbb   : > { %v6548_v27 = vmul.u32.u64.low %v6501_v23, %v1375_v20  ;;  %v6549_v29 = vmul.u32.u64.high %v6501_v23, %v1375_v20, %v6548_v27  ;;  %v6552_v31 = vmul.u32.u64.low %v6501_v23, %v1371_v16  ;;  %v6553_v33 = vmul.u32.u64.high %v6501_v23, %v1371_v16, %v6552_v31 }
  0xbc   : > { %v1555_v36 = vor.u32 %v1554_v11, %v1553_v60  ;;  %v1558_v38 = vor.u32 %v1557_v21, %v1556_v7  ;;  %v1560_v41 = vshrl.u32 %v6269_v37, %v1551_v56  ;;  %v1383_v19 = vmul.u32 %v6501_v23, %v1367_v12 }
  0xbd   : > { %v1562_v42 = vshll.u32 %v6269_v37, %v6505_v25  ;;  %v1563_v44 = vshrl.u32 %v6270_v39, %v1551_v56  ;;  %v1566_v45 = vshrl.u32 %v8690_v47, %v1551_v56  ;;  %v1565_v48 = vshll.u32 %v6270_v39, %v6505_v25 }
  0xbe   : > { %v1561_v46 = vor.u32 %v1560_v41, %v1559_v40  ;;  %vm1568_vm9 = vcmp.lt.s32.totalorder %v6503_v24, 1  ;;  %vm1569_vm10 = vcmp.lt.s32.totalorder %v6503_v24, 2  ;;  %vm1385_vm11 = vc.u32 %v6549_v29, %v6552_v31 }
  0xbf   : > { %v1386_v23 = vadd.s32 1, %v6553_v33  ;;  %v1564_v49 = vor.u32 %v1563_v44, %v1562_v42  ;;  %vm1570_vm12 = vcmp.lt.s32.totalorder %v6503_v24, 3  ;;  %v1567_v50 = vor.u32 %v1566_v45, %v1565_v48 }
  0xc0   : > { %vm1571_vm13 = vcmp.lt.s32.totalorder %v6503_v24, 4  ;;  %v1572_v54 = vsel %vm1568_vm9, %v1552_v10, %v1555_v36  ;;  %v1576_v56 = vsel %vm1568_vm9, %v1555_v36, %v1558_v38  ;;  %v1580_v60 = vsel %vm1568_vm9, %v1558_v38, %v1561_v46 }
  0xc1   : > { %v1387_v57 = vsel %vm1385_vm11, %v1386_v23, %v6553_v33  ;;  %v1573_v25 = vsel %vm1571_vm13, %v1561_v46, 2102212464  ;;  %v1577_v59 = vsel %vm1571_vm13, %v1564_v49, 920167782  ;;  %v1581_v0 = vsel %vm1571_vm13, %v1567_v50, 1326507024 }
  0xc2   : > { %v1388_v61 = vadd.s32 %v1387_v57, %v1383_v19  ;;  %v1574_v62 = vsel %vm1570_vm12, %v1558_v38, %v1573_v25  ;;  %v1578_v63 = vsel %vm1570_vm12, %v1561_v46, %v1577_v59  ;;  %v1582_v3 = vsel %vm1570_vm12, %v1564_v49, %v1581_v0 }
  0xc3   : > { %v1579_v2 = vsel %vm1569_vm10, %v1576_v56, %v1578_v63  ;;  %v1231_v4 = vand.u32 8388607, %v1224_v22  ;;  %v6579_v7 = vmul.f32 6.2831855, %v6498_v18  ;;  %v1583_v9 = vsel %vm1569_vm10, %v1580_v60, %v1582_v3 }
  0xc4   : > { %v1389_v8 = vadd.s32 536870912, %v1388_v61  ;;  %v6584_v10 = vmul.u32.u64.low %v6507_v26, %v1579_v2  ;;  %v6585_v11 = vmul.u32.u64.high %v6507_v26, %v1579_v2, %v6584_v10  ;;  %v1575_v12 = vsel %vm1569_vm10, %v1572_v54, %v1574_v62 }
  0xc5   : > { %v6591_v16 = vmul.u32.u64.low %v6507_v26, %v1583_v9  ;;  %v6592_v20 = vmul.u32.u64.high %v6507_v26, %v1583_v9, %v6591_v16  ;;  %v1239_v21 = vsub.s32 32, %v6512_v32  ;;  %v6598_v27 = vadd.f32 0.5, %v6488_v13 }
  0xc6   : > { %v6595_v18 = vshrl.u32 %v1389_v8, 30  ;;  %v1232_v33 = vor.u32 8388608, %v1231_v4  ;;  %v1435_v36 = vand.u32 2139095040, %v6579_v7  ;;  %v6602_v38 = vadd.f32 0.5, %v6491_v14 }
  0xc7   : > { %v6605_v24 = vadd.f32 0.5, %v6494_v15  ;;  %v1591_v41 = vmul.u32 %v6507_v26, %v1575_v12  ;;  %v1594_v19 = vadd.s32 1, %v6585_v11  ;;  %v6611_v42 = vshrl.u32 %v6496_v17, 5 }
  0xc8   : > { %v1391_v40 = vshll.u32 %v6595_v18, 30  ;;  %vm1593_vm14 = vc.u32 %v6592_v20, %v6584_v10  ;;  %v1242_v44 = vshrl.u32 %v8683_v30, %v1239_v21  ;;  %v1245_v45 = vshrl.u32 %v8686_v34, %v1239_v21 }
  0xc9   : > { %v1248_v46 = vshrl.u32 %v6269_v37, %v1239_v21  ;;  %v1595_v23 = vsel %vm1593_vm14, %v1594_v19, %v6585_v11  ;;  %v1250_v26 = vshll.u32 %v6269_v37, %v6512_v32  ;;  %v1251_v49 = vshrl.u32 %v6270_v39, %v1239_v21 }
  0xca   : > { %v6618_v48 = vsub.s32 %v1388_v61, %v1391_v40  ;;  %v1596_v17 = vadd.s32 %v1595_v23, %v1591_v41  ;;  %v1241_v50 = vshll.u32 %v6266_v28, %v6512_v32  ;;  %v1254_v54 = vshrl.u32 %v8690_v47, %v1239_v21 }
  0xcb   : > { %v1436_v56 = vshrl.u32 %v1435_v36, 23  ;;  %v1244_v25 = vshll.u32 %v8683_v30, %v6512_v32  ;;  %v1247_v59 = vshll.u32 %v8686_v34, %v6512_v32  ;;  %v1252_v60 = vor.u32 %v1251_v49, %v1250_v26 }
  0xcc   : > { %v1394_v57 = vsub.s32 0, %v6618_v48  ;;  %v1597_v61 = vadd.s32 536870912, %v1596_v17  ;;  %v1243_v62 = vor.u32 %v1242_v44, %v1241_v50  ;;  %v1253_v63 = vshll.u32 %v6270_v39, %v6512_v32 }
  0xcd   : > { %v781_v0 = vfloor.f32 %v6598_v27  ;;  %v1246_v3 = vor.u32 %v1245_v45, %v1244_v25  ;;  %v1249_v4 = vor.u32 %v1248_v46, %v1247_v59  ;;  %vm1259_vm15 = vcmp.lt.s32.totalorder %v6611_v42, 4 }
  0xce   : > { %v5842_v2 = vmin.u32 %v1394_v57, %v6618_v48  ;;  %v6637_v8 = vshrl.u32 %v1597_v61, 30  ;;  %v1255_v9 = vor.u32 %v1254_v54, %v1253_v63  ;;  %v1265_v11 = vsel %vm1259_vm15, %v1252_v60, 920167782 }
  0xcf   : > { %v1432_v12 = vand.u32 2147483647, %v6579_v7  ;;  %v1384_v32 = vadd.s32 %v6552_v31, %v6549_v29  ;;  %v1272_v36 = vshll.u32 %v1232_v33, 8  ;;  %v5845_v40 = vadd.s32 4294967169, %v1436_v56 }
  0xd0   : > { %v1396_v16 = vclz %v5842_v2  ;;  %v1599_v41 = vshll.u32 %v6637_v8, 30  ;;  %v1240_v19 = vshrl.u32 %v6266_v28, %v1239_v21  ;;  %vm1256_vm2 = vcmp.lt.s32.totalorder %v6611_v42, 1 }
  0xd1   : > { %vm1258_vm3 = vcmp.lt.s32.totalorder %v6611_v42, 3  ;;  %v1264_v45 = vsel %vm1256_vm2, %v1243_v62, %v1246_v3  ;;  %v1268_v23 = vsel %vm1256_vm2, %v1246_v3, %v1249_v4  ;;  %v1414_v26 = vsub.s32 4, %v6595_v18 }
  0xd2   : > { %v5843_v44 = vadd.s32 4294967294, %v1396_v16  ;;  %v1266_v46 = vsel %vm1258_vm3, %v1249_v4, %v1265_v11  ;;  %v6652_v29 = vsub.s32 %v1596_v17, %v1599_v41  ;;  %v1261_v31 = vsel %vm1259_vm15, %v1249_v4, 2102212464 }
  0xd3   : > { %v1269_v21 = vsel %vm1259_vm15, %v1255_v9, 1326507024  ;;  %vm1257_vm5 = vcmp.lt.s32.totalorder %v6611_v42, 2  ;;  %v1260_v33 = vsel %vm1256_vm2, %v1240_v19, %v1243_v62  ;;  %v1262_v59 = vsel %vm1258_vm3, %v1246_v3, %v1261_v31 }
  0xd4   : > { %vm5844_vm4 = vcmp.lt.s32.totalorder %v5843_v44, 0  ;;  %v1270_v49 = vsel %vm1258_vm3, %v1252_v60, %v1269_v21  ;;  %v1602_v54 = vsub.s32 0, %v6652_v29  ;;  %v1267_v17 = vsel %vm1257_vm5, %v1264_v45, %v1266_v46 }
  0xd5   : > { %v1399_v50 = vsel %vm5844_vm4, 0, %v5843_v44  ;;  %v1271_v56 = vsel %vm1257_vm5, %v1268_v23, %v1270_v49  ;;  %v1442_v61 = vadd.s32 1, %v5845_v40  ;;  %v1415_v41 = vsel %vm1330_vm1, %v1414_v26, %v6595_v18 }
  0xd6   : > { %v1400_v57 = vsub.s32 32, %v1399_v50  ;;  %v1404_v25 = vsub.s32 4294967266, %v1399_v50  ;;  %v1401_v62 = vshll.u32 %v6618_v48, %v1399_v50  ;;  %v5850_v63 = vmin.u32 %v1602_v54, %v6652_v29 }
  0xd7   : > { %v6670_v60 = vmul.u32.u64.low %v1272_v36, %v1271_v56  ;;  %v6671_v2 = vmul.u32.u64.high %v1272_v36, %v1271_v56, %v6670_v60  ;;  %v6673_v11 = vmul.u32.u64.low %v1272_v36, %v1267_v17  ;;  %v6674_v16 = vmul.u32.u64.high %v1272_v36, %v1267_v17, %v6673_v11 }
  0xd8   : > { %v1402_v4 = vshrl.u32 %v1384_v32, %v1400_v57  ;;  %v1405_v9 = vadd.s32 127, %v1404_v25  ;;  %vm1538_vm6 = vcmp.lt.s32.totalorder %v6474_v53, 0  ;;  %v1604_v3 = vclz %v5850_v63 }
  0xd9   : > { %v783_v48 = vfloor.f32 %v6602_v38  ;;  %v1263_v44 = vsel %vm1257_vm5, %v1260_v33, %v1262_v59  ;;  %vm1443_vm7 = vcmp.gt.s32.totalorder %v1442_v61, 0  ;;  %vm6686_vm8 = vcmp.le.f32.partialorder %v1328_v55, 0.7853982 }
  0xda   : > { %v1403_v40 = vor.u32 %v1402_v4, %v1401_v62  ;;  %v1406_v19 = vshll.u32 %v1405_v9, 23  ;;  %v5851_v45 = vadd.s32 4294967294, %v1604_v3  ;;  %vm1281_vm9 = vc.u32 %v6671_v2, %v6673_v11 }
  0xdb   : > { %v1444_v18 = vsel %vm1443_vm7, %v1442_v61, 0  ;;  %v1622_v23 = vsub.s32 4, %v6637_v8  ;;  %v1282_v26 = vadd.s32 1, %v6674_v16  ;;  %v1439_v42 = vand.u32 8388607, %v1432_v12 }
  0xdc   : > { %v1407_v46 = vor.u32 4788187, %v1406_v19  ;;  %v6698_v31 = vsel %vm6686_vm8, 0, %v1415_v41  ;;  %vm5852_vm10 = vcmp.lt.s32.totalorder %v5851_v45, 0  ;;  %v1279_v55 = vmul.u32 %v1272_v36, %v1263_v44 }
  0xdd   : > { %v1446_v21 = vand.u32 31, %v1444_v18  ;;  %v1410_v49 = vcvt.s32.f32 %v1403_v40  ;;  %v1607_v50 = vsel %vm5852_vm10, 0, %v5851_v45  ;;  %v1283_v54 = vsel %vm1281_vm9, %v1282_v26, %v6674_v16 }
  0xde   : > { %v1408_v33 = vand.u32 2147483647, %v1407_v46  ;;  %v1592_v17 = vadd.s32 %v6584_v10, %v6592_v20  ;;  %v1608_v56 = vsub.s32 32, %v1607_v50  ;;  %v1612_v57 = vsub.s32 4294967266, %v1607_v50 }
  0xdf   : > { %v1284_v25 = vadd.s32 %v1283_v54, %v1279_v55  ;;  %v1421_v61 = vadd.s32 3, %v6698_v31  ;;  %vm6706_vm11 = vcmp.le.f32.partialorder %v1536_v58, 0.7853982  ;;  %v1623_v36 = vsel %vm1538_vm6, %v1622_v23, %v6637_v8 }
  0xe0   : > { %v1411_v59 = vmul.f32 %v1410_v49, %v1408_v33  ;;  %v1447_v63 = vsub.s32 32, %v1446_v21  ;;  %v1609_v60 = vshll.u32 %v6652_v29, %v1607_v50  ;;  %v1610_v10 = vshrl.u32 %v1592_v17, %v1608_v56 }
  0xe1   : > { %v1613_v20 = vadd.s32 127, %v1612_v57  ;;  %v1285_v4 = vadd.s32 536870912, %v1284_v25  ;;  %v1440_v16 = vor.u32 8388608, %v1439_v42  ;;  %v6714_v41 = vshrl.u32 %v1444_v18, 5 }
  0xe2   : > { %v1412_v9 = vxor.u32 2147483648, %v1411_v59  ;;  %v1449_v3 = vshll.u32 %v6266_v28, %v1446_v21  ;;  %v1611_v58 = vor.u32 %v1610_v10, %v1609_v60  ;;  %v1456_v44 = vshrl.u32 %v6269_v37, %v1447_v63 }
  0xe3   : > { %v1614_v40 = vshll.u32 %v1613_v20, 23  ;;  %v6717_v19 = vshrl.u32 %v1285_v4, 30  ;;  %v1450_v29 = vshrl.u32 %v8683_v30, %v1447_v63  ;;  %v1452_v45 = vshll.u32 %v8683_v30, %v1446_v21 }
  0xe4   : > { %v1413_v8 = vsel %vm1330_vm1, %v1412_v9, %v1411_v59  ;;  %v1453_v46 = vshrl.u32 %v8686_v34, %v1447_v63  ;;  %v1455_v42 = vshll.u32 %v8686_v34, %v1446_v21  ;;  %v1618_v55 = vcvt.s32.f32 %v1611_v58 }
  0xe5   : > { %v1416_v18 = vsel %vm6686_vm8, %v6472_v52, %v1413_v8  ;;  %v1615_v23 = vor.u32 4788187, %v1614_v40  ;;  %v1287_v26 = vshll.u32 %v6717_v19, 30  ;;  %v1458_v33 = vshll.u32 %v6269_v37, %v1446_v21 }
  0xe6   : > { %6136 = vcosq.f32 %v1416_v18  ;;  %v1459_v49 = vshrl.u32 %v6270_v39, %v1447_v63  ;;  %v1457_v17 = vor.u32 %v1456_v44, %v1455_v42  ;;  %v1451_v56 = vor.u32 %v1450_v29, %v1449_v3 }
  0xe7   : > { %6138 = vsinq.f32 %v1416_v18  ;;  %v1616_v50 = vand.u32 2147483647, %v1615_v23  ;;  %v6732_v54 = vsub.s32 %v1284_v25, %v1287_v26  ;;  %v1454_v57 = vor.u32 %v1453_v46, %v1452_v45 }
  0xe8   : > { %v1460_v32 = vor.u32 %v1459_v49, %v1458_v33  ;;  %v1462_v59 = vshrl.u32 %v8690_v47, %v1447_v63  ;;  %v6735_v60 = vand.u32 3, %v1421_v61  ;;  %v6739_v20 = vsel %vm6706_vm11, 0, %v1623_v36 }
  0xe9   : > { %v1619_v10 = vmul.f32 %v1618_v55, %v1616_v50  ;;  %v1290_v4 = vsub.s32 0, %v6732_v54  ;;  %v1461_v9 = vshll.u32 %v6270_v39, %v1446_v21  ;;  %vm1464_vm12 = vcmp.lt.s32.totalorder %v6714_v41, 1 }
  0xea   : > { %vm1467_vm13 = vcmp.lt.s32.totalorder %v6714_v41, 4  ;;  %v6745_v25 = vshll.u32 %v1440_v16, 8  ;;  %v1448_v61 = vshrl.u32 %v6266_v28, %v1447_v63  ;;  %vm1466_vm14 = vcmp.lt.s32.totalorder %v6714_v41, 3 }
  0xeb   : > { %v1620_v3 = vxor.u32 2147483648, %v1619_v10  ;;  %v5838_v58 = vmin.u32 %v1290_v4, %v6732_v54  ;;  %v1469_v40 = vsel %vm1467_vm13, %v1457_v17, 2102212464  ;;  %v1463_v36 = vor.u32 %v1462_v59, %v1461_v9 }
  0xec   : > { %v1472_v21 = vsel %vm1464_vm12, %v1451_v56, %v1454_v57  ;;  %v1473_v44 = vsel %vm1467_vm13, %v1460_v32, 920167782  ;;  %v789_v63 = vsub.f32 %v6488_v13, %v781_v0  ;;  %vm1465_vm15 = vcmp.lt.s32.totalorder %v6714_v41, 2 }
  0xed   : > { %v1621_v16 = vsel %vm1538_vm6, %v1620_v3, %v1619_v10  ;;  %v1292_v8 = vclz %v5838_v58  ;;  %v1474_v29 = vsel %vm1466_vm14, %v1457_v17, %v1473_v44  ;;  %v1468_v46 = vsel %vm1464_vm12, %v1448_v61, %v1451_v56 }
  0xee   : > { %v1624_v45 = vsel %vm6706_vm11, %v6474_v53, %v1621_v16  ;;  %v1470_v18 = vsel %vm1466_vm14, %v1454_v57, %v1469_v40  ;;  %v1475_v26 = vsel %vm1465_vm15, %v1472_v21, %v1474_v29  ;;  %v1476_v13 = vsel %vm1464_vm12, %v1454_v57, %v1457_v17 }
  0xef   : > { %6140 = vcosq.f32 %v1624_v45  ;;  %v5839_v23 = vadd.s32 4294967294, %v1292_v8  ;;  %vm1420_vm1 = vweird.f32 %v6472_v52  ;;  %vm1226_vm2 = vcmp.lt.s32.totalorder %v6470_v51, 0 }
  0xf0   : > { %6142 = vsinq.f32 %v1624_v45  ;;  %v1477_v27 = vsel %vm1467_vm13, %v1463_v36, 1326507024  ;;  %v6780_v0 = vmul.u32.u64.low %v6745_v25, %v1475_v26  ;;  %v6781_v62 = vmul.u32.u64.high %v6745_v25, %v1475_v26, %v6780_v0 }
  0xf1   : > { %vm1427_vm3 = vcmp.eq.s32.totalorder %v6735_v60, 2  ;;  %v1629_v42 = vadd.s32 3, %v6739_v20  ;;  %vm5840_vm4 = vcmp.lt.s32.totalorder %v5839_v23, 0  ;;  %v1478_v55 = vsel %vm1466_vm14, %v1460_v32, %v1477_v27 }
  0xf2   : > { %v1280_v33 = vadd.s32 %v6673_v11, %v6671_v2  ;;  %v1295_v49 = vsel %vm5840_vm4, 0, %v5839_v23  ;;  %v1479_v50 = vsel %vm1465_vm15, %v1476_v13, %v1478_v55  ;;  %v6792_v17 = vmul.f32 6.2831855, %v789_v63 }
  0xf3   : > { %v6794_v56 = vpop.eup %6136  ;;  %v1296_v57 = vsub.s32 32, %v1295_v49  ;;  %v1300_v59 = vsub.s32 4294967266, %v1295_v49  ;;  %v1310_v10 = vsub.s32 4, %v6717_v19  ;;  %v1471_v4 = vsel %vm1465_vm15, %v1468_v46, %v1470_v18 }
  0xf4   : > { %v6799_v9 = vpop.eup %6138  ;;  %v8678_v32 = vxor.u32 2147483648, %v6794_v56  ;;  %v1297_v2 = vshll.u32 %v6732_v54, %v1295_v49  ;;  %v6804_v11 = vmul.u32.u64.low %v6745_v25, %v1479_v50  ;;  %v6805_v3 = vmul.u32.u64.high %v6745_v25, %v1479_v50, %v6804_v11 }
  0xf5   : > { %v8679_v58 = vxor.u32 2147483648, %v6799_v9  ;;  %v1298_v61 = vshrl.u32 %v1280_v33, %v1296_v57  ;;  %v1301_v40 = vadd.s32 127, %v1300_v59  ;;  %v1490_v36 = vadd.s32 1, %v6781_v62 }
  0xf6   : > { %vm1423_vm5 = vcmp.lt.s32.totalorder %v6735_v60, 2  ;;  %vm1424_vm6 = vcmp.eq.s32.totalorder %v6735_v60, 0  ;;  %v1429_v41 = vsel %vm1427_vm3, %v8678_v32, %v6799_v9  ;;  %v915_v54 = vand.u32 2139095040, %v6792_v17 }
  0xf7   : > { %v1426_v21 = vsel %vm1424_vm6, %v6794_v56, %v8679_v58  ;;  %v1630_v44 = vand.u32 3, %v1629_v42  ;;  %v1299_v16 = vor.u32 %v1298_v61, %v1297_v2  ;;  %v1302_v8 = vshll.u32 %v1301_v40, 23 }
  0xf8   : > { %v1430_v29 = vsel %vm1423_vm5, %v1426_v21, %v1429_v41  ;;  %v1487_v63 = vmul.u32 %v6745_v25, %v1471_v4  ;;  %vm1489_vm7 = vc.u32 %v6805_v3, %v6780_v0  ;;  %v791_v60 = vsub.f32 %v6491_v14, %v783_v48 }
  0xf9   : > { %v1431_v45 = vsel %vm1420_vm1, nan, %v1430_v29  ;;  %v1303_v46 = vor.u32 4788187, %v1302_v8  ;;  %v1311_v18 = vsel %vm1226_vm2, %v1310_v10, %v6717_v19  ;;  %v1491_v23 = vsel %vm1489_vm7, %v1490_v36, %v6781_v62 }
  0xfa   : > { %5853 = vmatprep.subr.msk.mxu0 %vm531_vm0, %v1431_v45  ;;  %vm1628_vm8 = vweird.f32 %v6474_v53  ;;  %v1492_v25 = vadd.s32 %v1491_v23, %v1487_v63  ;;  %v916_v26 = vshrl.u32 %v915_v54, 23  ;;  %v780_v38 = vfloor.f32 %v6605_v24 }
  0xfb   : > { %vm6837_vm9 = vcmp.le.f32.partialorder %v1224_v22, 0.7853982  ;;  %v1304_v48 = vand.u32 2147483647, %v1303_v46  ;;  %v1306_v13 = vcvt.s32.f32 %v1299_v16  ;;  %v912_v19 = vand.u32 2147483647, %v6792_v17 }
  0xfc   : > { %v6842_v27 = vpop.eup %6140  ;;  %v6846_v62 = vsel %vm6837_vm9, 0, %v1311_v18  ;;  %v1493_v42 = vadd.s32 536870912, %v1492_v25  ;;  %v5825_v55 = vadd.s32 4294967169, %v916_v26  ;;  %v6848_v33 = vmul.f32 6.2831855, %v791_v60 }
  0xfd   : > { %v6850_v49 = vpop.eup %6142  ;;  %vm1631_vm10 = vcmp.lt.s32.totalorder %v1630_v44, 2  ;;  %vm1632_vm11 = vcmp.eq.s32.totalorder %v1630_v44, 0  ;;  %v8674_v22 = vxor.u32 2147483648, %v6842_v27  ;;  %v1307_v50 = vmul.f32 %v1306_v13, %v1304_v48 }
  0xfe   : > { %v8677_v57 = vxor.u32 2147483648, %v6850_v49  ;;  %vm1635_vm12 = vcmp.eq.s32.totalorder %v1630_v44, 2  ;;  %v1494_v59 = vshrl.u32 %v1493_v42, 30  ;;  %v922_v10 = vadd.s32 1, %v5825_v55 }
  0xff   : > { %v1637_v4 = vsel %vm1635_vm12, %v8674_v22, %v6850_v49  ;;  %v1308_v2 = vxor.u32 2147483648, %v1307_v50  ;;  %v1317_v11 = vadd.s32 3, %v6846_v62  ;;  %v919_v61 = vand.u32 8388607, %v912_v19 }
 0x100   : > { %v1634_v40 = vsel %vm1632_vm11, %v6842_v27, %v8677_v57  ;;  %v1495_v36 = vshll.u32 %v1494_v59, 30  ;;  %vm923_vm13 = vcmp.gt.s32.totalorder %v922_v10, 0  ;;  %v1123_v41 = vand.u32 2139095040, %v6848_v33 }
 0x101   : > { %v1638_v54 = vsel %vm1631_vm10, %v1634_v40, %v1637_v4  ;;  %v1309_v21 = vsel %vm1226_vm2, %v1308_v2, %v1307_v50  ;;  %v1518_v16 = vsub.s32 4, %v1494_v59  ;;  %v924_v8 = vsel %vm923_vm13, %v922_v10, 0 }
 0x102   : > { %v1639_v29 = vsel %vm1628_vm8, nan, %v1638_v54  ;;  %v1312_v63 = vsel %vm6837_vm9, %v6470_v51, %v1309_v21  ;;  %vm1434_vm14 = vcmp.lt.s32.totalorder %v6579_v7, 0  ;;  %v6873_v60 = vsub.s32 %v1492_v25, %v1495_v36 }
 0x103   : > { %5859 = vmatprep.subr.msk.mxu1 %vm531_vm0, %v1639_v29  ;;  %6144 = vcosq.f32 %v1312_v63  ;;  %v6876_v44 = vand.u32 3, %v1317_v11  ;;  %vm6880_vm15 = vcmp.le.f32.partialorder %v1432_v12, 0.7853982  ;;  %v926_v46 = vand.u32 31, %v924_v8 }
 0x104   : > { %6146 = vsinq.f32 %v1312_v63  ;;  %v1498_v18 = vsub.s32 0, %v6873_v60  ;;  %v920_v23 = vor.u32 8388608, %v919_v61  ;;  %v1124_v26 = vshrl.u32 %v1123_v41, 23 }
 0x105   : > { %v1488_v25 = vadd.s32 %v6780_v0, %v6805_v3  ;;  %v1519_v14 = vsel %vm1434_vm14, %v1518_v16, %v1494_v59  ;;  %v927_v48 = vsub.s32 32, %v926_v46  ;;  %v1120_v13 = vand.u32 2147483647, %v6848_v33 }
 0x106   : > { %v5846_v12 = vmin.u32 %v1498_v18, %v6873_v60  ;;  %v6891_v42 = vshrl.u32 %v924_v8, 5  ;;  %v929_v55 = vshll.u32 %v6266_v28, %v926_v46  ;;  %v932_v50 = vshll.u32 %v8683_v30, %v926_v46 }
 0x107   : > { %v930_v10 = vshrl.u32 %v8683_v30, %v927_v48  ;;  %v933_v4 = vshrl.u32 %v8686_v34, %v927_v48  ;;  %v935_v0 = vshll.u32 %v8686_v34, %v926_v46  ;;  %v936_v3 = vshrl.u32 %v6269_v37, %v927_v48 }
 0x108   : > { %v1500_v59 = vclz %v5846_v12  ;;  %v938_v2 = vshll.u32 %v6269_v37, %v926_v46  ;;  %v6900_v11 = vshll.u32 %v920_v23, 8  ;;  %v5833_v61 = vadd.s32 4294967169, %v1124_v26 }
 0x109   : > { %v931_v40 = vor.u32 %v930_v10, %v929_v55  ;;  %v934_v36 = vor.u32 %v933_v4, %v932_v50  ;;  %v937_v41 = vor.u32 %v936_v3, %v935_v0  ;;  %v939_v54 = vshrl.u32 %v6270_v39, %v927_v48 }
 0x10a   : > { %vm1323_vm2 = vcmp.eq.s32.totalorder %v6876_v44, 2  ;;  %v5847_v21 = vadd.s32 4294967294, %v1500_v59  ;;  %v6906_v16 = vsel %vm6880_vm15, 0, %v1519_v14  ;;  %v941_v8 = vshll.u32 %v6270_v39, %v926_v46 }
 0x10b   : > { %v942_v29 = vshrl.u32 %v8690_v47, %v927_v48  ;;  %vm1320_vm3 = vcmp.eq.s32.totalorder %v6876_v44, 0  ;;  %v928_v63 = vshrl.u32 %v6266_v28, %v927_v48  ;;  %v940_v18 = vor.u32 %v939_v54, %v938_v2 }
 0x10c   : > { %vm944_vm4 = vcmp.lt.s32.totalorder %v6891_v42, 1  ;;  %vm947_vm5 = vcmp.lt.s32.totalorder %v6891_v42, 4  ;;  %vm1319_vm6 = vcmp.lt.s32.totalorder %v6876_v44, 2  ;;  %vm5848_vm7 = vcmp.lt.s32.totalorder %v5847_v21, 0 }
 0x10d   : > { %v943_v23 = vor.u32 %v942_v29, %v941_v8  ;;  %vm945_vm9 = vcmp.lt.s32.totalorder %v6891_v42, 2  ;;  %v949_v46 = vsel %vm947_vm5, %v937_v41, 2102212464  ;;  %vm1316_vm10 = vweird.f32 %v6470_v51 }
 0x10e   : > { %v1503_v26 = vsel %vm5848_vm7, 0, %v5847_v21  ;;  %vm946_vm11 = vcmp.lt.s32.totalorder %v6891_v42, 3  ;;  %v952_v14 = vsel %vm944_vm4, %v931_v40, %v934_v36  ;;  %v953_v48 = vsel %vm947_vm5, %v940_v18, 920167782 }
 0x10f   : > { %v1504_v12 = vsub.s32 32, %v1503_v26  ;;  %v1508_v55 = vsub.s32 4294967266, %v1503_v26  ;;  %v948_v50 = vsel %vm944_vm4, %v928_v63, %v931_v40  ;;  %v956_v10 = vsel %vm944_vm4, %v934_v36, %v937_v41 }
 0x110   : > { %v1505_v4 = vshll.u32 %v6873_v60, %v1503_v26  ;;  %v950_v0 = vsel %vm946_vm11, %v934_v36, %v949_v46  ;;  %v954_v3 = vsel %vm946_vm11, %v937_v41, %v953_v48  ;;  %v957_v59 = vsel %vm947_vm5, %v943_v23, 1326507024  ;;  %v6925_v2 = vpop.eup %6144 }
 0x111   : > { %v1506_v54 = vshrl.u32 %v1488_v25, %v1504_v12  ;;  %v1509_v21 = vadd.s32 127, %v1508_v55  ;;  %v955_v8 = vsel %vm945_vm9, %v952_v14, %v954_v3  ;;  %v958_v29 = vsel %vm946_vm11, %v940_v18, %v957_v59  ;;  %v6929_v6 = vpop.eup %6146 }
 0x112   : > { %v8675_v40 = vxor.u32 2147483648, %v6925_v2  ;;  %v959_v60 = vsel %vm945_vm9, %v956_v10, %v958_v29  ;;  %v6935_v36 = vmul.u32.u64.low %v6900_v11, %v955_v8  ;;  %v6936_v41 = vmul.u32.u64.high %v6900_v11, %v955_v8, %v6935_v36 }
 0x113   : > { %v8676_v63 = vxor.u32 2147483648, %v6929_v6  ;;  %v1507_v25 = vor.u32 %v1506_v54, %v1505_v4  ;;  %v1510_v23 = vshll.u32 %v1509_v21, 23  ;;  %v1130_v46 = vadd.s32 1, %v5833_v61 }
 0x114   : > { %v1325_v18 = vsel %vm1323_vm2, %v8675_v40, %v6929_v6  ;;  %v6946_v26 = vmul.u32.u64.low %v6900_v11, %v959_v60  ;;  %v6947_v14 = vmul.u32.u64.high %v6900_v11, %v959_v60, %v6946_v26  ;;  %v1127_v48 = vand.u32 8388607, %v1120_v13 }
 0x115   : > { %v1322_v12 = vsel %vm1320_vm3, %v6925_v2, %v8676_v63  ;;  %v1511_v61 = vor.u32 4788187, %v1510_v23  ;;  %v951_v55 = vsel %vm945_vm9, %v948_v50, %v950_v0  ;;  %vm1131_vm12 = vcmp.gt.s32.totalorder %v1130_v46, 0 }
 0x116   : > { %v1326_v10 = vsel %vm1319_vm6, %v1322_v12, %v1325_v18  ;;  %v970_v4 = vadd.s32 1, %v6936_v41  ;;  %v1132_v3 = vsel %vm1131_vm12, %v1130_v46, 0  ;;  %v788_v59 = vsub.f32 %v6494_v15, %v780_v38 }
 0x117   : > { %v1327_v54 = vsel %vm1316_vm10, nan, %v1326_v10  ;;  %v1512_v21 = vand.u32 2147483647, %v1511_v61  ;;  %v1514_v8 = vcvt.s32.f32 %v1507_v25  ;;  %v1134_v29 = vand.u32 31, %v1132_v3 }
 0x118   : > { %5854 = vmatpush1.msk.msra.mxu0 %vm531_vm0, %v1327_v54  ;;  %v1525_v42 = vadd.s32 3, %v6906_v16  ;;  %v967_v44 = vmul.u32 %v6900_v11, %v951_v55  ;;  %vm969_vm13 = vc.u32 %v6947_v14, %v6935_v36  ;;  %v1128_v50 = vor.u32 8388608, %v1127_v48 }
 0x119   : > { %v1515_v0 = vmul.f32 %v1514_v8, %v1512_v21  ;;  %v971_v24 = vsel %vm969_vm13, %v970_v4, %v6936_v41  ;;  %v1133_v15 = vshrl.u32 %v1132_v3, 5  ;;  %v1135_v38 = vsub.s32 32, %v1134_v29 }
 0x11a   : > { %v972_v60 = vadd.s32 %v971_v24, %v967_v44  ;;  %v1137_v23 = vshll.u32 %v6266_v28, %v1134_v29  ;;  %v1140_v25 = vshll.u32 %v8683_v30, %v1134_v29  ;;  %v1143_v46 = vshll.u32 %v8686_v34, %v1134_v29 }
 0x11b   : > { %v1516_v18 = vxor.u32 2147483648, %v1515_v0  ;;  %v1138_v26 = vshrl.u32 %v8683_v30, %v1135_v38  ;;  %v1141_v11 = vshrl.u32 %v8686_v34, %v1135_v38  ;;  %v1146_v12 = vshll.u32 %v6269_v37, %v1134_v29 }
 0x11c   : > { %v973_v48 = vadd.s32 536870912, %v972_v60  ;;  %v1144_v61 = vshrl.u32 %v6269_v37, %v1135_v38  ;;  %v1147_v41 = vshrl.u32 %v6270_v39, %v1135_v38  ;;  %v1149_v55 = vshll.u32 %v6270_v39, %v1134_v29 }
 0x11d   : > { %v1517_v10 = vsel %vm1434_vm14, %v1516_v18, %v1515_v0  ;;  %v1139_v4 = vor.u32 %v1138_v26, %v1137_v23  ;;  %v1142_v3 = vor.u32 %v1141_v11, %v1140_v25  ;;  %v1150_v54 = vshrl.u32 %v8690_v47, %v1135_v38 }
 0x11e   : > { %v1520_v21 = vsel %vm6880_vm15, %v6579_v7, %v1517_v10  ;;  %v974_v8 = vshrl.u32 %v973_v48, 30  ;;  %v1145_v44 = vor.u32 %v1144_v61, %v1143_v46  ;;  %v1148_v24 = vor.u32 %v1147_v41, %v1146_v12 }
 0x11f   : > { %6148 = vcosq.f32 %v1520_v21  ;;  %v6987_v22 = vand.u32 3, %v1525_v42  ;;  %v1151_v40 = vor.u32 %v1150_v54, %v1149_v55  ;;  %vm1152_vm2 = vcmp.lt.s32.totalorder %v1133_v15, 1 }
 0x120   : > { %6150 = vsinq.f32 %v1520_v21  ;;  %v975_v29 = vshll.u32 %v974_v8, 30  ;;  %v1168_v63 = vshll.u32 %v1128_v50, 8  ;;  %v1136_v0 = vshrl.u32 %v6266_v28, %v1135_v38 }
 0x121   : > { %vm1155_vm14 = vcmp.lt.s32.totalorder %v1133_v15, 4  ;;  %v1160_v23 = vsel %vm1152_vm2, %v1139_v4, %v1142_v3  ;;  %v6991_v25 = vmul.f32 6.2831855, %v788_v59  ;;  %vm1154_vm15 = vcmp.lt.s32.totalorder %v1133_v15, 3 }
 0x122   : > { %v6993_v45 = vsub.s32 %v972_v60, %v975_v29  ;;  %v1157_v46 = vsel %vm1155_vm14, %v1145_v44, 2102212464  ;;  %v1161_v18 = vsel %vm1155_vm14, %v1148_v24, 920167782  ;;  %vm1153_vm3 = vcmp.lt.s32.totalorder %v1133_v15, 2 }
 0x123   : > { %v1162_v42 = vsel %vm1154_vm15, %v1145_v44, %v1161_v18  ;;  %v1164_v26 = vsel %vm1152_vm2, %v1142_v3, %v1145_v44  ;;  %v1165_v11 = vsel %vm1155_vm14, %v1151_v40, 1326507024  ;;  %v998_v50 = vsub.s32 4, %v974_v8 }
 0x124   : > { %v978_v12 = vsub.s32 0, %v6993_v45  ;;  %v1156_v38 = vsel %vm1152_vm2, %v1136_v0, %v1139_v4  ;;  %v1163_v48 = vsel %vm1153_vm3, %v1160_v23, %v1162_v42  ;;  %v1158_v61 = vsel %vm1154_vm15, %v1142_v3, %v1157_v46 }
 0x125   : > { %v1166_v59 = vsel %vm1154_vm15, %v1148_v24, %v1165_v11  ;;  %v6999_v41 = vmul.u32.u64.low %v1168_v63, %v1163_v48  ;;  %v7000_v60 = vmul.u32.u64.high %v1168_v63, %v1163_v48, %v6999_v41  ;;  %vm914_vm4 = vcmp.lt.s32.totalorder %v6792_v17, 0 }
 0x126   : > { %v5826_v55 = vmin.u32 %v978_v12, %v6993_v45  ;;  %v1167_v10 = vsel %vm1153_vm3, %v1164_v26, %v1166_v59  ;;  %v811_v21 = vand.u32 2139095040, %v6991_v25  ;;  %vm7011_vm5 = vcmp.le.f32.partialorder %v912_v19, 0.7853982 }
 0x127   : > { %v7005_v54 = vmul.u32.u64.low %v1168_v63, %v1167_v10  ;;  %v7006_v40 = vmul.u32.u64.high %v1168_v63, %v1167_v10, %v7005_v54  ;;  %v1159_v44 = vsel %vm1153_vm3, %v1156_v38, %v1158_v61  ;;  %v766_v24 = vmul.f32 %v6466_v43, %v6485_v1 }
 0x128   : > { %v980_v3 = vclz %v5826_v55  ;;  %vm1524_vm6 = vweird.f32 %v6579_v7  ;;  %vm1527_vm7 = vcmp.lt.s32.totalorder %v6987_v22, 2  ;;  %v999_v29 = vsel %vm914_vm4, %v998_v50, %v974_v8 }
 0x129   : > { %v1178_v0 = vadd.s32 1, %v7000_v60  ;;  %v812_v23 = vshrl.u32 %v811_v21, 23  ;;  %vm1528_vm9 = vcmp.eq.s32.totalorder %v6987_v22, 0  ;;  %vm1531_vm11 = vcmp.eq.s32.totalorder %v6987_v22, 2 }
 0x12a   : > { %v5827_v19 = vadd.s32 4294967294, %v980_v3  ;;  %v8682_v15 = vand.u32 2147483647, %v6991_v25  ;;  %v968_v43 = vadd.s32 %v6935_v36, %v6947_v14  ;;  %v1175_v46 = vmul.u32 %v1168_v63, %v1159_v44 }
 0x12b   : > { %vm1177_vm12 = vc.u32 %v7006_v40, %v6999_v41  ;;  %v5821_v18 = vadd.s32 4294967169, %v812_v23  ;;  %v7033_v8 = vsel %vm7011_vm5, 0, %v999_v29  ;;  %v774_v11 = vadd.f32 0.5, %v766_v24 }
 0x12c   : > { %v7029_v42 = vpop.eup %6148  ;;  %vm5828_vm13 = vcmp.lt.s32.totalorder %v5827_v19, 0  ;;  %v1179_v26 = vsel %vm1177_vm12, %v1178_v0, %v7000_v60  ;;  %v815_v59 = vand.u32 8388607, %v8682_v15  ;;  %v1176_v22 = vadd.s32 %v6999_v41, %v7006_v40 }
 0x12d   : > { %v7036_v12 = vpop.eup %6150  ;;  %v8680_v50 = vxor.u32 2147483648, %v7029_v42  ;;  %v983_v38 = vsel %vm5828_vm13, 0, %v5827_v19  ;;  %v1180_v36 = vadd.s32 %v1179_v26, %v1175_v46  ;;  %v818_v63 = vadd.s32 1, %v5821_v18 }
 0x12e   : > { %v8681_v14 = vxor.u32 2147483648, %v7036_v12  ;;  %v984_v48 = vsub.s32 32, %v983_v38  ;;  %v988_v61 = vsub.s32 4294967266, %v983_v38  ;;  %v985_v55 = vshll.u32 %v6993_v45, %v983_v38 }
 0x12f   : > { %v1533_v60 = vsel %vm1531_vm11, %v8680_v50, %v7036_v12  ;;  %v1181_v10 = vadd.s32 536870912, %v1180_v36  ;;  %vm819_vm2 = vcmp.gt.s32.totalorder %v818_v63, 0  ;;  %v782_v19 = vfloor.f32 %v774_v11 }
 0x130   : > { %v1530_v54 = vsel %vm1528_vm9, %v7029_v42, %v8681_v14  ;;  %v986_v21 = vshrl.u32 %v968_v43, %v984_v48  ;;  %v989_v3 = vadd.s32 127, %v988_v61  ;;  %v820_v44 = vsel %vm819_vm2, %v818_v63, 0 }
 0x131   : > { %v1534_v29 = vsel %vm1527_vm7, %v1530_v54, %v1533_v60  ;;  %v7055_v0 = vshrl.u32 %v1181_v10, 30  ;;  %v822_v23 = vand.u32 31, %v820_v44  ;;  %v7062_v63 = vadd.s32 3, %v7033_v8 }
 0x132   : > { %v1535_v45 = vsel %vm1524_vm6, nan, %v1534_v29  ;;  %v987_v46 = vor.u32 %v986_v21, %v985_v55  ;;  %v990_v18 = vshll.u32 %v989_v3, 23  ;;  %v816_v61 = vor.u32 8388608, %v815_v59 }
 0x133   : > { %5860 = vmatpush1.msk.msra.mxu1 %vm531_vm0, %v1535_v45  ;;  %v1183_v26 = vshll.u32 %v7055_v0, 30  ;;  %v823_v38 = vsub.s32 32, %v822_v23  ;;  %v790_v60 = vsub.f32 %v766_v24, %v782_v19  ;;  %v821_v29 = vshrl.u32 %v820_v44, 5 }
 0x134   : > { %v991_v43 = vor.u32 4788187, %v990_v18  ;;  %v994_v55 = vcvt.s32.f32 %v987_v46  ;;  %v825_v45 = vshll.u32 %v6266_v28, %v822_v23  ;;  %v828_v18 = vshll.u32 %v8683_v30, %v822_v23 }
 0x135   : > { %v7065_v48 = vsub.s32 %v1180_v36, %v1183_v26  ;;  %v826_v11 = vshrl.u32 %v8683_v30, %v823_v38  ;;  %v829_v54 = vshrl.u32 %v8686_v34, %v823_v38  ;;  %v832_v21 = vshrl.u32 %v6269_v37, %v823_v38 }
 0x136   : > { %v992_v10 = vand.u32 2147483647, %v991_v43  ;;  %v831_v40 = vshll.u32 %v8686_v34, %v822_v23  ;;  %v834_v36 = vshll.u32 %v6269_v37, %v822_v23  ;;  %v835_v24 = vshrl.u32 %v6270_v39, %v823_v38 }
 0x137   : > { %v1186_v3 = vsub.s32 0, %v7065_v48  ;;  %v827_v19 = vor.u32 %v826_v11, %v825_v45  ;;  %v830_v46 = vor.u32 %v829_v54, %v828_v18  ;;  %v838_v26 = vshrl.u32 %v8690_v47, %v823_v38 }
 0x138   : > { %v995_v41 = vmul.f32 %v994_v55, %v992_v10  ;;  %v833_v57 = vor.u32 %v832_v21, %v831_v40  ;;  %v836_v44 = vor.u32 %v835_v24, %v834_v36  ;;  %v837_v32 = vshll.u32 %v6270_v39, %v822_v23 }
 0x139   : > { %v5834_v59 = vmin.u32 %v1186_v3, %v7065_v48  ;;  %v824_v10 = vshrl.u32 %v6266_v28, %v823_v38  ;;  %v856_v55 = vshll.u32 %v816_v61, 8  ;;  %v7080_v50 = vmul.f32 6.2831855, %v790_v60 }
 0x13a   : > { %v996_v43 = vxor.u32 2147483648, %v995_v41  ;;  %v839_v15 = vor.u32 %v838_v26, %v837_v32  ;;  %vm840_vm14 = vcmp.lt.s32.totalorder %v821_v29, 1  ;;  %vm841_vm15 = vcmp.lt.s32.totalorder %v821_v29, 2 }
 0x13b   : > { %v1188_v58 = vclz %v5834_v59  ;;  %vm842_vm3 = vcmp.lt.s32.totalorder %v821_v29, 3  ;;  %vm843_vm7 = vcmp.lt.s32.totalorder %v821_v29, 4  ;;  %v848_v38 = vsel %vm840_vm14, %v827_v19, %v830_v46 }
 0x13c   : > { %v997_v14 = vsel %vm914_vm4, %v996_v43, %v995_v41  ;;  %v845_v23 = vsel %vm843_vm7, %v833_v57, 2102212464  ;;  %v849_v61 = vsel %vm843_vm7, %v836_v44, 920167782  ;;  %v844_v60 = vsel %vm840_vm14, %v824_v10, %v827_v19 }
 0x13d   : > { %v1000_v11 = vsel %vm7011_vm5, %v6792_v17, %v997_v14  ;;  %v5835_v54 = vadd.s32 4294967294, %v1188_v58  ;;  %v850_v32 = vsel %vm842_vm3, %v833_v57, %v849_v61  ;;  %v852_v4 = vsel %vm840_vm14, %v830_v46, %v833_v57 }
 0x13e   : > { %6152 = vcosq.f32 %v1000_v11  ;;  %v851_v3 = vsel %vm841_vm15, %v848_v38, %v850_v32  ;;  %v853_v14 = vsel %vm843_vm7, %v839_v15, 1326507024  ;;  %v846_v18 = vsel %vm842_vm3, %v830_v46, %v845_v23 }
 0x13f   : > { %6154 = vsinq.f32 %v1000_v11  ;;  %vm5836_vm9 = vcmp.lt.s32.totalorder %v5835_v54, 0  ;;  %v854_v41 = vsel %vm842_vm3, %v836_v44, %v853_v14  ;;  %v847_v57 = vsel %vm841_vm15, %v844_v60, %v846_v18 }
 0x140   : > { %v1191_v21 = vsel %vm5836_vm9, 0, %v5835_v54  ;;  %v855_v36 = vsel %vm841_vm15, %v852_v4, %v854_v41  ;;  %v7096_v24 = vmul.u32.u64.low %v856_v55, %v851_v3  ;;  %v7097_v59 = vmul.u32.u64.high %v856_v55, %v851_v3, %v7096_v24 }
 0x141   : > { %v1192_v58 = vsub.s32 32, %v1191_v21  ;;  %v1196_v45 = vsub.s32 4294967266, %v1191_v21  ;;  %v1193_v40 = vshll.u32 %v7065_v48, %v1191_v21  ;;  %v1019_v15 = vand.u32 2139095040, %v7080_v50  ;;  %v7116_v21 = vld [vmem:[%s6410_s26] sm:$0xff]  ;;  %s5729_s26 = scalar_lea.sflag [#allocation3], %s459_s18 }
 0x142   : > { %v7100_v43 = vmul.u32.u64.low %v856_v55, %v855_v36  ;;  %v7101_v10 = vmul.u32.u64.high %v856_v55, %v855_v36, %v7100_v43  ;;  %v7106_v46 = vsub.s32 1, %v6400_v5  ;;  %v2915_v11 = vsub.s32 5, %v6400_v5 }
 0x143   : > { %v1194_v19 = vshrl.u32 %v1176_v22, %v1192_v58  ;;  %v1197_v26 = vadd.s32 127, %v1196_v45  ;;  %v866_v54 = vadd.s32 1, %v7097_v59  ;;  %v1020_v23 = vshrl.u32 %v1019_v15, 23 }
 0x144   : > { %v1006_v22 = vand.u32 3, %v7062_v63  ;;  %v863_v61 = vmul.u32 %v856_v55, %v847_v57  ;;  %vm865_vm4 = vc.u32 %v7101_v10, %v7096_v24  ;;  %v1206_v29 = vsub.s32 4, %v7055_v0 }
 0x145   : > { %v1195_v48 = vor.u32 %v1194_v19, %v1193_v40  ;;  %v1198_v44 = vshll.u32 %v1197_v26, 23  ;;  %v867_v60 = vsel %vm865_vm4, %v866_v54, %v7097_v59  ;;  %v5829_v32 = vadd.s32 4294967169, %v1020_v23 }
 0x146   : > { %v2908_v3 = vrot.slane %v7116_v21, %v7106_v46  ;;  %v868_v58 = vadd.s32 %v867_v60, %v863_v61  ;;  %v7121_v63 = vrot.slane %v7116_v21, %v2915_v11  ;;  %vm1122_vm5 = vcmp.lt.s32.totalorder %v6848_v33, 0 }
 0x147   : > { %v1199_v38 = vor.u32 4788187, %v1198_v44  ;;  %v1202_v14 = vcvt.s32.f32 %v1195_v48  ;;  %v8685_v55 = vand.u32 2147483647, %v7080_v50  ;;  %v1026_v45 = vadd.s32 1, %v5829_v32 }
 0x148   : > { %vm1007_vm11 = vcmp.lt.s32.totalorder %v1006_v22, 2  ;;  %vm7129_vm12 = vcmp.le.f32.partialorder %v1120_v13, 0.7853982  ;;  %v869_v36 = vadd.s32 536870912, %v868_v58  ;;  %vm1011_vm13 = vcmp.eq.s32.totalorder %v1006_v22, 2 }
 0x149   : > { %v1200_v4 = vand.u32 2147483647, %v1199_v38  ;;  %v1207_v26 = vsel %vm1122_vm5, %v1206_v29, %v7055_v0  ;;  %vm1027_vm2 = vcmp.gt.s32.totalorder %v1026_v45, 0  ;;  %vm1008_vm14 = vcmp.eq.s32.totalorder %v1006_v22, 0 }
 0x14a   : > { %v7140_v15 = vshrl.u32 %v869_v36, 30  ;;  %v1028_v13 = vsel %vm1027_vm2, %v1026_v45, 0  ;;  %v1023_v44 = vand.u32 8388607, %v8685_v55  ;;  %v7154_v23 = vsel %vm7129_vm12, 0, %v1207_v26 }
 0x14b   : > { %v7125_v18 = vpop.eup %6152  ;;  %v1203_v40 = vmul.f32 %v1202_v14, %v1200_v4  ;;  %v1030_v11 = vand.u32 31, %v1028_v13  ;;  %vm1004_vm15 = vweird.f32 %v6792_v17  ;;  %v7163_v32 = vrot.slane %v2908_v3, %v7106_v46 }
 0x14c   : > { %v7133_v59 = vpop.eup %6154  ;;  %v8688_v19 = vxor.u32 2147483648, %v7125_v18  ;;  %v871_v38 = vshll.u32 %v7140_v15, 30  ;;  %v1213_v45 = vadd.s32 3, %v7154_v23  ;;  %v1024_v22 = vor.u32 8388608, %v1023_v44 }
 0x14d   : > { %v8689_v43 = vxor.u32 2147483648, %v7133_v59  ;;  %v1204_v57 = vxor.u32 2147483648, %v1203_v40  ;;  %v1031_v60 = vsub.s32 32, %v1030_v11  ;;  %v1033_v36 = vshll.u32 %v6266_v28, %v1030_v11 }
 0x14e   : > { %v1013_v48 = vsel %vm1011_vm13, %v8688_v19, %v7133_v59  ;;  %v7167_v14 = vsub.s32 %v868_v58, %v871_v38  ;;  %v1036_v3 = vshll.u32 %v8683_v30, %v1030_v11  ;;  %v1214_v55 = vand.u32 3, %v1213_v45 }
 0x14f   : > { %v1010_v0 = vsel %vm1008_vm14, %v7125_v18, %v8689_v43  ;;  %v1205_v54 = vsel %vm1122_vm5, %v1204_v57, %v1203_v40  ;;  %v1034_v40 = vshrl.u32 %v8683_v30, %v1031_v60  ;;  %v1037_v26 = vshrl.u32 %v8686_v34, %v1031_v60 }
 0x150   : > { %v1014_v61 = vsel %vm1007_vm11, %v1010_v0, %v1013_v48  ;;  %v1208_v29 = vsel %vm7129_vm12, %v6848_v33, %v1205_v54  ;;  %v874_v41 = vsub.s32 0, %v7167_v14  ;;  %v1029_v57 = vshrl.u32 %v1028_v13, 5 }
 0x151   : > { %v1015_v4 = vsel %vm1004_vm15, nan, %v1014_v61  ;;  %6156 = vcosq.f32 %v1208_v29  ;;  %v1039_v48 = vshll.u32 %v8686_v34, %v1030_v11  ;;  %v1040_v58 = vshrl.u32 %v6269_v37, %v1031_v60 }
 0x152   : > { %1695 = vmatprep.subr.mxu0 %v1015_v4  ;;  %6158 = vsinq.f32 %v1208_v29  ;;  %v7178_v0 = vand.u32 3, %v6698_v31  ;;  %v5822_v44 = vmin.u32 %v874_v41, %v7167_v14  ;;  %v1035_v54 = vor.u32 %v1034_v40, %v1033_v36 }
 0x153   : > { %v1038_v38 = vor.u32 %v1037_v26, %v1036_v3  ;;  %v1043_v61 = vshrl.u32 %v6270_v39, %v1031_v60  ;;  %v1041_v29 = vor.u32 %v1040_v58, %v1039_v48  ;;  %v1042_v4 = vshll.u32 %v6269_v37, %v1030_v11 }
 0x154   : > { %v1045_v30 = vshll.u32 %v6270_v39, %v1030_v11  ;;  %v1046_v13 = vshrl.u32 %v8690_v47, %v1031_v60  ;;  %v864_v34 = vadd.s32 %v7096_v24, %v7101_v10  ;;  %v876_v19 = vclz %v5822_v44 }
 0x155   : > { %v1064_v31 = vshll.u32 %v1024_v22, 8  ;;  %v1032_v43 = vshrl.u32 %v6266_v28, %v1031_v60  ;;  %v1044_v41 = vor.u32 %v1043_v61, %v1042_v4  ;;  %vm1048_vm3 = vcmp.lt.s32.totalorder %v1029_v57, 1 }
 0x156   : > { %v1047_v40 = vor.u32 %v1046_v13, %v1045_v30  ;;  %v5823_v36 = vadd.s32 4294967294, %v876_v19  ;;  %vm1050_vm7 = vcmp.lt.s32.totalorder %v1029_v57, 3  ;;  %vm1051_vm9 = vcmp.lt.s32.totalorder %v1029_v57, 4 }
 0x157   : > { %v1056_v3 = vsel %vm1048_vm3, %v1035_v54, %v1038_v38  ;;  %v1053_v26 = vsel %vm1051_vm9, %v1041_v29, 2102212464  ;;  %v1057_v11 = vsel %vm1051_vm9, %v1044_v41, 920167782  ;;  %v1060_v48 = vsel %vm1048_vm3, %v1038_v38, %v1041_v29 }
 0x158   : > { %v1061_v45 = vsel %vm1051_vm9, %v1047_v40, 1326507024  ;;  %vm8692_vm4 = vweird.f32 %v6848_v33  ;;  %vm5824_vm5 = vcmp.lt.s32.totalorder %v5823_v36, 0  ;;  %vm1049_vm11 = vcmp.lt.s32.totalorder %v1029_v57, 2 }
 0x159   : > { %v1058_v24 = vsel %vm1050_vm7, %v1041_v29, %v1057_v11  ;;  %v1062_v10 = vsel %vm1050_vm7, %v1044_v41, %v1061_v45  ;;  %v879_v30 = vsel %vm5824_vm5, 0, %v5823_v36  ;;  %v894_v19 = vsub.s32 4, %v7140_v15 }
 0x15a   : > { %v1059_v60 = vsel %vm1049_vm11, %v1056_v3, %v1058_v24  ;;  %v1063_v22 = vsel %vm1049_vm11, %v1060_v48, %v1062_v10  ;;  %v880_v58 = vsub.s32 32, %v879_v30  ;;  %v884_v44 = vsub.s32 4294967266, %v879_v30 }
 0x15b   : > { %v1052_v61 = vsel %vm1048_vm3, %v1032_v43, %v1035_v54  ;;  %v1054_v4 = vsel %vm1050_vm7, %v1038_v38, %v1053_v26  ;;  %v7200_v40 = vmul.u32.u64.low %v1064_v31, %v1063_v22  ;;  %v7201_v47 = vmul.u32.u64.high %v1064_v31, %v1063_v22, %v7200_v40 }
 0x15c   : > { %v7203_v29 = vmul.u32.u64.low %v1064_v31, %v1059_v60  ;;  %v7204_v41 = vmul.u32.u64.high %v1064_v31, %v1059_v60, %v7203_v29  ;;  %v881_v11 = vshll.u32 %v7167_v14, %v879_v30  ;;  %v882_v48 = vshrl.u32 %v864_v34, %v880_v58 }
 0x15d   : > { %v885_v45 = vadd.s32 127, %v884_v44  ;;  %vm1219_vm12 = vcmp.eq.s32.totalorder %v1214_v55, 2  ;;  %vm810_vm13 = vcmp.lt.s32.totalorder %v6991_v25, 0  ;;  %v1055_v54 = vsel %vm1049_vm11, %v1052_v61, %v1054_v4 }
 0x15e   : > { %v7198_v13 = vpop.eup %6156  ;;  %vm1216_vm2 = vcmp.eq.s32.totalorder %v1214_v55, 0  ;;  %v883_v26 = vor.u32 %v882_v48, %v881_v11  ;;  %vm1215_vm14 = vcmp.lt.s32.totalorder %v1214_v55, 2  ;;  %vm1073_vm3 = vc.u32 %v7201_v47, %v7203_v29 }
 0x15f   : > { %v7207_v36 = vpop.eup %6158  ;;  %v1220_v3 = vxor.u32 2147483648, %v7198_v13  ;;  %v886_v24 = vshll.u32 %v885_v45, 23  ;;  %v1074_v34 = vadd.s32 1, %v7204_v41  ;;  %v895_v57 = vsel %vm810_vm13, %v894_v19, %v7140_v15 }
 0x160   : > { %v1217_v43 = vxor.u32 2147483648, %v7207_v36  ;;  %v1071_v60 = vmul.u32 %v1064_v31, %v1055_v54  ;;  %v8720_v58 = vand.u32 2147483647, %v6991_v25  ;;  %v2574_v61 = vand.u32 3, %v6906_v16 }
 0x161   : > { %v1221_v38 = vsel %vm1219_vm12, %v1220_v3, %v7207_v36  ;;  %v887_v30 = vor.u32 4788187, %v886_v24  ;;  %v1075_v44 = vsel %vm1073_vm3, %v1074_v34, %v7204_v41  ;;  %v890_v40 = vcvt.s32.f32 %v883_v26 }
 0x162   : > { %v1218_v10 = vsel %vm1216_vm2, %v7198_v13, %v1217_v43  ;;  %vm7228_vm7 = vcmp.le.f32.partialorder %v8720_v58, 0.7853982  ;;  %v1076_v11 = vadd.s32 %v1075_v44, %v1071_v60  ;;  %v2059_v15 = vand.u32 3, %v7033_v8 }
 0x163   : > { %v1222_v14 = vsel %vm1215_vm14, %v1218_v10, %v1221_v38  ;;  %v888_v4 = vand.u32 2147483647, %v887_v30  ;;  %v7237_v31 = vmul.f32 %v7163_v32, %v6461_v35  ;;  %v897_v19 = vsel %vm7228_vm7, 0, %v895_v57 }
 0x164   : > { %v1223_v22 = vsel %vm8692_vm4, nan, %v1222_v14  ;;  %vm2473_vm9 = vcmp.eq.s32.totalorder %v7178_v0, 0  ;;  %vm2576_vm5 = vcmp.eq.s32.totalorder %v2574_v61, 0  ;;  %v1077_v41 = vadd.s32 536870912, %v1076_v11 }
 0x165   : > { %1784 = vmatprep.subr.mxu1 %v1223_v22  ;;  %v891_v48 = vmul.f32 %v890_v40, %v888_v4  ;;  %v8723_v16 = vxor.u32 2147483648, %v7036_v12  ;;  %vm2579_vm11 = vcmp.eq.s32.totalorder %v2574_v61, 2  ;;  %vm2575_vm12 = vcmp.lt.s32.totalorder %v2574_v61, 2 }
 0x166   : > { %v8724_v8 = vxor.u32 2147483648, %v7029_v42  ;;  %vm2061_vm2 = vcmp.eq.s32.totalorder %v2059_v15, 0  ;;  %vm2064_vm14 = vcmp.eq.s32.totalorder %v2059_v15, 2  ;;  %v7248_v26 = vshrl.u32 %v1077_v41, 30 }
 0x167   : > { %v2578_v45 = vsel %vm2576_vm5, %v7029_v42, %v8723_v16  ;;  %v892_v38 = vxor.u32 2147483648, %v891_v48  ;;  %v8725_v10 = vxor.u32 2147483648, %v7133_v59  ;;  %vm2060_vm3 = vcmp.lt.s32.totalorder %v2059_v15, 2 }
 0x168   : > { %v2581_v54 = vsel %vm2579_vm11, %v8724_v8, %v7036_v12  ;;  %v8726_v30 = vxor.u32 2147483648, %v7125_v18  ;;  %v2265_v12 = vand.u32 3, %v7154_v23  ;;  %v1079_v60 = vshll.u32 %v7248_v26, 30 }
 0x169   : > { %v2582_v24 = vsel %vm2575_vm12, %v2578_v45, %v2581_v54  ;;  %v2063_v34 = vsel %vm2061_vm2, %v7125_v18, %v8725_v10  ;;  %v893_v57 = vsel %vm810_vm13, %v892_v38, %v891_v48  ;;  %vm2476_vm5 = vcmp.eq.s32.totalorder %v7178_v0, 2 }
 0x16a   : > { %v7255_v14 = vsel %vm1524_vm6, nan, %v2582_v24  ;;  %v2066_v42 = vsel %vm2064_vm14, %v8726_v30, %v7133_v59  ;;  %v896_v7 = vsel %vm7228_vm7, %v6991_v25, %v893_v57  ;;  %v8727_v58 = vxor.u32 2147483648, %v6799_v9 }
 0x16b   : > { %v7265_v22 = vsel %vm2060_vm3, %v2063_v34, %v2066_v42  ;;  %v8728_v59 = vxor.u32 2147483648, %v6794_v56  ;;  %vm2267_vm6 = vcmp.eq.s32.totalorder %v2265_v12, 0  ;;  %6160 = vcosq.f32 %v896_v7 }
 0x16c   : > { %v2475_v18 = vsel %vm2473_vm9, %v6794_v56, %v8727_v58  ;;  %v901_v44 = vadd.s32 3, %v897_v19  ;;  %v7278_v61 = vsub.s32 %v1076_v11, %v1079_v60  ;;  %v2269_v4 = vsel %vm2267_vm6, %v7198_v13, %v1217_v43 }
 0x16d   : > { %v2478_v23 = vsel %vm2476_vm5, %v8728_v59, %v6799_v9  ;;  %v7283_v55 = vrot.slane %v7121_v63, %v7106_v46  ;;  %6162 = vsinq.f32 %v896_v7  ;;  %vm2472_vm13 = vcmp.lt.s32.totalorder %v7178_v0, 2 }
 0x16e   : > { %vm2270_vm7 = vcmp.eq.s32.totalorder %v2265_v12, 2  ;;  %v1082_v40 = vsub.s32 0, %v7278_v61  ;;  %v7288_v56 = vand.u32 3, %v6739_v20  ;;  %vm2266_vm9 = vcmp.lt.s32.totalorder %v2265_v12, 2 }
 0x16f   : > { %v2272_v9 = vsel %vm2270_vm7, %v1220_v3, %v7207_v36  ;;  %v2953_v43 = vadd.f32 0.5, %v7237_v31  ;;  %v2479_v11 = vsel %vm2472_vm13, %v2475_v18, %v2478_v23  ;;  %v2911_v63 = vsub.s32 3, %v6400_v5 }
 0x170   : > { %v7294_v15 = vsel %vm2266_vm9, %v2269_v4, %v2272_v9  ;;  %v7297_v48 = vand.u32 3, %v901_v44  ;;  %v5830_v0 = vmin.u32 %v1082_v40, %v7278_v61  ;;  %v7301_v41 = vand.u32 3, %v6846_v62 }
 0x171   : > { %v2919_v20 = vsub.s32 7, %v6400_v5  ;;  %v2912_v16 = vrot.slane %v7116_v21, %v2911_v63  ;;  %v7307_v13 = vmul.f32 %v7283_v55, %v6461_v35  ;;  %v7311_v3 = vsel %vm1420_vm1, nan, %v2479_v11 }
 0x172   : > { %v1084_v36 = vclz %v5830_v0  ;;  %vm2679_vm11 = vcmp.eq.s32.totalorder %v7288_v56, 0  ;;  %v8729_v45 = vxor.u32 2147483648, %v6850_v49  ;;  %v2961_v54 = vfloor.f32 %v2953_v43 }
 0x173   : > { %v7320_v5 = vrot.slane %v2912_v16, %v7106_v46  ;;  %v2920_v8 = vrot.slane %v7116_v21, %v2919_v20  ;;  %vm904_vm12 = vcmp.eq.s32.totalorder %v7297_v48, 0  ;;  %vm907_vm2 = vcmp.eq.s32.totalorder %v7297_v48, 2 }
 0x174   : > { %v7317_v62 = vsel %vm2679_vm11, %v6842_v27, %v8729_v45  ;;  %v5831_v52 = vadd.s32 4294967294, %v1084_v36  ;;  %vm2370_vm1 = vcmp.eq.s32.totalorder %v7301_v41, 0  ;;  %vm903_vm14 = vcmp.lt.s32.totalorder %v7297_v48, 2 }
 0x175   : > { %vm1018_vm3 = vcmp.lt.s32.totalorder %v7080_v50, 0  ;;  %vm2369_vm5 = vcmp.lt.s32.totalorder %v7301_v41, 2  ;;  %v1956_v38 = vand.u32 3, %v897_v19  ;;  %v2946_v24 = vmul.f32 %v7320_v5, %v6461_v35 }
 0x176   : > { %v7332_v21 = vrot.slane %v2920_v8, %v7106_v46  ;;  %v2969_v10 = vsub.f32 %v7237_v31, %v2961_v54  ;;  %vm900_vm6 = vweird.f32 %v6991_v25  ;;  %v1072_v34 = vadd.s32 %v7203_v29, %v7201_v47 }
 0x177   : > { %vm5832_vm13 = vcmp.lt.s32.totalorder %v5831_v52, 0  ;;  %vm1640_vm7 = vcmask 80896   ;;  %v8730_v30 = vxor.u32 2147483648, %v6929_v6  ;;  %vm2373_vm9 = vcmp.eq.s32.totalorder %v7301_v41, 2 }
 0x178   : > { %v1087_v19 = vsel %vm5832_vm13, 0, %v5831_v52  ;;  %v2954_v12 = vadd.f32 0.5, %v2946_v24  ;;  %v2948_v46 = vmul.f32 %v7332_v21, %v6461_v35  ;;  %v7344_v57 = vmul.f32 6.2831855, %v2969_v10  ;;  %v6161_v58 = vpop.eup %6160 }
 0x179   : > { %v2372_v42 = vsel %vm2370_vm1, %v6925_v2, %v8730_v30  ;;  %v1088_v31 = vsub.s32 32, %v1087_v19  ;;  %v1092_v60 = vsub.s32 4294967266, %v1087_v19  ;;  %v1102_v7 = vsub.s32 4, %v7248_v26 }
 0x17a   : > { %vm2682_vm11 = vcmp.eq.s32.totalorder %v7288_v56, 2  ;;  %v8731_v47 = vxor.u32 2147483648, %v6925_v2  ;;  %v8732_v18 = vand.u32 2147483647, %v7080_v50  ;;  %vm1958_vm13 = vcmp.eq.s32.totalorder %v1956_v38, 0  ;;  %v6163_v44 = vpop.eup %6162 }
 0x17b   : > { %vm1961_vm4 = vcmp.eq.s32.totalorder %v1956_v38, 2  ;;  %v2962_v35 = vfloor.f32 %v2954_v12  ;;  %v2956_v23 = vadd.f32 0.5, %v2948_v46  ;;  %v908_v4 = vxor.u32 2147483648, %v6161_v58 }
 0x17c   : > { %v2375_v29 = vsel %vm2373_vm9, %v8731_v47, %v6929_v6  ;;  %vm7353_vm1 = vcmp.le.f32.partialorder %v8732_v18, 0.7853982  ;;  %v1089_v40 = vshll.u32 %v7278_v61, %v1087_v19  ;;  %v1090_v9 = vshrl.u32 %v1072_v34, %v1088_v31  ;;  %v7374_v34 = vld [vmem:[%s8660_s4] sm:$0xff] }
 0x17d   : > { %v1093_v43 = vadd.s32 127, %v1092_v60  ;;  %v905_v11 = vxor.u32 2147483648, %v6163_v44  ;;  %v2970_v2 = vsub.f32 %v2946_v24, %v2962_v35  ;;  %v2964_v6 = vfloor.f32 %v2956_v23 }
 0x17e   : > { %v3404_v63 = vand.u32 2139095040, %v7344_v57  ;;  %v909_v0 = vsel %vm907_vm2, %v908_v4, %v6163_v44  ;;  %v1091_v20 = vor.u32 %v1090_v9, %v1089_v40  ;;  %v1963_v36 = vsel %vm1961_vm4, %v908_v4, %v6163_v44 }
 0x17f   : > { %v1094_v16 = vshll.u32 %v1093_v43, 23  ;;  %v906_v45 = vsel %vm904_vm12, %v6161_v58, %v905_v11  ;;  %v1960_v8 = vsel %vm1958_vm13, %v6161_v58, %v905_v11  ;;  %v7364_v54 = vmul.f32 6.2831855, %v2970_v2 }
 0x180   : > { %v2972_v61 = vsub.f32 %v2948_v46, %v2964_v6  ;;  %v910_v52 = vsel %vm903_vm14, %v906_v45, %v909_v0  ;;  %v1103_v10 = vsel %vm1018_vm3, %v1102_v7, %v7248_v26  ;;  %v2376_v30 = vsel %vm2369_vm5, %v2372_v42, %v2375_v29  ;;  %v7428_v6 = vld [vmem:[%s8660_s4 + $0x10] sm:$0xff] }
 0x181   : > { %v1095_v24 = vor.u32 4788187, %v1094_v16  ;;  %v911_v19 = vsel %vm900_vm6, nan, %v910_v52  ;;  %v1098_v12 = vcvt.s32.f32 %v1091_v20  ;;  %vm1957_vm4 = vcmp.lt.s32.totalorder %v1956_v38, 2 }
 0x182   : > { %v3505_v48 = vand.u32 2147483647, %v7364_v54  ;;  %1696 = vmatpush1.msra.mxu0 %v911_v19  ;;  %v1964_v31 = vsel %vm1957_vm4, %v1960_v8, %v1963_v36  ;;  %v3508_v26 = vand.u32 2139095040, %v7364_v54  ;;  %v7382_v60 = vmul.f32 6.2831855, %v2972_v61 }
 0x183   : > { %v1096_v46 = vand.u32 2147483647, %v1095_v24  ;;  %5855 = vmatmul.mubr.msk.f32.vlgmr.msra.gmra.mxu0 %vm1640_vm7, %v7374_v34  ;;  %5897 = vmatprep.subr.msk.mxu0 %vm531_vm0, %v7311_v3  ;;  %v8735_v41 = vxor.u32 2147483648, %v6842_v27  ;;  %v2377_v42 = vsel %vm1316_vm10, nan, %v2376_v30  ;;  %v2068_v7 = vsel %vm1004_vm15, nan, %v7265_v22  ;;  %v7405_v27 = vld [vmem:[%s8660_s4 + $0x8] sm:$0xff] }
 0x184   : > { %v3405_v47 = vshrl.u32 %v3404_v63, 23  ;;  %v1105_v58 = vsel %vm7353_vm1, 0, %v1103_v10  ;;  %5898 = vmatpush1.msk.msra.mxu0 %vm531_vm0, %v2377_v42  ;;  %v8736_v3 = vmov 0.0   ;;  %v3509_v51 = vshrl.u32 %v3508_v26, 23  ;;  %v7453_v10 = vld [vmem:[%s8660_s4 + $0x18] sm:$0xff] }
 0x185   : > { %v2684_v38 = vsel %vm2682_vm11, %v8735_v41, %v6850_v49  ;;  %v1099_v29 = vmul.f32 %v1098_v12, %v1096_v46  ;;  %1735 = vmatprep.mubr.f32.mxu0 %v8736_v3  ;;  %v3713_v49 = vand.u32 2147483647, %v7382_v60  ;;  %2741 = vmatprep.subr.mxu0 %v2068_v7  ;;  %v1965_v17 = vsel %vm900_vm6, nan, %v1964_v31 }
 0x186   : > { %v3512_v22 = vand.u32 8388607, %v3505_v48  ;;  %v3716_v18 = vand.u32 2139095040, %v7382_v60  ;;  %v5925_v35 = vadd.s32 4294967169, %v3405_v47  ;;  %vm2678_vm10 = vcmp.lt.s32.totalorder %v7288_v56, 2  ;;  %2742 = vmatpush1.msra.mxu0 %v1965_v17  ;;  %v7480_v17 = vld [vmem:[%s8661_s5] sm:$0xff] }
 0x187   : > { %v1100_v23 = vxor.u32 2147483648, %v1099_v29  ;;  %v5929_v44 = vadd.s32 4294967169, %v3509_v51  ;;  %v3720_v4 = vand.u32 8388607, %v3713_v49  ;;  %v7417_v40 = vadd.f32 0.5, %v7307_v13  ;;  %5856 = vmatmul.mubr.msk.f32.gmra.mxu0 %vm1640_vm7, %v7405_v27 }
 0x188   : > { %v2685_v25 = vsel %vm2678_vm10, %v7317_v62, %v2684_v38  ;;  %v3717_v9 = vshrl.u32 %v3716_v18, 23  ;;  %v3411_v43 = vadd.s32 1, %v5925_v35  ;;  %v1109_v2 = vadd.s32 3, %v1105_v58  ;;  %1741 = vmatprep.mubr.f32.mxu0 %v8736_v3 }
 0x189   : > { %v1101_v11 = vsel %vm1018_vm3, %v1100_v23, %v1099_v29  ;;  %v3515_v56 = vadd.s32 1, %v5929_v44  ;;  %v3401_v63 = vand.u32 2147483647, %v7344_v57  ;;  %v3513_v0 = vor.u32 8388608, %v3512_v22 }
 0x18a   : > { %v1104_v62 = vsel %vm7353_vm1, %v7080_v50, %v1101_v11  ;;  %v5937_v20 = vadd.s32 4294967169, %v3717_v9  ;;  %v3721_v16 = vor.u32 8388608, %v3720_v4  ;;  %v7436_v36 = vsel %vm1628_vm8, nan, %v2685_v25 }
 0x18b   : > { %6164 = vcosq.f32 %v1104_v62  ;;  %v7438_v45 = vand.u32 3, %v1105_v58  ;;  %vm3516_vm15 = vcmp.gt.s32.totalorder %v3515_v56, 0  ;;  %5857 = vmatmul.mubr.msk.f32.gmra.mxu0 %vm1640_vm7, %v7428_v6  ;;  %vm3412_vm12 = vcmp.gt.s32.totalorder %v3411_v43, 0 }
 0x18c   : > { %6166 = vsinq.f32 %v1104_v62  ;;  %v3517_v8 = vsel %vm3516_vm15, %v3515_v56, 0  ;;  %v3723_v61 = vadd.s32 1, %v5937_v20  ;;  %v7442_v59 = vand.u32 3, %v1109_v2  ;;  %1747 = vmatprep.mubr.f32.mxu0 %v8736_v3 }
 0x18d   : > { %vm8737_vm2 = vweird.f32 %v6848_v33  ;;  %v3518_v53 = vshrl.u32 %v3517_v8, 5  ;;  %v3519_v24 = vand.u32 31, %v3517_v8  ;;  %v7455_v30 = vshll.u32 %v3513_v0, 8 }
 0x18e   : > { %v7447_v52 = vsel %vm8737_vm2, nan, %v7294_v15  ;;  %v7457_v19 = vshll.u32 %v3721_v16, 8  ;;  %v7461_v12 = vand.u32 8388607, %v3401_v63  ;;  %v2963_v33 = vfloor.f32 %v7417_v40 }
 0x18f   : > { %v3520_v15 = vsub.s32 32, %v3519_v24  ;;  %v3522_v46 = vshll.u32 %v6266_v28, %v3519_v24  ;;  %vm3724_vm8 = vcmp.gt.s32.totalorder %v3723_v61, 0  ;;  %v7465_v31 = vsel %vm3412_vm12, %v3411_v43, 0  ;;  %5858 = vmatmul.mubr.msk.f32.gmra.mxu0 %vm1640_vm7, %v7453_v10 }
 0x190   : > { %v8738_v26 = vmov 2475754826   ;;  %v8739_v38 = vmov 2131351028   ;;  %v3531_v7 = vshll.u32 %v6269_v37, %v3519_v24  ;;  %v3534_v47 = vshll.u32 %v6270_v39, %v3519_v24  ;;  %2775 = vmatprep.mubr.f32.mxu0 %v8736_v3 }
 0x191   : > { %v3525_v41 = vshll.u32 %v8738_v26, %v3519_v24  ;;  %v3528_v42 = vshll.u32 %v8739_v38, %v3519_v24  ;;  %v3523_v29 = vshrl.u32 %v8738_v26, %v3520_v15  ;;  %v3526_v58 = vshrl.u32 %v8739_v38, %v3520_v15 }
 0x192   : > { %v3529_v51 = vshrl.u32 %v6269_v37, %v3520_v15  ;;  %vm3537_vm14 = vcmp.lt.s32.totalorder %v3518_v53, 1  ;;  %vm1115_vm3 = vcmp.eq.s32.totalorder %v7442_v59, 2  ;;  %vm2167_vm5 = vcmp.eq.s32.totalorder %v7438_v45, 2 }
 0x193   : > { %v3521_v22 = vshrl.u32 %v6266_v28, %v3520_v15  ;;  %v3532_v18 = vshrl.u32 %v6270_v39, %v3520_v15  ;;  %v8740_v35 = vmov 1326507024   ;;  %vm3539_vm6 = vcmp.lt.s32.totalorder %v3518_v53, 3  ;;  %5899 = vmatmul.mubr.msk.f32.vlgmr.msra.gmra.mxu0 %vm1640_vm7, %v7480_v17 }
 0x194   : > { %v3535_v23 = vshrl.u32 %v8740_v35, %v3520_v15  ;;  %vm1112_vm9 = vcmp.eq.s32.totalorder %v7442_v59, 0  ;;  %vm2164_vm11 = vcmp.eq.s32.totalorder %v7438_v45, 0  ;;  %v3524_v44 = vor.u32 %v3523_v29, %v3522_v46  ;;  %2781 = vmatprep.mubr.f32.mxu0 %v8736_v3 }
 0x195   : > { %v3527_v4 = vor.u32 %v3526_v58, %v3525_v41  ;;  %v3530_v25 = vor.u32 %v3529_v51, %v3528_v42  ;;  %v3725_v9 = vsel %vm3724_vm8, %v3723_v61, 0  ;;  %vm1111_vm1 = vcmp.lt.s32.totalorder %v7442_v59, 2 }
 0x196   : > { %vm2163_vm13 = vcmp.lt.s32.totalorder %v7438_v45, 2  ;;  %v3533_v43 = vor.u32 %v3532_v18, %v3531_v7  ;;  %v3536_v11 = vor.u32 %v3535_v23, %v3534_v47  ;;  %vm3540_vm4 = vcmp.lt.s32.totalorder %v3518_v53, 4 }
 0x197   : > { %v3727_v2 = vand.u32 31, %v3725_v9  ;;  %vm1108_vm10 = vweird.f32 %v7080_v50  ;;  %v3541_v56 = vsel %vm3537_vm14, %v3521_v22, %v3524_v44  ;;  %v3542_v62 = vsel %vm3540_vm4, %v3530_v25, 2102212464 }
 0x198   : > { %v3545_v0 = vsel %vm3537_vm14, %v3524_v44, %v3527_v4  ;;  %v3549_v20 = vsel %vm3537_vm14, %v3527_v4, %v3530_v25  ;;  %v3543_v16 = vsel %vm3539_vm6, %v3527_v4, %v3542_v62  ;;  %v3546_v8 = vsel %vm3540_vm4, %v3533_v43, 920167782  ;;  %v6165_v42 = vpop.eup %6164 }
 0x199   : > { %v3550_v61 = vsel %vm3540_vm4, %v3536_v11, 1326507024  ;;  %v3728_v24 = vsub.s32 32, %v3727_v2  ;;  %vm3538_vm15 = vcmp.lt.s32.totalorder %v3518_v53, 2  ;;  %v3547_v15 = vsel %vm3539_vm6, %v3530_v25, %v3546_v8  ;;  %v6167_v51 = vpop.eup %6166 }
 0x19a   : > { %v3551_v46 = vsel %vm3539_vm6, %v3533_v43, %v3550_v61  ;;  %v7503_v41 = vand.u32 31, %v7465_v31  ;;  %v3544_v7 = vsel %vm3538_vm15, %v3541_v56, %v3543_v16  ;;  %v3548_v47 = vsel %vm3538_vm15, %v3545_v0, %v3547_v15 }
 0x19b   : > { %v3552_v29 = vsel %vm3538_vm15, %v3549_v20, %v3551_v46  ;;  %v7505_v58 = vshrl.u32 %v3725_v9, 5  ;;  %v1116_v22 = vxor.u32 2147483648, %v6165_v42  ;;  %v3730_v44 = vshll.u32 %v6266_v28, %v3727_v2 }
 0x19c   : > { %v7508_v18 = vmul.u32.u64.low %v7455_v30, %v3552_v29  ;;  %v7509_v23 = vmul.u32.u64.high %v7455_v30, %v3552_v29, %v7508_v18  ;;  %v1113_v4 = vxor.u32 2147483648, %v6167_v51  ;;  %v3731_v43 = vshrl.u32 %v8738_v26, %v3728_v24 }
 0x19d   : > { %v7513_v53 = vmul.u32.u64.low %v7455_v30, %v3548_v47  ;;  %v7514_v25 = vmul.u32.u64.high %v7455_v30, %v3548_v47, %v7513_v53  ;;  %v1117_v9 = vsel %vm1115_vm3, %v1116_v22, %v6167_v51  ;;  %v2169_v11 = vsel %vm2167_vm5, %v1116_v22, %v6167_v51 }
 0x19e   : > { %v3560_v56 = vmul.u32 %v7455_v30, %v3544_v7  ;;  %v3734_v62 = vshrl.u32 %v8739_v38, %v3728_v24  ;;  %v1114_v0 = vsel %vm1112_vm9, %v6165_v42, %v1113_v4  ;;  %v2166_v20 = vsel %vm2164_vm11, %v6165_v42, %v1113_v4 }
 0x19f   : > { %v3733_v16 = vshll.u32 %v8738_v26, %v3727_v2  ;;  %v3737_v8 = vshrl.u32 %v6269_v37, %v3728_v24  ;;  %v1118_v61 = vsel %vm1111_vm1, %v1114_v0, %v1117_v9  ;;  %v2170_v15 = vsel %vm2163_vm13, %v2166_v20, %v2169_v11 }
 0x1a0   : > { %vm3562_vm12 = vc.u32 %v7509_v23, %v7513_v53  ;;  %v3736_v30 = vshll.u32 %v8739_v38, %v3727_v2  ;;  %v1119_v46 = vsel %vm1108_vm10, nan, %v1118_v61  ;;  %v3563_v42 = vadd.s32 1, %v7514_v25 }
 0x1a1   : > { %v3732_v7 = vor.u32 %v3731_v43, %v3730_v44  ;;  %v3735_v47 = vor.u32 %v3734_v62, %v3733_v16  ;;  %1785 = vmatpush1.msra.mxu1 %v1119_v46  ;;  %v3729_v29 = vshrl.u32 %v6266_v28, %v3728_v24  ;;  %v3739_v51 = vshll.u32 %v6269_v37, %v3727_v2 }
 0x1a2   : > { %v3738_v59 = vor.u32 %v3737_v8, %v3736_v30  ;;  %v3740_v45 = vshrl.u32 %v6270_v39, %v3728_v24  ;;  %5861 = vmatmul.mubr.msk.f32.vlgmr.msra.gmra.mxu1 %vm1640_vm7, %v7374_v34  ;;  %5903 = vmatprep.subr.msk.mxu1 %vm531_vm0, %v7436_v36  ;;  %v2171_v22 = vsel %vm1108_vm10, nan, %v2170_v15  ;;  %v3564_v18 = vsel %vm3562_vm12, %v3563_v42, %v7514_v25 }
 0x1a3   : > { %v3742_v44 = vshll.u32 %v6270_v39, %v3727_v2  ;;  %v3743_v4 = vshrl.u32 %v8740_v35, %v3728_v24  ;;  %5904 = vmatpush1.msk.msra.mxu1 %vm531_vm0, %v7255_v14  ;;  %1824 = vmatprep.mubr.f32.mxu1 %v8736_v3  ;;  %v3565_v43 = vadd.s32 %v3564_v18, %v3560_v56  ;;  %vm3745_vm2 = vcmp.lt.s32.totalorder %v7505_v58, 1 }
 0x1a4   : > { %v3741_v9 = vor.u32 %v3740_v45, %v3739_v51  ;;  %vm3748_vm8 = vcmp.lt.s32.totalorder %v7505_v58, 4  ;;  %2830 = vmatprep.subr.mxu1 %v7447_v52  ;;  %vm3746_vm14 = vcmp.lt.s32.totalorder %v7505_v58, 2  ;;  %v3753_v36 = vsel %vm3745_vm2, %v3732_v7, %v3735_v47 }
 0x1a5   : > { %v3744_v50 = vor.u32 %v3743_v4, %v3742_v44  ;;  %v3750_v34 = vsel %vm3748_vm8, %v3738_v59, 2102212464  ;;  %2831 = vmatpush1.msra.mxu1 %v2171_v22  ;;  %v3566_v2 = vadd.s32 536870912, %v3565_v43  ;;  %vm3747_vm3 = vcmp.lt.s32.totalorder %v7505_v58, 3 }
 0x1a6   : > { %v3754_v14 = vsel %vm3748_vm8, %v3741_v9, 920167782  ;;  %v3757_v24 = vsel %vm3745_vm2, %v3735_v47, %v3738_v59  ;;  %5862 = vmatmul.mubr.msk.f32.gmra.mxu1 %vm1640_vm7, %v7405_v27  ;;  %v3749_v25 = vsel %vm3745_vm2, %v3729_v29, %v3732_v7  ;;  %v3751_v11 = vsel %vm3747_vm3, %v3735_v47, %v3750_v34 }
 0x1a7   : > { %v3755_v56 = vsel %vm3747_vm3, %v3738_v59, %v3754_v14  ;;  %v3758_v62 = vsel %vm3748_vm8, %v3744_v50, 1326507024  ;;  %v7562_v0 = vshrl.u32 %v3566_v2, 30  ;;  %1830 = vmatprep.mubr.f32.mxu1 %v8736_v3  ;;  %v3416_v16 = vsub.s32 32, %v7503_v41 }
 0x1a8   : > { %v3756_v52 = vsel %vm3746_vm14, %v3753_v36, %v3755_v56  ;;  %v3759_v20 = vsel %vm3747_vm3, %v3741_v9, %v3758_v62  ;;  %v3752_v30 = vsel %vm3746_vm14, %v3749_v25, %v3751_v11  ;;  %v2971_v7 = vsub.f32 %v7307_v13, %v2963_v33 }
 0x1a9   : > { %v3760_v8 = vsel %vm3746_vm14, %v3757_v24, %v3759_v20  ;;  %v7571_v61 = vmul.u32.u64.low %v7457_v19, %v3756_v52  ;;  %v7572_v27 = vmul.u32.u64.high %v7457_v19, %v3756_v52, %v7571_v61  ;;  %v3568_v15 = vshll.u32 %v7562_v0, 30 }
 0x1aa   : > { %v7579_v46 = vmul.u32.u64.low %v7457_v19, %v3760_v8  ;;  %v7580_v42 = vmul.u32.u64.high %v7457_v19, %v3760_v8, %v7579_v46  ;;  %5863 = vmatmul.mubr.msk.f32.gmra.mxu1 %vm1640_vm7, %v7428_v6  ;;  %v7589_v47 = vmul.f32 %v7320_v5, %v6485_v1  ;;  %v3409_v58 = vor.u32 8388608, %v7461_v12 }
 0x1ab   : > { %v7591_v29 = vsub.s32 %v3565_v43, %v3568_v15  ;;  %1836 = vmatprep.mubr.f32.mxu1 %v8736_v3  ;;  %v3422_v59 = vshrl.u32 %v8739_v38, %v3416_v16  ;;  %v3425_v51 = vshrl.u32 %v6269_v37, %v3416_v16  ;;  %v3768_v6 = vmul.u32 %v7457_v19, %v3752_v30 }
 0x1ac   : > { %v3771_v40 = vadd.s32 1, %v7572_v27  ;;  %v7600_v13 = vshrl.u32 %v7465_v31, 5  ;;  %v3419_v5 = vshrl.u32 %v8738_v26, %v3416_v16  ;;  %vm3770_vm5 = vc.u32 %v7580_v42, %v7571_v61 }
 0x1ad   : > { %v3571_v33 = vsub.s32 0, %v7591_v29  ;;  %v3421_v12 = vshll.u32 %v8738_v26, %v7503_v41  ;;  %v3424_v45 = vshll.u32 %v8739_v38, %v7503_v41  ;;  %v3418_v31 = vshll.u32 %v6266_v28, %v7503_v41 }
 0x1ae   : > { %v3772_v19 = vsel %vm3770_vm5, %v3771_v40, %v7572_v27  ;;  %5864 = vmatmul.mubr.msk.f32.gmra.mxu1 %vm1640_vm7, %v7453_v10  ;;  %v3427_v22 = vshll.u32 %v6269_v37, %v7503_v41  ;;  %v3428_v18 = vshrl.u32 %v6270_v39, %v3416_v16  ;;  %v3430_v10 = vshll.u32 %v6270_v39, %v7503_v41 }
 0x1af   : > { %v5930_v44 = vmin.u32 %v3571_v33, %v7591_v29  ;;  %v3773_v4 = vadd.s32 %v3772_v19, %v3768_v6  ;;  %2864 = vmatprep.mubr.f32.mxu1 %v8736_v3  ;;  %v3423_v43 = vor.u32 %v3422_v59, %v3421_v12  ;;  %v3426_v9 = vor.u32 %v3425_v51, %v3424_v45 }
 0x1b0   : > { %v3420_v50 = vor.u32 %v3419_v5, %v3418_v31  ;;  %v3429_v34 = vor.u32 %v3428_v18, %v3427_v22  ;;  %v3431_v36 = vshrl.u32 %v8740_v35, %v3416_v16  ;;  %vm3433_vm6 = vcmp.lt.s32.totalorder %v7600_v13, 1 }
 0x1b1   : > { %v3573_v2 = vclz %v5930_v44  ;;  %v7624_v14 = vshll.u32 %v3409_v58, 8  ;;  %v7626_v24 = vmul.f32 6.2831855, %v2971_v7  ;;  %v3774_v25 = vadd.s32 536870912, %v3773_v4 }
 0x1b2   : > { %5905 = vmatmul.mubr.msk.f32.vlgmr.msra.gmra.mxu1 %vm1640_vm7, %v7480_v17  ;;  %v3432_v11 = vor.u32 %v3431_v36, %v3430_v10  ;;  %vm3434_vm9 = vcmp.lt.s32.totalorder %v7600_v13, 2  ;;  %vm3436_vm11 = vcmp.lt.s32.totalorder %v7600_v13, 4  ;;  %vm3435_vm1 = vcmp.lt.s32.totalorder %v7600_v13, 3 }
 0x1b3   : > { %v5931_v56 = vadd.s32 4294967294, %v3573_v2  ;;  %v3442_v41 = vsel %vm3436_vm11, %v3429_v34, 920167782  ;;  %v3445_v62 = vsel %vm3433_vm6, %v3423_v43, %v3426_v9  ;;  %2870 = vmatprep.mubr.f32.mxu1 %v8736_v3  ;;  %v3775_v52 = vshrl.u32 %v3774_v25, 30 }
 0x1b4   : > { %v3441_v17 = vsel %vm3433_vm6, %v3420_v50, %v3423_v43  ;;  %v3443_v20 = vsel %vm3435_vm1, %v3426_v9, %v3442_v41  ;;  %v3446_v8 = vsel %vm3436_vm11, %v3432_v11, 1326507024  ;;  %v3561_v27 = vadd.s32 %v7513_v53, %v7509_v23 }
 0x1b5   : > { %vm5932_vm13 = vcmp.lt.s32.totalorder %v5931_v56, 0  ;;  %v3417_v15 = vshrl.u32 %v6266_v28, %v3416_v16  ;;  %v3447_v30 = vsel %vm3435_vm1, %v3429_v34, %v3446_v8  ;;  %v3591_v7 = vsub.s32 4, %v7562_v0 }
 0x1b6   : > { %v3576_v46 = vsel %vm5932_vm13, 0, %v5931_v56  ;;  %v3776_v58 = vshll.u32 %v3775_v52, 30  ;;  %v3448_v59 = vsel %vm3434_vm9, %v3445_v62, %v3447_v30  ;;  %v3438_v40 = vsel %vm3436_vm11, %v3426_v9, 2102212464 }
 0x1b7   : > { %v3577_v51 = vsub.s32 32, %v3576_v46  ;;  %v3581_v6 = vsub.s32 4294967266, %v3576_v46  ;;  %v3444_v23 = vsel %vm3434_vm9, %v3441_v17, %v3443_v20  ;;  %vm3507_vm4 = vcmp.lt.s32.totalorder %v7364_v54, 0 }
 0x1b8   : > { %v7657_v53 = vsub.s32 %v3773_v4, %v3776_v58  ;;  %v7660_v16 = vmul.u32.u64.low %v7624_v14, %v3448_v59  ;;  %v7661_v5 = vmul.u32.u64.high %v7624_v14, %v3448_v59, %v7660_v16  ;;  %v3578_v33 = vshll.u32 %v7591_v29, %v3576_v46 }
 0x1b9   : > { %v3579_v12 = vshrl.u32 %v3561_v27, %v3577_v51  ;;  %v3582_v45 = vadd.s32 127, %v3581_v6  ;;  %v3437_v19 = vsel %vm3433_vm6, %v3417_v15, %v3420_v50  ;;  %v3439_v22 = vsel %vm3435_vm1, %v3423_v43, %v3438_v40 }
 0x1ba   : > { %v3779_v31 = vsub.s32 0, %v7657_v53  ;;  %v7670_v18 = vmul.u32.u64.low %v7624_v14, %v3444_v23  ;;  %v7671_v44 = vmul.u32.u64.high %v7624_v14, %v3444_v23, %v7670_v18  ;;  %v3592_v29 = vsel %vm3507_vm4, %v3591_v7, %v7562_v0 }
 0x1bb   : > { %v3580_v4 = vor.u32 %v3579_v12, %v3578_v33  ;;  %v3583_v9 = vshll.u32 %v3582_v45, 23  ;;  %v3612_v34 = vand.u32 2139095040, %v7626_v24  ;;  %vm7679_vm10 = vcmp.le.f32.partialorder %v3505_v48, 0.7853982 }
 0x1bc   : > { %v5938_v43 = vmin.u32 %v3779_v31, %v7657_v53  ;;  %v3799_v10 = vsub.s32 4, %v3775_v52  ;;  %v3609_v36 = vand.u32 2147483647, %v7626_v24  ;;  %vm3715_vm15 = vcmp.lt.s32.totalorder %v7382_v60, 0 }
 0x1bd   : > { %v3584_v2 = vor.u32 4788187, %v3583_v9  ;;  %v3440_v25 = vsel %vm3434_vm9, %v3437_v19, %v3439_v22  ;;  %v3613_v0 = vshrl.u32 %v3612_v34, 23  ;;  %v7690_v11 = vsel %vm7679_vm10, 0, %v3592_v29 }
 0x1be   : > { %vm7694_vm12 = vcmp.le.f32.partialorder %v3713_v49, 0.7853982  ;;  %v3781_v56 = vclz %v5938_v43  ;;  %vm3458_vm2 = vc.u32 %v7661_v5, %v7670_v18  ;;  %v3587_v62 = vcvt.s32.f32 %v3580_v4 }
 0x1bf   : > { %v3585_v41 = vand.u32 2147483647, %v3584_v2  ;;  %v3459_v17 = vadd.s32 1, %v7671_v44  ;;  %v5933_v13 = vadd.s32 4294967169, %v3613_v0  ;;  %v3800_v8 = vsel %vm3715_vm15, %v3799_v10, %v3775_v52 }
 0x1c0   : > { %v5939_v20 = vadd.s32 4294967294, %v3781_v56  ;;  %v3456_v27 = vmul.u32 %v7624_v14, %v3440_v25  ;;  %v3616_v49 = vand.u32 8388607, %v3609_v36  ;;  %v2950_v7 = vadd.f32 0.5, %v7589_v47 }
 0x1c1   : > { %v3588_v15 = vmul.f32 %v3587_v62, %v3585_v41  ;;  %v3460_v30 = vsel %vm3458_vm2, %v3459_v17, %v7671_v44  ;;  %v3619_v46 = vadd.s32 1, %v5933_v13  ;;  %v3598_v58 = vadd.s32 3, %v7690_v11 }
 0x1c2   : > { %v3769_v59 = vadd.s32 %v7571_v61, %v7580_v42  ;;  %vm5940_vm8 = vcmp.lt.s32.totalorder %v5939_v20, 0  ;;  %v3461_v51 = vadd.s32 %v3460_v30, %v3456_v27  ;;  %v7712_v14 = vsel %vm7694_vm12, 0, %v3800_v8 }
 0x1c3   : > { %v3589_v6 = vxor.u32 2147483648, %v3588_v15  ;;  %v3784_v52 = vsel %vm5940_vm8, 0, %v5939_v20  ;;  %vm3620_vm14 = vcmp.gt.s32.totalorder %v3619_v46, 0  ;;  %v3617_v33 = vor.u32 8388608, %v3616_v49 }
 0x1c4   : > { %v3785_v40 = vsub.s32 32, %v3784_v52  ;;  %v3789_v23 = vsub.s32 4294967266, %v3784_v52  ;;  %v3462_v16 = vadd.s32 536870912, %v3461_v51  ;;  %v3786_v45 = vshll.u32 %v7657_v53, %v3784_v52 }
 0x1c5   : > { %v3590_v12 = vsel %vm3507_vm4, %v3589_v6, %v3588_v15  ;;  %v3621_v19 = vsel %vm3620_vm14, %v3619_v46, 0  ;;  %v2958_v61 = vfloor.f32 %v2950_v7  ;;  %v7723_v43 = vand.u32 3, %v3598_v58 }
 0x1c6   : > { %v3593_v42 = vsel %vm7679_vm10, %v7364_v54, %v3590_v12  ;;  %v3787_v31 = vshrl.u32 %v3769_v59, %v3785_v40  ;;  %v3790_v22 = vadd.s32 127, %v3789_v23  ;;  %v7720_v44 = vshrl.u32 %v3462_v16, 30 }
 0x1c7   : > { %6168 = vcosq.f32 %v3593_v42  ;;  %v3623_v4 = vand.u32 31, %v3621_v19  ;;  %v7726_v53 = vadd.s32 3, %v7712_v14  ;;  %v2966_v50 = vsub.f32 %v7589_v47, %v2958_v61 }
 0x1c8   : > { %6170 = vsinq.f32 %v3593_v42  ;;  %v3788_v9 = vor.u32 %v3787_v31, %v3786_v45  ;;  %v3791_v29 = vshll.u32 %v3790_v22, 23  ;;  %v3464_v34 = vshll.u32 %v7720_v44, 30 }
 0x1c9   : > { %v3624_v10 = vsub.s32 32, %v3623_v4  ;;  %v7730_v25 = vadd.s32 %v7670_v18, %v7661_v5  ;;  %v7734_v56 = vshll.u32 %v3617_v33, 8  ;;  %v7736_v41 = vshrl.u32 %v3621_v19, 5 }
 0x1ca   : > { %v3792_v2 = vor.u32 4788187, %v3791_v29  ;;  %v7732_v0 = vsub.s32 %v3461_v51, %v3464_v34  ;;  %v7742_v13 = vmul.f32 %v7332_v21, %v6485_v1  ;;  %v3795_v47 = vcvt.s32.f32 %v3788_v9 }
 0x1cb   : > { %v3627_v62 = vshrl.u32 %v8738_v26, %v3624_v10  ;;  %v3630_v17 = vshrl.u32 %v8739_v38, %v3624_v10  ;;  %v3633_v5 = vshrl.u32 %v6269_v37, %v3624_v10  ;;  %v3626_v18 = vshll.u32 %v6266_v28, %v3623_v4 }
 0x1cc   : > { %v3793_v20 = vand.u32 2147483647, %v3792_v2  ;;  %v3467_v8 = vsub.s32 0, %v7732_v0  ;;  %v3629_v27 = vshll.u32 %v8738_v26, %v3623_v4  ;;  %v3632_v49 = vshll.u32 %v8739_v38, %v3623_v4 }
 0x1cd   : > { %v7749_v15 = vmul.f32 6.2831855, %v2966_v50  ;;  %vm3604_vm3 = vcmp.eq.s32.totalorder %v7723_v43, 2  ;;  %v3635_v46 = vshll.u32 %v6269_v37, %v3623_v4  ;;  %v3636_v7 = vshrl.u32 %v6270_v39, %v3624_v10 }
 0x1ce   : > { %v3796_v30 = vmul.f32 %v3795_v47, %v3793_v20  ;;  %v5926_v21 = vmin.u32 %v3467_v8, %v7732_v0  ;;  %vm3601_vm5 = vcmp.eq.s32.totalorder %v7723_v43, 0  ;;  %v3628_v58 = vor.u32 %v3627_v62, %v3626_v18 }
 0x1cf   : > { %v3631_v59 = vor.u32 %v3630_v17, %v3629_v27  ;;  %v3634_v51 = vor.u32 %v3633_v5, %v3632_v49  ;;  %v3639_v6 = vshrl.u32 %v8740_v35, %v3624_v10  ;;  %vm3600_vm6 = vcmp.lt.s32.totalorder %v7723_v43, 2 }
 0x1d0   : > { %v3797_v52 = vxor.u32 2147483648, %v3796_v30  ;;  %v3469_v40 = vclz %v5926_v21  ;;  %v3637_v23 = vor.u32 %v3636_v7, %v3635_v46  ;;  %v3638_v16 = vshll.u32 %v6270_v39, %v3623_v4 }
 0x1d1   : > { %vm3597_vm9 = vweird.f32 %v7364_v54  ;;  %v3487_v33 = vsub.s32 4, %v7720_v44  ;;  %v3625_v12 = vshrl.u32 %v6266_v28, %v3624_v10  ;;  %vm3641_vm11 = vcmp.lt.s32.totalorder %v7736_v41, 1  ;;  %v8315_v54 = vld [vmem:[%s8662_s6 + $0x8] sm:$0xff] }
 0x1d2   : > { %vm3642_vm1 = vcmp.lt.s32.totalorder %v7736_v41, 2  ;;  %v3798_v45 = vsel %vm3715_vm15, %v3797_v52, %v3796_v30  ;;  %v5927_v19 = vadd.s32 4294967294, %v3469_v40  ;;  %v3640_v61 = vor.u32 %v3639_v6, %v3638_v16 }
 0x1d3   : > { %vm3644_vm13 = vcmp.lt.s32.totalorder %v7736_v41, 4  ;;  %v3801_v42 = vsel %vm7694_vm12, %v7382_v60, %v3798_v45  ;;  %vm3643_vm4 = vcmp.lt.s32.totalorder %v7736_v41, 3  ;;  %v3645_v31 = vsel %vm3641_vm11, %v3625_v12, %v3628_v58 }
 0x1d4   : > { %v3646_v22 = vsel %vm3644_vm13, %v3634_v51, 2102212464  ;;  %v7775_v4 = vpop.eup %6168  ;;  %6172 = vcosq.f32 %v3801_v42  ;;  %vm5928_vm10 = vcmp.lt.s32.totalorder %v5927_v19, 0  ;;  %v3649_v9 = vsel %vm3641_vm11, %v3628_v58, %v3631_v59 }
 0x1d5   : > { %v3650_v29 = vsel %vm3644_vm13, %v3637_v23, 920167782  ;;  %v7781_v48 = vpop.eup %6170  ;;  %v3605_v34 = vxor.u32 2147483648, %v7775_v4  ;;  %6174 = vsinq.f32 %v3801_v42  ;;  %v3472_v10 = vsel %vm5928_vm10, 0, %v5927_v19 }
 0x1d6   : > { %v3647_v50 = vsel %vm3643_vm4, %v3631_v59, %v3646_v22  ;;  %v3602_v2 = vxor.u32 2147483648, %v7781_v48  ;;  %v3473_v62 = vsub.s32 32, %v3472_v10  ;;  %v3474_v17 = vshll.u32 %v7732_v0, %v3472_v10 }
 0x1d7   : > { %v3477_v20 = vsub.s32 4294967266, %v3472_v10  ;;  %v3606_v47 = vsel %vm3604_vm3, %v3605_v34, %v7781_v48  ;;  %v3651_v8 = vsel %vm3643_vm4, %v3634_v51, %v3650_v29  ;;  %v3653_v5 = vsel %vm3641_vm11, %v3631_v59, %v3634_v51 }
 0x1d8   : > { %v3654_v18 = vsel %vm3644_vm13, %v3640_v61, 1326507024  ;;  %v3603_v0 = vsel %vm3601_vm5, %v7775_v4, %v3602_v2  ;;  %v3475_v27 = vshrl.u32 %v7730_v25, %v3473_v62  ;;  %v3652_v30 = vsel %vm3642_vm1, %v3649_v9, %v3651_v8 }
 0x1d9   : > { %v3478_v49 = vadd.s32 127, %v3477_v20  ;;  %v3607_v21 = vsel %vm3600_vm6, %v3603_v0, %v3606_v47  ;;  %v3655_v46 = vsel %vm3643_vm4, %v3637_v23, %v3654_v18  ;;  %v2952_v40 = vadd.f32 0.5, %v7742_v13 }
 0x1da   : > { %v7812_v7 = vmul.u32.u64.low %v7734_v56, %v3652_v30  ;;  %v7813_v58 = vmul.u32.u64.high %v7734_v56, %v3652_v30, %v7812_v7  ;;  %v3608_v59 = vsel %vm3597_vm9, nan, %v3607_v21  ;;  %v3476_v51 = vor.u32 %v3475_v27, %v3474_v17 }
 0x1db   : > { %v3479_v6 = vshll.u32 %v3478_v49, 23  ;;  %v3656_v25 = vsel %vm3642_vm1, %v3653_v5, %v3655_v46  ;;  %5941 = vmatprep.subr.msk.mxu0 %vm531_vm0, %v3608_v59  ;;  %vm3403_vm15 = vcmp.lt.s32.totalorder %v7344_v57, 0  ;;  %v3648_v16 = vsel %vm3642_vm1, %v3645_v31, %v3647_v50 }
 0x1dc   : > { %v7821_v43 = vmul.u32.u64.low %v7734_v56, %v3656_v25  ;;  %v7822_v52 = vmul.u32.u64.high %v7734_v56, %v3656_v25, %v7821_v43  ;;  %v3092_v12 = vand.u32 2139095040, %v7749_v15  ;;  %v3807_v45 = vand.u32 3, %v7726_v53 }
 0x1dd   : > { %v3480_v23 = vor.u32 4788187, %v3479_v6  ;;  %v3488_v19 = vsel %vm3403_vm15, %v3487_v33, %v7720_v44  ;;  %v3667_v61 = vadd.s32 1, %v7813_v58  ;;  %v7836_v42 = vmul.f32 %v7163_v32, %v6485_v1 }
 0x1de   : > { %vm7840_vm12 = vcmp.le.f32.partialorder %v3401_v63, 0.7853982  ;;  %v3483_v31 = vcvt.s32.f32 %v3476_v51  ;;  %v3093_v9 = vshrl.u32 %v3092_v12, 23  ;;  %v3664_v53 = vmul.u32 %v7734_v56, %v3648_v16 }
 0x1df   : > { %v3481_v41 = vand.u32 2147483647, %v3480_v23  ;;  %vm3666_vm2 = vc.u32 %v7822_v52, %v7812_v7  ;;  %v3089_v44 = vand.u32 2147483647, %v7749_v15  ;;  %v2960_v33 = vfloor.f32 %v2952_v40 }
 0x1e0   : > { %v7849_v32 = vsel %vm7840_vm12, 0, %v3488_v19  ;;  %v3668_v63 = vsel %vm3666_vm2, %v3667_v61, %v7813_v58  ;;  %v5913_v10 = vadd.s32 4294967169, %v3093_v9  ;;  %vm3808_vm8 = vcmp.lt.s32.totalorder %v3807_v45, 2 }
 0x1e1   : > { %v3484_v29 = vmul.f32 %v3483_v31, %v3481_v41  ;;  %v7852_v50 = vpop.eup %6172  ;;  %vm3809_vm14 = vcmp.eq.s32.totalorder %v3807_v45, 0  ;;  %v3669_v62 = vadd.s32 %v3668_v63, %v3664_v53  ;;  %v7855_v56 = vadd.f32 0.5, %v7836_v42 }
 0x1e2   : > { %v7857_v17 = vpop.eup %6174  ;;  %vm3812_vm3 = vcmp.eq.s32.totalorder %v3807_v45, 2  ;;  %v8693_v20 = vxor.u32 2147483648, %v7852_v50  ;;  %v3099_v8 = vadd.s32 1, %v5913_v10  ;;  %v3494_v18 = vadd.s32 3, %v7849_v32 }
 0x1e3   : > { %v3485_v47 = vxor.u32 2147483648, %v3484_v29  ;;  %v8694_v5 = vxor.u32 2147483648, %v7857_v17  ;;  %v3670_v0 = vadd.s32 536870912, %v3669_v62  ;;  %v3096_v27 = vand.u32 8388607, %v3089_v44 }
 0x1e4   : > { %v3814_v49 = vsel %vm3812_vm3, %v8693_v20, %v7857_v17  ;;  %vm3100_vm5 = vcmp.gt.s32.totalorder %v3099_v8, 0  ;;  %v2968_v21 = vsub.f32 %v7742_v13, %v2960_v33  ;;  %vm3805_vm6 = vweird.f32 %v7382_v60 }
 0x1e5   : > { %v3486_v30 = vsel %vm3403_vm15, %v3485_v47, %v3484_v29  ;;  %v3811_v46 = vsel %vm3809_vm14, %v7852_v50, %v8694_v5  ;;  %v7877_v59 = vshrl.u32 %v3670_v0, 30  ;;  %v3101_v51 = vsel %vm3100_vm5, %v3099_v8, 0 }
 0x1e6   : > { %v3489_v58 = vsel %vm7840_vm12, %v7344_v57, %v3486_v30  ;;  %v3815_v6 = vsel %vm3808_vm8, %v3811_v46, %v3814_v49  ;;  %v3103_v25 = vand.u32 31, %v3101_v51  ;;  %v2957_v40 = vfloor.f32 %v7855_v56 }
 0x1e7   : > { %6176 = vcosq.f32 %v3489_v58  ;;  %v3816_v13 = vsel %vm3805_vm6, nan, %v3815_v6  ;;  %v3672_v43 = vshll.u32 %v7877_v59, 30  ;;  %v7886_v23 = vand.u32 3, %v3494_v18 }
 0x1e8   : > { %6178 = vsinq.f32 %v3489_v58  ;;  %5947 = vmatprep.subr.msk.mxu1 %vm531_vm0, %v3816_v13  ;;  %v7889_v16 = vadd.s32 %v7812_v7, %v7822_v52  ;;  %v3097_v12 = vor.u32 8388608, %v3096_v27  ;;  %v3104_v45 = vsub.s32 32, %v3103_v25 }
 0x1e9   : > { %v7891_v19 = vsub.s32 %v3669_v62, %v3672_v43  ;;  %v3102_v61 = vshrl.u32 %v3101_v51, 5  ;;  %v3106_v22 = vshll.u32 %v6266_v28, %v3103_v25  ;;  %v7894_v41 = vmul.f32 6.2831855, %v2968_v21 }
 0x1ea   : > { %v3107_v31 = vshrl.u32 %v8738_v26, %v3104_v45  ;;  %v3109_v9 = vshll.u32 %v8738_v26, %v3103_v25  ;;  %v3110_v53 = vshrl.u32 %v8739_v38, %v3104_v45  ;;  %v3112_v33 = vshll.u32 %v8739_v38, %v3103_v25 }
 0x1eb   : > { %v3675_v7 = vsub.s32 0, %v7891_v19  ;;  %v3113_v52 = vshrl.u32 %v6269_v37, %v3104_v45  ;;  %v3115_v29 = vshll.u32 %v6269_v37, %v3103_v25  ;;  %v3116_v63 = vshrl.u32 %v6270_v39, %v3104_v45 }
 0x1ec   : > { %v3108_v10 = vor.u32 %v3107_v31, %v3106_v22  ;;  %v3111_v62 = vor.u32 %v3110_v53, %v3109_v9  ;;  %v3118_v47 = vshll.u32 %v6270_v39, %v3103_v25  ;;  %v3119_v8 = vshrl.u32 %v8740_v35, %v3104_v45 }
 0x1ed   : > { %vm3500_vm11 = vcmp.eq.s32.totalorder %v7886_v23, 2  ;;  %v5934_v18 = vmin.u32 %v3675_v7, %v7891_v19  ;;  %v3114_v0 = vor.u32 %v3113_v52, %v3112_v33  ;;  %v3117_v27 = vor.u32 %v3116_v63, %v3115_v29 }
 0x1ee   : > { %v7908_v49 = vshll.u32 %v3097_v12, 8  ;;  %vm3497_vm1 = vcmp.eq.s32.totalorder %v7886_v23, 0  ;;  %v3105_v30 = vshrl.u32 %v6266_v28, %v3104_v45  ;;  %v3120_v21 = vor.u32 %v3119_v8, %v3118_v47 }
 0x1ef   : > { %vm3121_vm13 = vcmp.lt.s32.totalorder %v3102_v61, 1  ;;  %v3300_v46 = vand.u32 2139095040, %v7894_v41  ;;  %vm3496_vm4 = vcmp.lt.s32.totalorder %v7886_v23, 2  ;;  %v3677_v58 = vclz %v5934_v18 }
 0x1f0   : > { %vm3122_vm10 = vcmp.lt.s32.totalorder %v3102_v61, 2  ;;  %vm3123_vm15 = vcmp.lt.s32.totalorder %v3102_v61, 3  ;;  %vm3124_vm12 = vcmp.lt.s32.totalorder %v3102_v61, 4  ;;  %v3125_v51 = vsel %vm3121_vm13, %v3105_v30, %v3108_v10 }
 0x1f1   : > { %v3126_v6 = vsel %vm3124_vm12, %v3114_v0, 2102212464  ;;  %v3129_v25 = vsel %vm3121_vm13, %v3108_v10, %v3111_v62  ;;  %v3130_v13 = vsel %vm3124_vm12, %v3117_v27, 920167782  ;;  %v5935_v43 = vadd.s32 4294967294, %v3677_v58 }
 0x1f2   : > { %v3127_v12 = vsel %vm3123_vm15, %v3111_v62, %v3126_v6  ;;  %v3131_v22 = vsel %vm3123_vm15, %v3114_v0, %v3130_v13  ;;  %v3133_v45 = vsel %vm3121_vm13, %v3111_v62, %v3114_v0  ;;  %v3695_v31 = vsub.s32 4, %v7877_v59 }
 0x1f3   : > { %v3132_v9 = vsel %vm3122_vm10, %v3129_v25, %v3131_v22  ;;  %v3134_v53 = vsel %vm3124_vm12, %v3120_v21, 1326507024  ;;  %v3301_v33 = vshrl.u32 %v3300_v46, 23  ;;  %vm5936_vm2 = vcmp.lt.s32.totalorder %v5935_v43, 0 }
 0x1f4   : > { %v7918_v7 = vpop.eup %6176  ;;  %v3135_v52 = vsel %vm3123_vm15, %v3117_v27, %v3134_v53  ;;  %v7922_v29 = vmul.u32.u64.low %v7908_v49, %v3132_v9  ;;  %v7923_v63 = vmul.u32.u64.high %v7908_v49, %v3132_v9, %v7922_v29  ;;  %v3680_v47 = vsel %vm5936_vm2, 0, %v5935_v43 }
 0x1f5   : > { %v7926_v10 = vpop.eup %6178  ;;  %v8695_v62 = vxor.u32 2147483648, %v7918_v7  ;;  %v3128_v8 = vsel %vm3122_vm10, %v3125_v51, %v3127_v12  ;;  %v3136_v18 = vsel %vm3122_vm10, %v3133_v45, %v3135_v52  ;;  %v3681_v30 = vsub.s32 32, %v3680_v47 }
 0x1f6   : > { %v8696_v0 = vxor.u32 2147483648, %v7926_v10  ;;  %v3682_v21 = vshll.u32 %v7891_v19, %v3680_v47  ;;  %v3685_v27 = vsub.s32 4294967266, %v3680_v47  ;;  %v5921_v25 = vadd.s32 4294967169, %v3301_v33 }
 0x1f7   : > { %v3502_v46 = vsel %vm3500_vm11, %v8695_v62, %v7926_v10  ;;  %v7939_v58 = vmul.u32.u64.low %v7908_v49, %v3136_v18  ;;  %v7940_v6 = vmul.u32.u64.high %v7908_v49, %v3136_v18, %v7939_v58  ;;  %v3683_v19 = vshrl.u32 %v7889_v16, %v3681_v30 }
 0x1f8   : > { %v3499_v61 = vsel %vm3497_vm1, %v7918_v7, %v8696_v0  ;;  %v3686_v51 = vadd.s32 127, %v3685_v27  ;;  %v3147_v13 = vadd.s32 1, %v7923_v63  ;;  %vm3493_vm8 = vweird.f32 %v7344_v57 }
 0x1f9   : > { %v3503_v43 = vsel %vm3496_vm4, %v3499_v61, %v3502_v46  ;;  %vm3611_vm14 = vcmp.lt.s32.totalorder %v7626_v24, 0  ;;  %v3307_v12 = vadd.s32 1, %v5921_v25  ;;  %v3684_v45 = vor.u32 %v3683_v19, %v3682_v21 }
 0x1fa   : > { %v3504_v22 = vsel %vm3493_vm8, nan, %v3503_v43  ;;  %v3687_v9 = vshll.u32 %v3686_v51, 23  ;;  %v2965_v16 = vsub.f32 %v7836_v42, %v2957_v40  ;;  %v3144_v53 = vmul.u32 %v7908_v49, %v3128_v8 }
 0x1fb   : > { %5942 = vmatpush1.msk.msra.mxu0 %vm531_vm0, %v3504_v22  ;;  %vm3146_vm3 = vc.u32 %v7940_v6, %v7922_v29  ;;  %v3297_v23 = vand.u32 2147483647, %v7894_v41  ;;  %vm3308_vm5 = vcmp.gt.s32.totalorder %v3307_v12, 0  ;;  %v3696_v52 = vsel %vm3611_vm14, %v3695_v31, %v7877_v59  ;;  %v1860_v22 = vld [vmem:[%s8661_s5 + $0x8] sm:$0xff] }
 0x1fc   : > { %v3688_v33 = vor.u32 4788187, %v3687_v9  ;;  %v3148_v47 = vsel %vm3146_vm3, %v3147_v13, %v7923_v63  ;;  %v3309_v56 = vsel %vm3308_vm5, %v3307_v12, 0  ;;  %vm7969_vm11 = vcmp.le.f32.partialorder %v3609_v36, 0.7853982  ;;  %5900 = vmatmul.mubr.msk.f32.gmra.mxu0 %vm1640_vm7, %v1860_v22  ;;  %5906 = vmatmul.mubr.msk.f32.gmra.mxu1 %vm1640_vm7, %v1860_v22 }
 0x1fd   : > { %v3149_v18 = vadd.s32 %v3148_v47, %v3144_v53  ;;  %v3311_v42 = vand.u32 31, %v3309_v56  ;;  %v3691_v8 = vcvt.s32.f32 %v3684_v45  ;;  %v7975_v30 = vsel %vm7969_vm11, 0, %v3696_v52  ;;  %2787 = vmatprep.mubr.f32.mxu0 %v8736_v3  ;;  %2876 = vmatprep.mubr.f32.mxu1 %v8736_v3 }
 0x1fe   : > { %v3689_v49 = vand.u32 2147483647, %v3688_v33  ;;  %v7977_v59 = vmul.f32 6.2831855, %v2965_v16  ;;  %v3304_v63 = vand.u32 8388607, %v3297_v23  ;;  %vm3701_vm2 = vweird.f32 %v7626_v24 }
 0x1ff   : > { %v3150_v21 = vadd.s32 536870912, %v3149_v18  ;;  %v3312_v27 = vsub.s32 32, %v3311_v42  ;;  %v3314_v46 = vshll.u32 %v6266_v28, %v3311_v42  ;;  %v3317_v36 = vshll.u32 %v8738_v26, %v3311_v42 }
 0x200   : > { %v3692_v31 = vmul.f32 %v3691_v8, %v3689_v49  ;;  %v3323_v19 = vshll.u32 %v6269_v37, %v3311_v42  ;;  %v3310_v9 = vshrl.u32 %v3309_v56, 5  ;;  %v3320_v16 = vshll.u32 %v8739_v38, %v3311_v42  ;;  %v1861_v56 = vld [vmem:[%s8661_s5 + $0x10] sm:$0xff] }
 0x201   : > { %v7983_v58 = vshrl.u32 %v3150_v21, 30  ;;  %v3315_v25 = vshrl.u32 %v8738_v26, %v3312_v27  ;;  %v3318_v61 = vshrl.u32 %v8739_v38, %v3312_v27  ;;  %v3321_v13 = vshrl.u32 %v6269_v37, %v3312_v27  ;;  %5901 = vmatmul.mubr.msk.f32.gmra.mxu0 %vm1640_vm7, %v1861_v56  ;;  %5907 = vmatmul.mubr.msk.f32.gmra.mxu1 %vm1640_vm7, %v1861_v56 }
 0x202   : > { %v3693_v51 = vxor.u32 2147483648, %v3692_v31  ;;  %v3324_v43 = vshrl.u32 %v6270_v39, %v3312_v27  ;;  %v3327_v12 = vshrl.u32 %v8740_v35, %v3312_v27  ;;  %v3326_v53 = vshll.u32 %v6270_v39, %v3311_v42  ;;  %2793 = vmatprep.mubr.f32.mxu0 %v8736_v3  ;;  %2882 = vmatprep.mubr.f32.mxu1 %v8736_v3 }
 0x203   : > { %v3152_v45 = vshll.u32 %v7983_v58, 30  ;;  %v3316_v52 = vor.u32 %v3315_v25, %v3314_v46  ;;  %v3319_v47 = vor.u32 %v3318_v61, %v3317_v36  ;;  %v3702_v8 = vadd.s32 3, %v7975_v30 }
 0x204   : > { %v3694_v33 = vsel %vm3611_vm14, %v3693_v51, %v3692_v31  ;;  %v3325_v49 = vor.u32 %v3324_v43, %v3323_v19  ;;  %v3322_v22 = vor.u32 %v3321_v13, %v3320_v16  ;;  %v3305_v31 = vor.u32 8388608, %v3304_v63  ;;  %v1862_v63 = vld [vmem:[%s8661_s5 + $0x18] sm:$0xff] }
 0x205   : > { %v3697_v42 = vsel %vm7969_vm11, %v7626_v24, %v3694_v33  ;;  %v8009_v21 = vsub.s32 %v3149_v18, %v3152_v45  ;;  %v3328_v46 = vor.u32 %v3327_v12, %v3326_v53  ;;  %v2988_v36 = vand.u32 2139095040, %v7977_v59  ;;  %5902 = vmatmul.mubr.msk.f32.gmra.mxu0 %vm1640_vm7, %v1862_v63  ;;  %5908 = vmatmul.mubr.msk.f32.gmra.mxu1 %vm1640_vm7, %v1862_v63 }
 0x206   : > { %6180 = vcosq.f32 %v3697_v42  ;;  %vm3329_vm1 = vcmp.lt.s32.totalorder %v3310_v9, 1  ;;  %vm3332_vm13 = vcmp.lt.s32.totalorder %v3310_v9, 4  ;;  %v3313_v18 = vshrl.u32 %v6266_v28, %v3312_v27  ;;  %3905 = vmatprep.mubr.f32.mxu0 %v8736_v3  ;;  %3994 = vmatprep.mubr.f32.mxu1 %v8736_v3 }
 0x207   : > { %6182 = vsinq.f32 %v3697_v42  ;;  %v3155_v25 = vsub.s32 0, %v8009_v21  ;;  %vm3331_vm4 = vcmp.lt.s32.totalorder %v3310_v9, 3  ;;  %v3337_v40 = vsel %vm3329_vm1, %v3316_v52, %v3319_v47 }
 0x208   : > { %v3338_v61 = vsel %vm3332_vm13, %v3325_v49, 920167782  ;;  %vm3330_vm10 = vcmp.lt.s32.totalorder %v3310_v9, 2  ;;  %v3334_v51 = vsel %vm3332_vm13, %v3322_v22, 2102212464  ;;  %v3341_v43 = vsel %vm3329_vm1, %v3319_v47, %v3322_v22 }
 0x209   : > { %v5914_v19 = vmin.u32 %v3155_v25, %v8009_v21  ;;  %v3339_v27 = vsel %vm3331_vm4, %v3322_v22, %v3338_v61  ;;  %v3342_v12 = vsel %vm3332_vm13, %v3328_v46, 1326507024  ;;  %v3345_v45 = vshll.u32 %v3305_v31, 8 }
 0x20a   : > { %v3340_v13 = vsel %vm3330_vm10, %v3337_v40, %v3339_v27  ;;  %v8030_v16 = vand.u32 3, %v3702_v8  ;;  %v3333_v33 = vsel %vm3329_vm1, %v3313_v18, %v3316_v52  ;;  %v3335_v56 = vsel %vm3331_vm4, %v3319_v47, %v3334_v51  ;;  %v479_v47 = vld [vmem:[%s8659_s3 + $0x18] sm:$0xff] }
 0x20b   : > { %v3157_v53 = vclz %v5914_v19  ;;  %v3343_v42 = vsel %vm3331_vm4, %v3325_v49, %v3342_v12  ;;  %v8037_v25 = vmul.u32.u64.low %v3345_v45, %v3340_v13  ;;  %v8038_v40 = vmul.u32.u64.high %v3345_v45, %v3340_v13, %v8037_v25  ;;  %497 = vperm.xlu1 %6134, %v479_v47   ;;  %v478_v12 = vld [vmem:[%s8659_s3 + $0x10] sm:$0xff] }
 0x20c   : > { %v3344_v22 = vsel %vm3330_vm10, %v3341_v43, %v3343_v42  ;;  %v2989_v52 = vshrl.u32 %v2988_v36, 23  ;;  %vm3091_vm15 = vcmp.lt.s32.totalorder %v7749_v15, 0  ;;  %v3336_v49 = vsel %vm3330_vm10, %v3333_v33, %v3335_v56 }
 0x20d   : > { %v5915_v8 = vadd.s32 4294967294, %v3157_v53  ;;  %v8045_v31 = vmul.u32.u64.low %v3345_v45, %v3344_v22  ;;  %v8046_v46 = vmul.u32.u64.high %v3345_v45, %v3344_v22, %v8045_v31  ;;  %v8054_v61 = vmul.f32 %v7283_v55, %v6485_v1 }
 0x20e   : > { %v5909_v18 = vadd.s32 4294967169, %v2989_v52  ;;  %vm3705_vm14 = vcmp.eq.s32.totalorder %v8030_v16, 0  ;;  %v3355_v63 = vadd.s32 1, %v8038_v40  ;;  %v2985_v19 = vand.u32 2147483647, %v7977_v59 }
 0x20f   : > { %vm5916_vm12 = vcmp.lt.s32.totalorder %v5915_v8, 0  ;;  %v3145_v51 = vadd.s32 %v7922_v29, %v7940_v6  ;;  %v3175_v1 = vsub.s32 4, %v7983_v58  ;;  %v3352_v55 = vmul.u32 %v3345_v45, %v3336_v49  ;;  %492 = vperm.xlu1 %6134, %v478_v12  }
 0x210   : > { %v3160_v36 = vsel %vm5916_vm12, 0, %v5915_v8  ;;  %v2995_v13 = vadd.s32 1, %v5909_v18  ;;  %vm3354_vm3 = vc.u32 %v8046_v46, %v8037_v25  ;;  %vm3708_vm11 = vcmp.eq.s32.totalorder %v8030_v16, 2 }
 0x211   : > { %v3161_v9 = vsub.s32 32, %v3160_v36  ;;  %v3165_v27 = vsub.s32 4294967266, %v3160_v36  ;;  %v3162_v43 = vshll.u32 %v8009_v21, %v3160_v36  ;;  %v3356_v29 = vsel %vm3354_vm3, %v3355_v63, %v8038_v40  ;;  %v476_v36 = vld [vmem:[%s8659_s3] sm:$0xff] }
 0x212   : > { %vm2996_vm5 = vcmp.gt.s32.totalorder %v2995_v13, 0  ;;  %v3357_v45 = vadd.s32 %v3356_v29, %v3352_v55  ;;  %v2951_v31 = vadd.f32 0.5, %v8054_v61  ;;  %v2992_v49 = vand.u32 8388607, %v2985_v19 }
 0x213   : > { %v8069_v53 = vpop.eup %6180  ;;  %v3163_v33 = vshrl.u32 %v3145_v51, %v3161_v9  ;;  %v3166_v56 = vadd.s32 127, %v3165_v27  ;;  %v2997_v42 = vsel %vm2996_vm5, %v2995_v13, 0  ;;  %vm3704_vm1 = vcmp.lt.s32.totalorder %v8030_v16, 2  ;;  %482 = vperm.xlu1 %6134, %v476_v36  }
 0x214   : > { %v8072_v6 = vpop.eup %6182  ;;  %v3709_v21 = vxor.u32 2147483648, %v8069_v53  ;;  %v3358_v47 = vadd.s32 536870912, %v3357_v45  ;;  %v2999_v18 = vand.u32 31, %v2997_v42  ;;  %v3176_v9 = vsel %vm3091_vm15, %v3175_v1, %v7983_v58 }
 0x215   : > { %v3706_v8 = vxor.u32 2147483648, %v8072_v6  ;;  %v3164_v22 = vor.u32 %v3163_v33, %v3162_v43  ;;  %v3167_v52 = vshll.u32 %v3166_v56, 23  ;;  %vm8097_vm13 = vcmp.le.f32.partialorder %v3089_v44, 0.7853982 }
 0x216   : > { %v3710_v40 = vsel %vm3708_vm11, %v3709_v21, %v8072_v6  ;;  %v8101_v43 = vshrl.u32 %v3358_v47, 30  ;;  %v3000_v55 = vsub.s32 32, %v2999_v18  ;;  %v2959_v56 = vfloor.f32 %v2951_v31 }
 0x217   : > { %v3707_v63 = vsel %vm3705_vm14, %v8069_v53, %v3706_v8  ;;  %v3168_v51 = vor.u32 4788187, %v3167_v52  ;;  %v3171_v33 = vcvt.s32.f32 %v3164_v22  ;;  %v8108_v58 = vsel %vm8097_vm13, 0, %v3176_v9 }
 0x218   : > { %v3711_v27 = vsel %vm3704_vm1, %v3707_v63, %v3710_v40  ;;  %v3360_v44 = vshll.u32 %v8101_v43, 30  ;;  %v2993_v1 = vor.u32 8388608, %v2992_v49  ;;  %v3003_v29 = vshrl.u32 %v8738_v26, %v3000_v55 }
 0x219   : > { %v3712_v16 = vsel %vm3701_vm2, nan, %v3711_v27  ;;  %v3169_v12 = vand.u32 2147483647, %v3168_v51  ;;  %v3002_v40 = vshll.u32 %v6266_v28, %v2999_v18  ;;  %v3006_v47 = vshrl.u32 %v8739_v38, %v3000_v55 }
 0x21a   : > { %5948 = vmatpush1.msk.msra.mxu1 %vm531_vm0, %v3712_v16  ;;  %v3009_v36 = vshrl.u32 %v6269_v37, %v3000_v55  ;;  %v8115_v22 = vsub.s32 %v3357_v45, %v3360_v44  ;;  %v3005_v31 = vshll.u32 %v8738_v26, %v2999_v18  ;;  %v3008_v63 = vshll.u32 %v8739_v38, %v2999_v18  ;;  %v5103_v45 = vld [vmem:[%s8665_s9 + $0x10] sm:$0xff] }
 0x21b   : > { %v3172_v52 = vmul.f32 %v3171_v33, %v3169_v12  ;;  %v3012_v51 = vshrl.u32 %v6270_v39, %v3000_v55  ;;  %v2998_v27 = vshrl.u32 %v2997_v42, 5  ;;  %v3011_v49 = vshll.u32 %v6269_v37, %v2999_v18  ;;  %5117 = vperm.xlu1 %6134, %v5103_v45  }
 0x21c   : > { %v2967_v16 = vsub.f32 %v8054_v61, %v2959_v56  ;;  %v3363_v12 = vsub.s32 0, %v8115_v22  ;;  %v3004_v33 = vor.u32 %v3003_v29, %v3002_v40  ;;  %v3007_v20 = vor.u32 %v3006_v47, %v3005_v31 }
 0x21d   : > { %v3173_v9 = vxor.u32 2147483648, %v3172_v52  ;;  %v3010_v5 = vor.u32 %v3009_v36, %v3008_v63  ;;  %v3013_v62 = vor.u32 %v3012_v51, %v3011_v49  ;;  %v3014_v0 = vshll.u32 %v6270_v39, %v2999_v18 }
 0x21e   : > { %v3015_v42 = vshrl.u32 %v8740_v35, %v3000_v55  ;;  %v3182_v56 = vadd.s32 3, %v8108_v58  ;;  %v5922_v29 = vmin.u32 %v3363_v12, %v8115_v22  ;;  %v8135_v40 = vshll.u32 %v2993_v1, 8 }
 0x21f   : > { %v3174_v44 = vsel %vm3091_vm15, %v3173_v9, %v3172_v52  ;;  %v5101_v52 = vld [vmem:[%s8665_s9] sm:$0xff]  ;;  %vm3020_vm4 = vcmp.lt.s32.totalorder %v2998_v27, 4  ;;  %v8140_v18 = vmul.f32 6.2831855, %v2967_v16  ;;  %vm3017_vm10 = vcmp.lt.s32.totalorder %v2998_v27, 1 }
 0x220   : > { %v3177_v61 = vsel %vm8097_vm13, %v7749_v15, %v3174_v44  ;;  %v3016_v47 = vor.u32 %v3015_v42, %v3014_v0  ;;  %v3365_v36 = vclz %v5922_v29  ;;  %v3022_v13 = vsel %vm3020_vm4, %v3010_v5, 2102212464  ;;  %5107 = vperm.xlu1 %6134, %v5101_v52   ;;  %v5338_v0 = vld [vmem:[%s8667_s11 + $0x10] sm:$0xff] }
 0x221   : > { %6184 = vcosq.f32 %v3177_v61  ;;  %v3001_v31 = vshrl.u32 %v6266_v28, %v3000_v55  ;;  %vm3019_vm15 = vcmp.lt.s32.totalorder %v2998_v27, 3  ;;  %v3025_v63 = vsel %vm3017_vm10, %v3004_v33, %v3007_v20 }
 0x222   : > { %6186 = vsinq.f32 %v3177_v61  ;;  %v3026_v1 = vsel %vm3020_vm4, %v3013_v62, 920167782  ;;  %v5923_v51 = vadd.s32 4294967294, %v3365_v36  ;;  %vm3018_vm12 = vcmp.lt.s32.totalorder %v2998_v27, 2 }
 0x223   : > { %v3027_v9 = vsel %vm3019_vm15, %v3010_v5, %v3026_v1  ;;  %v3029_v49 = vsel %vm3017_vm10, %v3007_v20, %v3010_v5  ;;  %v3021_v16 = vsel %vm3017_vm10, %v3001_v31, %v3004_v33  ;;  %v3023_v12 = vsel %vm3019_vm15, %v3007_v20, %v3022_v13 }
 0x224   : > { %v3028_v45 = vsel %vm3018_vm12, %v3025_v63, %v3027_v9  ;;  %v3030_v44 = vsel %vm3020_vm4, %v3016_v47, 1326507024  ;;  %vm5924_vm14 = vcmp.lt.s32.totalorder %v5923_v51, 0  ;;  %v3196_v52 = vand.u32 2139095040, %v8140_v18  ;;  %5352 = vperm.xlu1 %6134, %v5338_v0  }
 0x225   : > { %v3031_v55 = vsel %vm3019_vm15, %v3013_v62, %v3030_v44  ;;  %v8151_v42 = vmul.u32.u64.low %v8135_v40, %v3028_v45  ;;  %v8152_v61 = vmul.u32.u64.high %v8135_v40, %v3028_v45, %v8151_v42  ;;  %v3368_v29 = vsel %vm5924_vm14, 0, %v5923_v51  ;;  %v5336_v62 = vld [vmem:[%s8667_s11] sm:$0xff] }
 0x226   : > { %v3032_v5 = vsel %vm3018_vm12, %v3029_v49, %v3031_v55  ;;  %v3183_v36 = vand.u32 3, %v3182_v56  ;;  %v3353_v20 = vadd.s32 %v8037_v25, %v8046_v46  ;;  %v3369_v33 = vsub.s32 32, %v3368_v29 }
 0x227   : > { %v3373_v13 = vsub.s32 4294967266, %v3368_v29  ;;  %v3024_v47 = vsel %vm3018_vm12, %v3021_v16, %v3023_v12  ;;  %v8164_v31 = vmul.u32.u64.low %v8135_v40, %v3032_v5  ;;  %v8165_v63 = vmul.u32.u64.high %v8135_v40, %v3032_v5, %v8164_v31 }
 0x228   : > { %v3197_v1 = vshrl.u32 %v3196_v52, 23  ;;  %v3370_v51 = vshll.u32 %v8115_v22, %v3368_v29  ;;  %v3371_v9 = vshrl.u32 %v3353_v20, %v3369_v33  ;;  %v3043_v49 = vadd.s32 1, %v8152_v61  ;;  %5342 = vperm.xlu1 %6134, %v5336_v62  }
 0x229   : > { %v3374_v56 = vadd.s32 127, %v3373_v13  ;;  %vm3299_vm3 = vcmp.lt.s32.totalorder %v7894_v41, 0  ;;  %v3040_v27 = vmul.u32 %v8135_v40, %v3024_v47  ;;  %vm3042_vm5 = vc.u32 %v8165_v63, %v8151_v42 }
 0x22a   : > { %v5917_v25 = vadd.s32 4294967169, %v3197_v1  ;;  %v3372_v46 = vor.u32 %v3371_v9, %v3370_v51  ;;  %v8697_v16 = vand.u32 2147483647, %v8140_v18  ;;  %vm3185_vm11 = vcmp.eq.s32.totalorder %v3183_v36, 0 }
 0x22b   : > { %v3375_v0 = vshll.u32 %v3374_v56, 23  ;;  %v3383_v44 = vsub.s32 4, %v8101_v43  ;;  %v3044_v55 = vsel %vm3042_vm5, %v3043_v49, %v8152_v61  ;;  %vm3188_vm1 = vcmp.eq.s32.totalorder %v3183_v36, 2 }
 0x22c   : > { %v3203_v12 = vadd.s32 1, %v5917_v25  ;;  %v3045_v40 = vadd.s32 %v3044_v55, %v3040_v27  ;;  %v3379_v33 = vcvt.s32.f32 %v3372_v46  ;;  %v3200_v61 = vand.u32 8388607, %v8697_v16 }
 0x22d   : > { %v3376_v22 = vor.u32 4788187, %v3375_v0  ;;  %vm3184_vm4 = vcmp.lt.s32.totalorder %v3183_v36, 2  ;;  %v3384_v9 = vsel %vm3299_vm3, %v3383_v44, %v8101_v43  ;;  %vm3181_vm10 = vweird.f32 %v7749_v15 }
 0x22e   : > { %v8174_v45 = vpop.eup %6184  ;;  %vm3204_vm13 = vcmp.gt.s32.totalorder %v3203_v12, 0  ;;  %v3046_v47 = vadd.s32 536870912, %v3045_v40  ;;  %vm3298_vm15 = vcmp.le.f32.partialorder %v3297_v23, 0.7853982 }
 0x22f   : > { %v8178_v29 = vpop.eup %6186  ;;  %v3189_v5 = vxor.u32 2147483648, %v8174_v45  ;;  %v3377_v20 = vand.u32 2147483647, %v3376_v22  ;;  %v3205_v13 = vsel %vm3204_vm13, %v3203_v12, 0  ;;  %v8201_v36 = vsel %vm3298_vm15, 0, %v3384_v9 }
 0x230   : > { %v3186_v52 = vxor.u32 2147483648, %v8178_v29  ;;  %v3207_v31 = vand.u32 31, %v3205_v13  ;;  %v8195_v49 = vshrl.u32 %v3046_v47, 30  ;;  %v3201_v12 = vor.u32 8388608, %v3200_v61 }
 0x231   : > { %v3190_v62 = vsel %vm3188_vm1, %v3189_v5, %v8178_v29  ;;  %v3380_v51 = vmul.f32 %v3379_v33, %v3377_v20  ;;  %vm3389_vm1 = vweird.f32 %v7894_v41 }
 0x232   : > { %v3187_v1 = vsel %vm3185_vm11, %v8174_v45, %v3186_v52  ;;  %v3208_v25 = vsub.s32 32, %v3207_v31  ;;  %v3048_v27 = vshll.u32 %v8195_v49, 30  ;;  %v3210_v44 = vshll.u32 %v6266_v28, %v3207_v31 }
 0x233   : > { %v3191_v56 = vsel %vm3184_vm4, %v3187_v1, %v3190_v62  ;;  %v3381_v0 = vxor.u32 2147483648, %v3380_v51  ;;  %v3206_v62 = vshrl.u32 %v3205_v13, 5  ;;  %v3213_v47 = vshll.u32 %v8738_v26, %v3207_v31 }
 0x234   : > { %v3192_v46 = vsel %vm3181_vm10, nan, %v3191_v56  ;;  %v3211_v43 = vshrl.u32 %v8738_v26, %v3208_v25  ;;  %v3214_v55 = vshrl.u32 %v8739_v38, %v3208_v25  ;;  %v3217_v20 = vshrl.u32 %v6269_v37, %v3208_v25 }
 0x235   : > { %3871 = vmatprep.subr.mxu0 %v3192_v46  ;;  %v3382_v22 = vsel %vm3299_vm3, %v3381_v0, %v3380_v51  ;;  %v3049_v33 = vsub.s32 %v3045_v40, %v3048_v27  ;;  %v3216_v61 = vshll.u32 %v8739_v38, %v3207_v31  ;;  %v3219_v9 = vshll.u32 %v6269_v37, %v3207_v31 }
 0x236   : > { %v3385_v23 = vsel %vm3298_vm15, %v7894_v41, %v3382_v22  ;;  %v3212_v1 = vor.u32 %v3211_v43, %v3210_v44  ;;  %v3215_v56 = vor.u32 %v3214_v55, %v3213_v47  ;;  %v3220_v46 = vshrl.u32 %v6270_v39, %v3208_v25  ;;  %v8396_v41 = vpop.f32.mrf.mxu0 }
 0x237   : > { %6188 = vcosq.f32 %v3385_v23  ;;  %v3051_v51 = vsub.s32 0, %v3049_v33  ;;  %v3218_v0 = vor.u32 %v3217_v20, %v3216_v61  ;;  %v3222_v16 = vshll.u32 %v6270_v39, %v3207_v31 }
 0x238   : > { %6190 = vsinq.f32 %v3385_v23  ;;  %v3223_v22 = vshrl.u32 %v8740_v35, %v3208_v25  ;;  %v3390_v40 = vadd.s32 3, %v8201_v36  ;;  %v3221_v26 = vor.u32 %v3220_v46, %v3219_v9 }
 0x239   : > { %v5910_v13 = vmin.u32 %v3051_v51, %v3049_v33  ;;  %v3209_v27 = vshrl.u32 %v6266_v28, %v3208_v25  ;;  %vm3225_vm12 = vcmp.lt.s32.totalorder %v3206_v62, 1  ;;  %v3241_v38 = vshll.u32 %v3201_v12, 8 }
 0x23a   : > { %v3224_v43 = vor.u32 %v3223_v22, %v3222_v16  ;;  %vm3227_vm14 = vcmp.lt.s32.totalorder %v3206_v62, 3  ;;  %vm3228_vm3 = vcmp.lt.s32.totalorder %v3206_v62, 4  ;;  %v3233_v44 = vsel %vm3225_vm12, %v3212_v1, %v3215_v56 }
 0x23b   : > { %v3053_v37 = vclz %v5910_v13  ;;  %v3230_v55 = vsel %vm3228_vm3, %v3218_v0, 2102212464  ;;  %v3234_v23 = vsel %vm3228_vm3, %v3221_v26, 920167782  ;;  %v3237_v20 = vsel %vm3225_vm12, %v3215_v56, %v3218_v0 }
 0x23c   : > { %v3238_v47 = vsel %vm3228_vm3, %v3224_v43, 1326507024  ;;  %vm3226_vm5 = vcmp.lt.s32.totalorder %v3206_v62, 2  ;;  %v3235_v35 = vsel %vm3227_vm14, %v3218_v0, %v3234_v23  ;;  %v3391_v61 = vand.u32 3, %v3390_v40 }
 0x23d   : > { %v5911_v39 = vadd.s32 4294967294, %v3053_v37  ;;  %v3239_v31 = vsel %vm3227_vm14, %v3221_v26, %v3238_v47  ;;  %v3229_v9 = vsel %vm3225_vm12, %v3209_v27, %v3212_v1  ;;  %v3236_v28 = vsel %vm3226_vm5, %v3233_v44, %v3235_v35 }
 0x23e   : > { %v3240_v16 = vsel %vm3226_vm5, %v3237_v20, %v3239_v31  ;;  %v3231_v25 = vsel %vm3227_vm14, %v3215_v56, %v3230_v55  ;;  %v8227_v22 = vmul.u32.u64.low %v3241_v38, %v3236_v28  ;;  %v8228_v13 = vmul.u32.u64.high %v3241_v38, %v3236_v28, %v8227_v22 }
 0x23f   : > { %vm5912_vm11 = vcmp.lt.s32.totalorder %v5911_v39, 0  ;;  %v8224_v12 = vmul.u32.u64.low %v3241_v38, %v3240_v16  ;;  %v8225_v51 = vmul.u32.u64.high %v3241_v38, %v3240_v16, %v8224_v12  ;;  %v3041_v0 = vadd.s32 %v8151_v42, %v8165_v63 }
 0x240   : > { %v3056_v46 = vsel %vm5912_vm11, 0, %v5911_v39  ;;  %vm3392_vm13 = vcmp.lt.s32.totalorder %v3391_v61, 2  ;;  %v3232_v26 = vsel %vm3226_vm5, %v3229_v9, %v3231_v25  ;;  %vm3396_vm15 = vcmp.eq.s32.totalorder %v3391_v61, 2 }
 0x241   : > { %v3057_v40 = vsub.s32 32, %v3056_v46  ;;  %v3061_v1 = vsub.s32 4294967266, %v3056_v46  ;;  %v3058_v56 = vshll.u32 %v3049_v33, %v3056_v46  ;;  %vm3250_vm4 = vc.u32 %v8225_v51, %v8227_v22 }
 0x242   : > { %v3251_v23 = vadd.s32 1, %v8228_v13  ;;  %v4750_v42 = vand.u32 3, %v7975_v30  ;;  %v3248_v39 = vmul.u32 %v3241_v38, %v3232_v26  ;;  %vm3393_vm12 = vcmp.eq.s32.totalorder %v3391_v61, 0 }
 0x243   : > { %v3059_v43 = vshrl.u32 %v3041_v0, %v3057_v40  ;;  %v3062_v37 = vadd.s32 127, %v3061_v1  ;;  %v3071_v33 = vsub.s32 4, %v8195_v49  ;;  %v4235_v30 = vand.u32 3, %v8108_v58 }
 0x244   : > { %v6189_v27 = vpop.eup %6188  ;;  %v3252_v35 = vsel %vm3250_vm4, %v3251_v23, %v8228_v13  ;;  %vm4752_vm14 = vcmp.eq.s32.totalorder %v4750_v42, 0  ;;  %vm4755_vm3 = vcmp.eq.s32.totalorder %v4750_v42, 2  ;;  %vm4751_vm5 = vcmp.lt.s32.totalorder %v4750_v42, 2 }
 0x245   : > { %v6191_v44 = vpop.eup %6190  ;;  %v3397_v55 = vxor.u32 2147483648, %v6189_v27  ;;  %v3060_v20 = vor.u32 %v3059_v43, %v3058_v56  ;;  %v3063_v47 = vshll.u32 %v3062_v37, 23  ;;  %v3253_v16 = vadd.s32 %v3252_v35, %v3248_v39 }
 0x246   : > { %v3394_v63 = vxor.u32 2147483648, %v6191_v44  ;;  %v4754_v0 = vsel %vm4752_vm14, %v8069_v53, %v3706_v8  ;;  %v4757_v61 = vsel %vm4755_vm3, %v3709_v21, %v8072_v6  ;;  %vm4237_vm11 = vcmp.eq.s32.totalorder %v4235_v30, 0 }
 0x247   : > { %v3398_v62 = vsel %vm3396_vm15, %v3397_v55, %v6191_v44  ;;  %v3064_v9 = vor.u32 4788187, %v3063_v47  ;;  %v3067_v28 = vcvt.s32.f32 %v3060_v20  ;;  %v3254_v46 = vadd.s32 536870912, %v3253_v16 }
 0x248   : > { %v3395_v31 = vsel %vm3393_vm12, %v6189_v27, %v3394_v63  ;;  %v4758_v58 = vsel %vm4751_vm5, %v4754_v0, %v4757_v61  ;;  %v4239_v1 = vsel %vm4237_vm11, %v8174_v45, %v3186_v52  ;;  %vm4236_vm4 = vcmp.lt.s32.totalorder %v4235_v30, 2 }
 0x249   : > { %v3399_v25 = vsel %vm3392_vm13, %v3395_v31, %v3398_v62  ;;  %v3065_v38 = vand.u32 2147483647, %v3064_v9  ;;  %vm4240_vm13 = vcmp.eq.s32.totalorder %v4235_v30, 2  ;;  %v8251_v40 = vshrl.u32 %v3254_v46, 30 }
 0x24a   : > { %v3400_v12 = vsel %vm3389_vm1, nan, %v3399_v25  ;;  %v8258_v26 = vsel %vm3701_vm2, nan, %v4758_v58  ;;  %v4242_v53 = vsel %vm4240_vm13, %v3189_v5, %v8178_v29  ;;  %v4441_v6 = vand.u32 3, %v8201_v36 }
 0x24b   : > { %3960 = vmatprep.subr.mxu1 %v3400_v12  ;;  %v3068_v13 = vmul.f32 %v3067_v28, %v3065_v38  ;;  %v3256_v8 = vshll.u32 %v8251_v40, 30  ;;  %v8265_v56 = vsel %vm4236_vm4, %v4239_v1, %v4242_v53  ;;  %vm2986_vm15 = vcmp.le.f32.partialorder %v2985_v19, 0.7853982 }
 0x24c   : > { %vm2987_vm12 = vcmp.lt.s32.totalorder %v7977_v59, 0  ;;  %vm4443_vm14 = vcmp.eq.s32.totalorder %v4441_v6, 0  ;;  %vm4446_vm2 = vcmp.eq.s32.totalorder %v4441_v6, 2  ;;  %vm4442_vm3 = vcmp.lt.s32.totalorder %v4441_v6, 2  ;;  %v8296_v6 = vld [vmem:[%s8662_s6] sm:$0xff] }
 0x24d   : > { %v3069_v21 = vxor.u32 2147483648, %v3068_v13  ;;  %v3257_v52 = vsub.s32 %v3253_v16, %v3256_v8  ;;  %v4445_v43 = vsel %vm4443_vm14, %v6189_v27, %v3394_v63  ;;  %v3072_v45 = vsel %vm2987_vm12, %v3071_v33, %v8195_v49 }
 0x24e   : > { %v4448_v5 = vsel %vm4446_vm2, %v3397_v55, %v6191_v44  ;;  %v3074_v23 = vsel %vm2986_vm15, 0, %v3072_v45  ;;  %v4647_v42 = vand.u32 3, %v7690_v11  ;;  %v4544_v55 = vand.u32 3, %v7849_v32 }
 0x24f   : > { %v3070_v24 = vsel %vm2987_vm12, %v3069_v21, %v3068_v13  ;;  %v3259_v36 = vsub.s32 0, %v3257_v52  ;;  %v8272_v37 = vsel %vm4442_vm3, %v4445_v43, %v4448_v5  ;;  %v3078_v47 = vadd.s32 3, %v3074_v23 }
 0x250   : > { %v3073_v29 = vsel %vm2986_vm15, %v7977_v59, %v3070_v24  ;;  %vm4649_vm5 = vcmp.eq.s32.totalorder %v4647_v42, 0  ;;  %vm4652_vm13 = vcmp.eq.s32.totalorder %v4647_v42, 2  ;;  %v3249_v63 = vadd.s32 %v8227_v22, %v8225_v51 }
 0x251   : > { %6192 = vcosq.f32 %v3073_v29  ;;  %v5918_v19 = vmin.u32 %v3259_v36, %v3257_v52  ;;  %v4651_v49 = vsel %vm4649_vm5, %v7775_v4, %v3602_v2  ;;  %v3079_v27 = vand.u32 3, %v3078_v47  ;;  %v2983_v36 = vld [vmem:[%s8662_s6 + $0x10] sm:$0xff] }
 0x252   : > { %6194 = vsinq.f32 %v3073_v29  ;;  %v4654_v11 = vsel %vm4652_vm13, %v3605_v34, %v7781_v48  ;;  %vm3077_vm4 = vweird.f32 %v7977_v59  ;;  %vm4648_vm15 = vcmp.lt.s32.totalorder %v4647_v42, 2 }
 0x253   : > { %v3261_v20 = vclz %v5918_v19  ;;  %v4132_v9 = vand.u32 3, %v3074_v23  ;;  %vm3080_vm12 = vcmp.lt.s32.totalorder %v3079_v27, 2  ;;  %vm3081_vm14 = vcmp.eq.s32.totalorder %v3079_v27, 0  ;;  %v2984_v19 = vld [vmem:[%s8662_s6 + $0x18] sm:$0xff] }
 0x254   : > { %v4655_v32 = vsel %vm4648_vm15, %v4651_v49, %v4654_v11  ;;  %vm4546_vm2 = vcmp.eq.s32.totalorder %v4544_v55, 0  ;;  %vm4549_vm3 = vcmp.eq.s32.totalorder %v4544_v55, 2  ;;  %vm3084_vm5 = vcmp.eq.s32.totalorder %v3079_v27, 2 }
 0x255   : > { %v5919_v39 = vadd.s32 4294967294, %v3261_v20  ;;  %v8751_v4 = vxor.u32 2147483648, %v7926_v10  ;;  %v8752_v34 = vxor.u32 2147483648, %v7918_v7  ;;  %vm4137_vm13 = vcmp.eq.s32.totalorder %v4132_v9, 2 }
 0x256   : > { %vm4545_vm15 = vcmp.lt.s32.totalorder %v4544_v55, 2  ;;  %v4656_v8 = vsel %vm3597_vm9, nan, %v4655_v32  ;;  %v4244_v45 = vsel %vm3181_vm10, nan, %v8265_v56  ;;  %vm3195_vm9 = vcmp.lt.s32.totalorder %v8140_v18, 0  ;;  %v4036_v55 = vld [vmem:[%s8663_s7 + $0x8] sm:$0xff] }
 0x257   : > { %vm5920_vm11 = vcmp.lt.s32.totalorder %v5919_v39, 0  ;;  %v4548_v48 = vsel %vm4546_vm2, %v7918_v7, %v8751_v4  ;;  %v4551_v12 = vsel %vm4549_vm3, %v8752_v34, %v7926_v10  ;;  %vm4133_vm2 = vcmp.lt.s32.totalorder %v4132_v9, 2  ;;  %v8406_v34 = vpop.f32.mrf.mxu1 }
 0x258   : > { %v3264_v44 = vsel %vm5920_vm11, 0, %v5919_v39  ;;  %vm4134_vm11 = vcmp.eq.s32.totalorder %v4132_v9, 0  ;;  %v4552_v7 = vsel %vm4545_vm15, %v4548_v48, %v4551_v12  ;;  %v3279_v29 = vsub.s32 4, %v8251_v40  ;;  %8756 = vst [vmem:[#allocation7_spill] sm:$0xff] %v8406_v34 }
 0x259   : > { %v3265_v62 = vsub.s32 32, %v3264_v44  ;;  %v3269_v33 = vsub.s32 4294967266, %v3264_v44  ;;  %v3266_v35 = vshll.u32 %v3257_v52, %v3264_v44  ;;  %v4553_v52 = vsel %vm3493_vm8, nan, %v4552_v7 }
 0x25a   : > { %v8753_v5 = vand.u32 2147483647, %v8140_v18  ;;  %v3280_v59 = vsel %vm3195_vm9, %v3279_v29, %v8251_v40  ;;  %v4853_v20 = vand.u32 3, %v7712_v14  ;;  %v4035_v40 = vld [vmem:[%s8663_s7] sm:$0xff]  ;;  %v8754_v39 = vxor.u32 2147483648, %v7857_v17 }
 0x25b   : > { %v3267_v31 = vshrl.u32 %v3249_v63, %v3265_v62  ;;  %v3270_v2 = vadd.s32 127, %v3269_v33  ;;  %v8755_v14 = vxor.u32 2147483648, %v7852_v50  ;;  %vm3285_vm15 = vweird.f32 %v8140_v18 }
 0x25c   : > { %vm3194_vm8 = vcmp.le.f32.partialorder %v8753_v5, 0.7853982  ;;  %vm4855_vm10 = vcmp.eq.s32.totalorder %v4853_v20, 0  ;;  %v4450_v60 = vsel %vm3389_vm1, nan, %v8272_v37 }
 0x25d   : > { %v3268_v22 = vor.u32 %v3267_v31, %v3266_v35  ;;  %v3271_v25 = vshll.u32 %v3270_v2, 23  ;;  %v3282_v23 = vsel %vm3194_vm8, 0, %v3280_v59  ;;  %v4857_v49 = vsel %vm4855_vm10, %v7852_v50, %v8754_v39  ;;  %v4037_v50 = vld [vmem:[%s8663_s7 + $0x10] sm:$0xff] }
 0x25e   : > { %v6193_v28 = vpop.eup %6192  ;;  %v3286_v42 = vadd.s32 3, %v3282_v23  ;;  %v4338_v44 = vand.u32 3, %v3282_v23 }
 0x25f   : > { %v6195_v16 = vpop.eup %6194  ;;  %v3085_v51 = vxor.u32 2147483648, %v6193_v28  ;;  %v3272_v46 = vor.u32 4788187, %v3271_v25  ;;  %v3275_v53 = vcvt.s32.f32 %v3268_v22  ;;  %v4038_v22 = vld [vmem:[%s8663_s7 + $0x18] sm:$0xff] }
 0x260   : > { %v3082_v30 = vxor.u32 2147483648, %v6195_v16  ;;  %v3287_v47 = vand.u32 3, %v3286_v42 }
 0x261   : > { %v3086_v38 = vsel %vm3084_vm5, %v3085_v51, %v6195_v16  ;;  %v4139_v13 = vsel %vm4137_vm13, %v3085_v51, %v6195_v16  ;;  %v3273_v1 = vand.u32 2147483647, %v3272_v46  ;;  %vm4340_vm5 = vcmp.eq.s32.totalorder %v4338_v44, 0  ;;  %v8410_v46 = vpop.f32.mrf.mxu1 }
 0x262   : > { %v3083_v0 = vsel %vm3081_vm14, %v6193_v28, %v3082_v30  ;;  %v4136_v61 = vsel %vm4134_vm11, %v6193_v28, %v3082_v30  ;;  %vm3292_vm14 = vcmp.eq.s32.totalorder %v3287_v47, 2  ;;  %vm3289_vm3 = vcmp.eq.s32.totalorder %v3287_v47, 0  ;;  %8757 = vst [vmem:[#allocation8_spill] sm:$0xff] %v8410_v46 }
 0x263   : > { %v3087_v58 = vsel %vm3080_vm12, %v3083_v0, %v3086_v38  ;;  %v3276_v21 = vmul.f32 %v3275_v53, %v3273_v1  ;;  %v4140_v24 = vsel %vm4133_vm2, %v4136_v61, %v4139_v13  ;;  %vm4854_vm12 = vcmp.lt.s32.totalorder %v4853_v20, 2  ;;  %v8414_v61 = vpop.f32.mrf.mxu1 }
 0x264   : > { %v3088_v10 = vsel %vm3077_vm4, nan, %v3087_v58  ;;  %v4141_v57 = vsel %vm3077_vm4, nan, %v4140_v24  ;;  %vm4858_vm4 = vcmp.eq.s32.totalorder %v4853_v20, 2  ;;  %vm4343_vm11 = vcmp.eq.s32.totalorder %v4338_v44, 2 }
 0x265   : > { %3872 = vmatpush1.msra.mxu0 %v3088_v10  ;;  %v3277_v43 = vxor.u32 2147483648, %v3276_v21  ;;  %v4860_v27 = vsel %vm4858_vm4, %v8755_v14, %v7857_v17  ;;  %vm3288_vm13 = vcmp.lt.s32.totalorder %v3287_v47, 2  ;;  %vm4339_vm2 = vcmp.lt.s32.totalorder %v4338_v44, 2  ;;  %v8418_v58 = vpop.f32.mrf.mxu1 }
 0x266   : > { %5985 = vmatprep.subr.msk.mxu0 %vm531_vm0, %v4656_v8  ;;  %5943 = vmatmul.mubr.msk.f32.vlgmr.msra.gmra.mxu0 %vm1640_vm7, %v8296_v6  ;;  %v4861_v35 = vsel %vm4854_vm12, %v4857_v49, %v4860_v27 }
 0x267   : > { %5986 = vmatpush1.msk.msra.mxu0 %vm531_vm0, %v4553_v52  ;;  %3911 = vmatprep.mubr.f32.mxu0 %v8736_v3  ;;  %v3278_v15 = vsel %vm3195_vm9, %v3277_v43, %v3276_v21  ;;  %v4862_v16 = vsel %vm3805_vm6, nan, %v4861_v35  ;;  %v8420_v1 = vpop.f32.mrf.mxu1 }
 0x268   : > { %4917 = vmatprep.subr.mxu0 %v4244_v45  ;;  %v3281_v56 = vsel %vm3194_vm8, %v8140_v18, %v3278_v15  ;;  %v8398_v18 = vpop.f32.mrf.mxu0 }
 0x269   : > { %4918 = vmatpush1.msra.mxu0 %v4141_v57  ;;  %6196 = vcosq.f32 %v3281_v56 }
 0x26a   : > { %5944 = vmatmul.mubr.msk.f32.gmra.mxu0 %vm1640_vm7, %v8315_v54  ;;  %6198 = vsinq.f32 %v3281_v56 }
 0x26b   : > { %3917 = vmatprep.mubr.f32.mxu0 %v8736_v3 }
 0x26e   : > { %5945 = vmatmul.mubr.msk.f32.gmra.mxu0 %vm1640_vm7, %v2983_v36 }
 0x26f   : > { %3923 = vmatprep.mubr.f32.mxu0 %v8736_v3 }
 0x272   : > { %5946 = vmatmul.mubr.msk.f32.gmra.mxu0 %vm1640_vm7, %v2984_v19 }
 0x273   : > { %4951 = vmatprep.mubr.f32.mxu0 %v8736_v3 }
 0x276   : > { %5987 = vmatmul.mubr.msk.f32.vlgmr.msra.gmra.mxu0 %vm1640_vm7, %v4035_v40  ;;  %v6197_v63 = vpop.eup %6196 }
 0x277   : > { %4957 = vmatprep.mubr.f32.mxu0 %v8736_v3  ;;  %v6199_v62 = vpop.eup %6198  ;;  %v3293_v33 = vxor.u32 2147483648, %v6197_v63 }
 0x278   : > { %v3290_v11 = vxor.u32 2147483648, %v6199_v62 }
 0x279   : > { %v3294_v31 = vsel %vm3292_vm14, %v3293_v33, %v6199_v62  ;;  %v4345_v9 = vsel %vm4343_vm11, %v3293_v33, %v6199_v62 }
 0x27a   : > { %5988 = vmatmul.mubr.msk.f32.gmra.mxu0 %vm1640_vm7, %v4036_v55  ;;  %v3291_v17 = vsel %vm3289_vm3, %v6197_v63, %v3290_v11  ;;  %v4342_v2 = vsel %vm4340_vm5, %v6197_v63, %v3290_v11 }
 0x27b   : > { %4963 = vmatprep.mubr.f32.mxu0 %v8736_v3  ;;  %v3295_v28 = vsel %vm3288_vm13, %v3291_v17, %v3294_v31  ;;  %v4346_v51 = vsel %vm4339_vm2, %v4342_v2, %v4345_v9 }
 0x27c   : > { %v3296_v32 = vsel %vm3285_vm15, nan, %v3295_v28  ;;  %v4347_v25 = vsel %vm3285_vm15, nan, %v4346_v51 }
 0x27d   : > { %3961 = vmatpush1.msra.mxu1 %v3296_v32 }
 0x27e   : > { %5989 = vmatmul.mubr.msk.f32.gmra.mxu0 %vm1640_vm7, %v4037_v50  ;;  %5991 = vmatprep.subr.msk.mxu1 %vm531_vm0, %v4862_v16 }
 0x27f   : > { %4969 = vmatprep.mubr.f32.mxu0 %v8736_v3  ;;  %5949 = vmatmul.mubr.msk.f32.vlgmr.msra.gmra.mxu1 %vm1640_vm7, %v8296_v6  ;;  %v8424_v6 = vpop.f32.mrf.mxu1 }
 0x280   : > { %5992 = vmatpush1.msk.msra.mxu1 %vm531_vm0, %v8258_v26  ;;  %4000 = vmatprep.mubr.f32.mxu1 %v8736_v3  ;;  %v8400_v26 = vpop.f32.mrf.mxu0  ;;  %vm5125_vm0 = vcmask 261120  }
 0x281   : > { %5006 = vmatprep.subr.mxu1 %v4450_v60  ;;  %v8426_v10 = vpop.f32.mrf.mxu1 }
 0x282   : > { %5990 = vmatmul.mubr.msk.f32.gmra.mxu0 %vm1640_vm7, %v4038_v22  ;;  %5007 = vmatpush1.msra.mxu1 %v4347_v25  ;;  %v8402_v37 = vpop.f32.mrf.mxu0 }
 0x283   : > { %5202 = vmatprep.mubr.f32.mxu0 %v8736_v3  ;;  %5950 = vmatmul.mubr.msk.f32.gmra.mxu1 %vm1640_vm7, %v8315_v54  ;;  %v8428_v8 = vpop.f32.mrf.mxu1 }
 0x284   : > { %4006 = vmatprep.mubr.f32.mxu1 %v8736_v3  ;;  %v8404_v30 = vpop.f32.mrf.mxu0 }
 0x285   : > { %v8430_v52 = vpop.f32.mrf.mxu1 }
 0x286   : > { %v620_v4 = vpop.f32.mrf.mxu0  ;;  %8758 = vst [vmem:[#allocation9_spill] sm:$0xff] %v8430_v52  ;;  %v8464_v31 = vpop.permute.xlu1 %497 }
 0x287   : > { %5951 = vmatmul.mubr.msk.f32.gmra.mxu1 %vm1640_vm7, %v2983_v36  ;;  %v8432_v45 = vpop.f32.mrf.mxu1 }
 0x288   : > { %4012 = vmatprep.mubr.f32.mxu1 %v8736_v3  ;;  %v624_v48 = vpop.f32.mrf.mxu0  ;;  %8759 = vst [vmem:[#allocation10_spill] sm:$0xff] %v8432_v45 }
 0x289   : > { %v8436_v29 = vpop.f32.mrf.mxu1 }
 0x28a   : > { %v626_v12 = vpop.f32.mrf.mxu0  ;;  %8760 = vst [vmem:[#allocation11_spill] sm:$0xff] %v8436_v29  ;;  %v8468_v28 = vpop.permute.xlu1 %492 }
 0x28b   : > { %5952 = vmatmul.mubr.msk.f32.gmra.mxu1 %vm1640_vm7, %v2984_v19  ;;  %v8440_v5 = vpop.f32.mrf.mxu1 }
 0x28c   : > { %5040 = vmatprep.mubr.f32.mxu1 %v8736_v3  ;;  %v8408_v38 = vpop.f32.mrf.mxu0  ;;  %8761 = vst [vmem:[#allocation12_spill] sm:$0xff] %v8440_v5 }
 0x28d   : > { %v8444_v56 = vpop.f32.mrf.mxu1 }
 0x28e   : > { %v8412_v0 = vpop.f32.mrf.mxu0  ;;  %v8479_v52 = vpop.permute.xlu1 %482 }
 0x28f   : > { %5993 = vmatmul.mubr.msk.f32.vlgmr.msra.gmra.mxu1 %vm1640_vm7, %v4035_v40  ;;  %v8446_v59 = vpop.f32.mrf.mxu1  ;;  %v609_v46 = vadd.f32 %v8398_v18, %v8479_v52 }
 0x290   : > { %5046 = vmatprep.mubr.f32.mxu1 %v8736_v3  ;;  %v8416_v13 = vpop.f32.mrf.mxu0 }
 0x291   : > { %v8448_v19 = vpop.f32.mrf.mxu1 }
 0x292   : > { %v8422_v53 = vpop.f32.mrf.mxu0 }
 0x293   : > { %5994 = vmatmul.mubr.msk.f32.gmra.mxu1 %vm1640_vm7, %v4036_v55  ;;  %v8450_v20 = vpop.f32.mrf.mxu1 }
 0x294   : > { %5052 = vmatprep.mubr.f32.mxu1 %v8736_v3  ;;  %v1743_v7 = vpop.f32.mrf.mxu0 }
 0x295   : > { %v8452_v47 = vpop.f32.mrf.mxu1 }
 0x296   : > { %v1745_v21 = vpop.f32.mrf.mxu0  ;;  %8762 = vst [vmem:[#allocation13_spill] sm:$0xff] %v8452_v47  ;;  %v8475_v47 = vpop.permute.xlu0 %487 }
 0x297   : > { %5995 = vmatmul.mubr.msk.f32.gmra.mxu1 %vm1640_vm7, %v4037_v50  ;;  %v8454_v49 = vpop.f32.mrf.mxu1  ;;  %v615_v29 = vadd.f32 %v8402_v37, %v8475_v47  ;;  %v607_v37 = vadd.f32 %v8396_v41, %v8479_v52 }
 0x298   : > { %5058 = vmatprep.mubr.f32.mxu1 %v8736_v3  ;;  %v1749_v24 = vpop.f32.mrf.mxu0  ;;  %8763 = vst [vmem:[#allocation14_spill] sm:$0xff] %v8454_v49  ;;  %v621_v49 = vadd.f32 %v620_v4, %v8468_v28 }
 0x299   : > { %v1843_v18 = vadd.f32 %v8408_v38, %v607_v37  ;;  %v714_v37 = vadd.f32 %v8426_v10, %v8464_v31 }
 0x29a   : > { %v1751_v43 = vpop.f32.mrf.mxu0 }
 0x29b   : > { %5996 = vmatmul.mubr.msk.f32.gmra.mxu1 %vm1640_vm7, %v4038_v22  ;;  %v625_v22 = vadd.f32 %v624_v48, %v8464_v31  ;;  %v1852_v48 = vadd.f32 %v1745_v21, %v621_v49 }
 0x29c   : > { %5291 = vmatprep.mubr.f32.mxu1 %v8736_v3  ;;  %v8434_v54 = vpop.f32.mrf.mxu0 }
 0x29d   : > { %v1855_v45 = vadd.f32 %v1749_v24, %v625_v22 }
 0x29e   : > { %v8438_v57 = vpop.f32.mrf.mxu0 }
 0x2bc   : > { %v8442_v15 = vpop.f32.mrf.mxu0  ;;  %v8458_v27 = vpop.f32.mrf.mxu1 }
 0x2bd   : > { %8764 = vst [vmem:[#allocation15_spill] sm:$0xff] %v8458_v27  ;;  %v627_v27 = vadd.f32 %v626_v12, %v8464_v31 }
 0x2be   : > { %v2785_v36 = vpop.f32.mrf.mxu0  ;;  %v8460_v63 = vpop.f32.mrf.mxu1 }
 0x2bf   : > { %8765 = vst [vmem:[#allocation16_spill] sm:$0xff] %v8460_v63  ;;  %v619_v63 = vadd.f32 %v8404_v30, %v8468_v28  ;;  %v1856_v34 = vadd.f32 %v1751_v43, %v627_v27  ;;  %v1848_v30 = vadd.f32 %v8422_v53, %v615_v29 }
 0x2c1   : > { %v2789_v23 = vpop.f32.mrf.mxu0  ;;  %v8462_v11 = vpop.f32.mrf.mxu1 }
 0x2c2   : > { %8766 = vst [vmem:[#allocation17_spill] sm:$0xff] %v8462_v11 }
 0x2c3   : > { %v2791_v42 = vpop.f32.mrf.mxu0  ;;  %v8466_v17 = vpop.f32.mrf.mxu1 }
 0x2c4   : > { %8767 = vst [vmem:[#allocation18_spill] sm:$0xff] %v8466_v17  ;;  %v1851_v17 = vadd.f32 %v1743_v7, %v619_v63  ;;  %v2898_v24 = vadd.f32 %v2791_v42, %v1852_v48 }
 0x2c5   : > { %v2795_v40 = vpop.f32.mrf.mxu0  ;;  %v8470_v32 = vpop.f32.mrf.mxu1 }
 0x2c6   : > { %v2901_v5 = vadd.f32 %v2795_v40, %v1855_v45  ;;  %v2897_v43 = vadd.f32 %v2789_v23, %v1851_v17  ;;  %v1844_v45 = vadd.f32 %v8412_v0, %v609_v46  ;;  %v2894_v40 = vadd.f32 %v2785_v36, %v1848_v30 }
 0x2c7   : > { %v2797_v39 = vpop.f32.mrf.mxu0  ;;  %v8473_v60 = vpop.f32.mrf.mxu1 }
 0x2c8   : > { %8768 = vst [vmem:[#allocation19_spill] sm:$0xff] %v8473_v60  ;;  %v613_v60 = vadd.f32 %v8400_v26, %v8475_v47  ;;  %v2902_v22 = vadd.f32 %v2797_v39, %v1856_v34 }
 0x2ca   : > { %v1847_v21 = vadd.f32 %v8416_v13, %v613_v60  ;;  %v2890_v13 = vadd.f32 %v8438_v57, %v1844_v45  ;;  %v708_v45 = vadd.f32 %v8420_v1, %v8468_v28 }
 0x2cc   : > { %v2893_v53 = vadd.f32 %v8442_v15, %v1847_v21 }
 0x326   : > { %v8456_v14 = vpop.f32.mrf.mxu0 }
 0x328   : > { %v3909_v44 = vpop.f32.mrf.mxu0 }
 0x32a   : > { %v3913_v55 = vpop.f32.mrf.mxu0 }
 0x32b   : > { %v4023_v46 = vadd.f32 %v3913_v55, %v2893_v53  ;;  %v8771_v53 = vld [vmem:[#allocation18_spill] sm:$0xff] }
 0x32c   : > { %v3915_v62 = vpop.f32.mrf.mxu0 }
 0x32d   : > { %v4024_v23 = vadd.f32 %v3915_v62, %v2894_v40  ;;  %v1857_v40 = vadd.f32 %v8448_v19, %v714_v37 }
 0x32e   : > { %v3919_v33 = vpop.f32.mrf.mxu0 }
 0x32f   : > { %v4027_v29 = vadd.f32 %v3919_v33, %v2897_v43  ;;  %v8532_v43 = vld [vmem:[%s8664_s8 + $0x10] sm:$0xff]  ;;  %v2903_v1 = vadd.f32 %v8470_v32, %v1857_v40  ;;  %v8774_v32 = vld [vmem:[#allocation11_spill] sm:$0xff] }
 0x330   : > { %v3921_v35 = vpop.f32.mrf.mxu0 }
 0x331   : > { %v4028_v27 = vadd.f32 %v3921_v35, %v2898_v24  ;;  %v4020_v35 = vadd.f32 %v3909_v44, %v2890_v13  ;;  %v8522_v24 = vld [vmem:[%s8664_s8 + $0x8] sm:$0xff]  ;;  %v8775_v13 = vld [vmem:[#allocation17_spill] sm:$0xff] }
 0x332   : > { %v3925_v50 = vpop.f32.mrf.mxu0 }
 0x333   : > { %v4031_v26 = vadd.f32 %v3925_v50, %v2901_v5  ;;  %v2889_v50 = vadd.f32 %v8434_v54, %v1843_v18 }
 0x334   : > { %v3927_v2 = vpop.f32.mrf.mxu0 }
 0x335   : > { %v4032_v63 = vadd.f32 %v3927_v2, %v2902_v22  ;;  %v4019_v15 = vadd.f32 %v8456_v14, %v2889_v50  ;;  %v8776_v50 = vld [vmem:[#allocation10_spill] sm:$0xff] }
 0x336   : > { %v4953_v9 = vpop.f32.mrf.mxu0 }
 0x338   : > { %v4955_v16 = vpop.f32.mrf.mxu0 }
 0x339   : > { %v5066_v48 = vadd.f32 %v4955_v16, %v4020_v35  ;;  %v8512_v16 = vld [vmem:[%s8664_s8] sm:$0xff] }
 0x33a   : > { %v4959_v51 = vpop.f32.mrf.mxu0 }
 0x33b   : > { %v5069_v33 = vadd.f32 %v4959_v51, %v4023_v46  ;;  %v5082_v44 = vmax.f32 %v5066_v48, 0.0 }
 0x33c   : > { %v4961_v25 = vpop.f32.mrf.mxu0 }
 0x33d   : > { %v5070_v38 = vadd.f32 %v4961_v25, %v4024_v23 }
 0x33e   : > { %v4965_v11 = vpop.f32.mrf.mxu0 }
 0x33f   : > { %v8487_v4 = vpop.f32.mrf.mxu1  ;;  %v5073_v36 = vadd.f32 %v4965_v11, %v4027_v29  ;;  %v5086_v54 = vmax.f32 %v5070_v38, 0.0  ;;  %v5085_v11 = vmax.f32 %v5069_v33, 0.0 }
 0x340   : > { %v4967_v12 = vpop.f32.mrf.mxu0 }
 0x341   : > { %v8495_v49 = vpop.f32.mrf.mxu1  ;;  %v5074_v39 = vadd.f32 %v4967_v12, %v4028_v27  ;;  %v5065_v12 = vadd.f32 %v4953_v9, %v4019_v15  ;;  %v5089_v30 = vmax.f32 %v5073_v36, 0.0  ;;  %v704_v27 = vadd.f32 %v8418_v58, %v8475_v47  ;;  %v5100_v58 = vld [vmem:[%s8664_s8 + $0x18] sm:$0xff]  ;;  %v8777_v36 = vld [vmem:[#allocation16_spill] sm:$0xff]  ;;  %v8778_v15 = vld [vmem:[#allocation9_spill] sm:$0xff] }
 0x342   : > { %v4971_v7 = vpop.f32.mrf.mxu0 }
 0x343   : > { %v8500_v34 = vpop.f32.mrf.mxu1  ;;  %v5077_v41 = vadd.f32 %v4971_v7, %v4031_v26  ;;  %v5090_v57 = vmax.f32 %v5074_v39, 0.0  ;;  %v5081_v14 = vmax.f32 %v5065_v12, 0.0  ;;  %v710_v26 = vadd.f32 %v8424_v6, %v8468_v28 }
 0x344   : > { %v4973_v42 = vpop.f32.mrf.mxu0  ;;  %v716_v7 = vadd.f32 %v8428_v8, %v8464_v31  ;;  %v702_v6 = vadd.f32 %v8414_v61, %v8475_v47  ;;  %v1853_v8 = vadd.f32 %v8444_v56, %v708_v45  ;;  %v8773_v56 = vld [vmem:[#allocation7_spill] sm:$0xff] }
 0x345   : > { %v5078_v5 = vadd.f32 %v4973_v42, %v4032_v63  ;;  %v8504_v0 = vpop.f32.mrf.mxu1  ;;  %v5093_v60 = vmax.f32 %v5077_v41, 0.0  ;;  %v1854_v63 = vadd.f32 %v8446_v59, %v710_v26  ;;  %v8769_v59 = vld [vmem:[#allocation8_spill] sm:$0xff]  ;;  %v8772_v41 = vld [vmem:[#allocation19_spill] sm:$0xff]  ;;  %v696_v47 = vadd.f32 %v8773_v56, %v8479_v52 }
 0x346   : > { %v1858_v18 = vadd.f32 %v8450_v20, %v716_v7  ;;  %v698_v19 = vadd.f32 %v8769_v59, %v8479_v52  ;;  %v8770_v20 = vld [vmem:[#allocation12_spill] sm:$0xff]  ;;  %v1849_v42 = vadd.f32 %v8774_v32, %v702_v6  ;;  %v2899_v23 = vadd.f32 %v8775_v13, %v1853_v8 }
 0x347   : > { %v5094_v17 = vmax.f32 %v5078_v5, 0.0  ;;  %v8507_v2 = vpop.f32.mrf.mxu1  ;;  %v1850_v28 = vadd.f32 %v8770_v20, %v704_v27  ;;  %v2900_v29 = vadd.f32 %v8771_v53, %v1854_v63  ;;  %v1845_v33 = vadd.f32 %v8778_v15, %v696_v47 }
 0x348   : > { %v2904_v61 = vadd.f32 %v8772_v41, %v1858_v18  ;;  %v1846_v46 = vadd.f32 %v8776_v50, %v698_v19  ;;  %v4029_v52 = vadd.f32 %v8507_v2, %v2899_v23 }
 0x349   : > { %5162 = vmatprep.subr.mxu0 %v5094_v17  ;;  %v4010_v62 = vpop.f32.mrf.mxu1  ;;  %v2896_v35 = vadd.f32 %v8777_v36, %v1850_v28 }
 0x34a   : > { %5163 = vmatpush1.msra.mxu0 %v5093_v60  ;;  %v4030_v38 = vadd.f32 %v4010_v62, %v2900_v29  ;;  %v8779_v60 = vld [vmem:[#allocation15_spill] sm:$0xff]  ;;  %v8781_v62 = vld [vmem:[#allocation13_spill] sm:$0xff] }
 0x34b   : > { %5164 = vmatprep.subr.mxu0 %v5090_v57  ;;  %v4014_v55 = vpop.f32.mrf.mxu1  ;;  %v2895_v48 = vadd.f32 %v8779_v60, %v1849_v42 }
 0x34c   : > { %5165 = vmatpush1.msra.mxu0 %v5089_v30  ;;  %v4033_v39 = vadd.f32 %v4014_v55, %v2903_v1  ;;  %v8780_v30 = vld [vmem:[#allocation14_spill] sm:$0xff]  ;;  %v4026_v55 = vadd.f32 %v8504_v0, %v2896_v35 }
 0x34d   : > { %5166 = vmatprep.subr.mxu0 %v5086_v54  ;;  %v4016_v25 = vpop.f32.mrf.mxu1  ;;  %v2892_v54 = vadd.f32 %v8780_v30, %v1846_v46  ;;  %v5332_v46 = vld [vmem:[%s8666_s10] sm:$0xff] }
 0x34e   : > { %5167 = vmatpush1.msra.mxu0 %v5085_v11  ;;  %v4034_v17 = vadd.f32 %v4016_v25, %v2904_v61  ;;  %v2891_v25 = vadd.f32 %v8781_v62, %v1845_v33  ;;  %v5334_v33 = vld [vmem:[%s8666_s10 + $0x10] sm:$0xff] }
 0x34f   : > { %5168 = vmatprep.subr.mxu0 %v5082_v44  ;;  %v8514_v9 = vpop.f32.mrf.mxu1  ;;  %v4022_v26 = vadd.f32 %v8495_v49, %v2892_v54 }
 0x350   : > { %5169 = vmatpush1.msra.mxu0 %v5081_v14  ;;  %v4025_v14 = vadd.f32 %v8500_v34, %v2895_v48  ;;  %v4021_v2 = vadd.f32 %v8487_v4, %v2891_v25 }
 0x351   : > { %5997 = vmatmul.mubr.msk.f32.vlgmr.msra.gmra.mxu0 %vm5125_vm0, %v8512_v16  ;;  %v5044_v51 = vpop.f32.mrf.mxu1 }
 0x352   : > { %5208 = vmatprep.mubr.f32.mxu0 %v8736_v3  ;;  %v5068_v63 = vadd.f32 %v5044_v51, %v4022_v26  ;;  %v5067_v0 = vadd.f32 %v8514_v9, %v4021_v2 }
 0x353   : > { %v5048_v22 = vpop.f32.mrf.mxu1 }
 0x354   : > { %v5071_v40 = vadd.f32 %v5048_v22, %v4025_v14  ;;  %v5084_v34 = vmax.f32 %v5068_v63, 0.0  ;;  %v5083_v49 = vmax.f32 %v5067_v0, 0.0 }
 0x355   : > { %5998 = vmatmul.mubr.msk.f32.gmra.mxu0 %vm5125_vm0, %v8522_v24  ;;  %v5050_v21 = vpop.f32.mrf.mxu1 }
 0x356   : > { %5214 = vmatprep.mubr.f32.mxu0 %v8736_v3  ;;  %v5072_v7 = vadd.f32 %v5050_v21, %v4026_v55  ;;  %v5087_v1 = vmax.f32 %v5071_v40, 0.0  ;;  %v5123_v21 = vpop.permute.xlu0 %5122 }
 0x357   : > { %v5054_v10 = vpop.f32.mrf.mxu1 }
 0x358   : > { %v5075_v37 = vadd.f32 %v5054_v10, %v4029_v52  ;;  %v5088_v8 = vmax.f32 %v5072_v7, 0.0  ;;  %v5335_v52 = vld [vmem:[%s8666_s10 + $0x18] sm:$0xff] }
 0x359   : > { %5999 = vmatmul.mubr.msk.f32.gmra.mxu0 %vm5125_vm0, %v8532_v43  ;;  %v5056_v31 = vpop.f32.mrf.mxu1 }
 0x35a   : > { %5220 = vmatprep.mubr.f32.mxu0 %v8736_v3  ;;  %v5076_v11 = vadd.f32 %v5056_v31, %v4030_v38  ;;  %v5091_v6 = vmax.f32 %v5075_v37, 0.0  ;;  %v5118_v31 = vpop.permute.xlu1 %5117  ;;  %v5333_v38 = vld [vmem:[%s8666_s10 + $0x8] sm:$0xff] }
 0x35b   : > { %v5060_v5 = vpop.f32.mrf.mxu1 }
 0x35c   : > { %v5079_v57 = vadd.f32 %v5060_v5, %v4033_v39  ;;  %v5092_v18 = vmax.f32 %v5076_v11, 0.0 }
 0x35d   : > { %6000 = vmatmul.mubr.msk.f32.gmra.mxu0 %vm5125_vm0, %v5100_v58  ;;  %v5062_v12 = vpop.f32.mrf.mxu1 }
 0x35e   : > { %5436 = vmatprep.mubr.f32.mxu0 %v8736_v3  ;;  %v5080_v44 = vadd.f32 %v5062_v12, %v4034_v17  ;;  %v5095_v27 = vmax.f32 %v5079_v57, 0.0 }
 0x360   : > { %v5096_v45 = vmax.f32 %v5080_v44, 0.0 }
 0x362   : > { %5251 = vmatprep.subr.mxu1 %v5096_v45 }
 0x363   : > { %5252 = vmatpush1.msra.mxu1 %v5095_v27 }
 0x364   : > { %5253 = vmatprep.subr.mxu1 %v5092_v18 }
 0x365   : > { %5254 = vmatpush1.msra.mxu1 %v5091_v6 }
 0x366   : > { %5255 = vmatprep.subr.mxu1 %v5088_v8 }
 0x367   : > { %5256 = vmatpush1.msra.mxu1 %v5087_v1 }
 0x368   : > { %5257 = vmatprep.subr.mxu1 %v5084_v34 }
 0x369   : > { %5258 = vmatpush1.msra.mxu1 %v5083_v49 }
 0x36a   : > { %6001 = vmatmul.mubr.msk.f32.vlgmr.msra.gmra.mxu1 %vm5125_vm0, %v8512_v16 }
 0x36b   : > { %5297 = vmatprep.mubr.f32.mxu1 %v8736_v3 }
 0x36e   : > { %6002 = vmatmul.mubr.msk.f32.gmra.mxu1 %vm5125_vm0, %v8522_v24 }
 0x36f   : > { %5303 = vmatprep.mubr.f32.mxu1 %v8736_v3 }
 0x372   : > { %6003 = vmatmul.mubr.msk.f32.gmra.mxu1 %vm5125_vm0, %v8532_v43  ;;  %v5113_v43 = vpop.permute.xlu0 %5112 }
 0x373   : > { %5309 = vmatprep.mubr.f32.mxu1 %v8736_v3 }
 0x376   : > { %6004 = vmatmul.mubr.msk.f32.gmra.mxu1 %vm5125_vm0, %v5100_v58  ;;  %v5108_v58 = vpop.permute.xlu1 %5107  ;;  %v5358_v34 = vpop.permute.xlu0 %5357 }
 0x377   : > { %5525 = vmatprep.mubr.f32.mxu1 %v8736_v3 }
 0x411   : > { %v5204_v4 = vpop.f32.mrf.mxu0 }
 0x412   : > { %v5205_v42 = vadd.f32 %v5204_v4, %v5108_v58  ;;  %v5353_v4 = vpop.permute.xlu1 %5352 }
 0x413   : > { %v5206_v9 = vpop.f32.mrf.mxu0 }
 0x414   : > { %v5207_v47 = vadd.f32 %v5206_v9, %v5108_v58  ;;  %v5316_v50 = vmax.f32 %v5205_v42, 0.0 }
 0x415   : > { %v5210_v51 = vpop.f32.mrf.mxu0 }
 0x416   : > { %v5211_v61 = vadd.f32 %v5210_v51, %v5113_v43  ;;  %v5317_v5 = vmax.f32 %v5207_v47, 0.0  ;;  %v5566_v47 = vld [vmem:[%s8668_s12] sm:$0x7] }
 0x417   : > { %v5212_v16 = vpop.f32.mrf.mxu0 }
 0x418   : > { %v5213_v29 = vadd.f32 %v5212_v16, %v5113_v43  ;;  %v5320_v39 = vmax.f32 %v5211_v61, 0.0 }
 0x419   : > { %v5216_v22 = vpop.f32.mrf.mxu0 }
 0x41a   : > { %v5217_v53 = vadd.f32 %v5216_v22, %v5118_v31  ;;  %v5321_v23 = vmax.f32 %v5213_v29, 0.0 }
 0x41b   : > { %v5218_v10 = vpop.f32.mrf.mxu0 }
 0x41c   : > { %v5219_v20 = vadd.f32 %v5218_v10, %v5118_v31  ;;  %v5324_v13 = vmax.f32 %v5217_v53, 0.0  ;;  %v5348_v10 = vpop.permute.xlu0 %5347 }
 0x41d   : > { %v5222_v24 = vpop.f32.mrf.mxu0 }
 0x41e   : > { %v5223_v59 = vadd.f32 %v5222_v24, %v5123_v21  ;;  %v5325_v32 = vmax.f32 %v5219_v20, 0.0 }
 0x41f   : > { %v5224_v19 = vpop.f32.mrf.mxu0 }
 0x420   : > { %v5225_v28 = vadd.f32 %v5224_v19, %v5123_v21  ;;  %v5328_v56 = vmax.f32 %v5223_v59, 0.0  ;;  %v5343_v19 = vpop.permute.xlu1 %5342 }
 0x422   : > { %v5329_v41 = vmax.f32 %v5225_v28, 0.0 }
 0x424   : > { %5396 = vmatprep.subr.mxu0 %v5329_v41 }
 0x425   : > { %5397 = vmatpush1.msra.mxu0 %v5328_v56 }
 0x426   : > { %5398 = vmatprep.subr.mxu0 %v5325_v32 }
 0x427   : > { %5399 = vmatpush1.msra.mxu0 %v5324_v13 }
 0x428   : > { %5400 = vmatprep.subr.mxu0 %v5321_v23 }
 0x429   : > { %5401 = vmatpush1.msra.mxu0 %v5320_v39 }
 0x42a   : > { %5402 = vmatprep.subr.mxu0 %v5317_v5  ;;  %v5293_v36 = vpop.f32.mrf.mxu1 }
 0x42b   : > { %5403 = vmatpush1.msra.mxu0 %v5316_v50  ;;  %v5294_v7 = vadd.f32 %v5293_v36, %v5108_v58 }
 0x42c   : > { %6005 = vmatmul.mubr.msk.f32.vlgmr.msra.gmra.mxu0 %vm5125_vm0, %v5332_v46  ;;  %v5295_v35 = vpop.f32.mrf.mxu1 }
 0x42d   : > { %5442 = vmatprep.mubr.f32.mxu0 %v8736_v3  ;;  %v5296_v37 = vadd.f32 %v5295_v35, %v5108_v58  ;;  %v5318_v63 = vmax.f32 %v5294_v7, 0.0 }
 0x42e   : > { %v5299_v17 = vpop.f32.mrf.mxu1 }
 0x42f   : > { %v5300_v25 = vadd.f32 %v5299_v17, %v5113_v43  ;;  %v5319_v27 = vmax.f32 %v5296_v37, 0.0 }
 0x430   : > { %6006 = vmatmul.mubr.msk.f32.gmra.mxu0 %vm5125_vm0, %v5333_v38  ;;  %v5301_v15 = vpop.f32.mrf.mxu1 }
 0x431   : > { %5448 = vmatprep.mubr.f32.mxu0 %v8736_v3  ;;  %v5302_v44 = vadd.f32 %v5301_v15, %v5113_v43  ;;  %v5322_v40 = vmax.f32 %v5300_v25, 0.0  ;;  %v5571_v25 = vpop.permute.xlu0 %5570 }
 0x432   : > { %v5305_v60 = vpop.f32.mrf.mxu1 }
 0x433   : > { %v5306_v11 = vadd.f32 %v5305_v60, %v5118_v31  ;;  %v5323_v2 = vmax.f32 %v5302_v44, 0.0 }
 0x434   : > { %6007 = vmatmul.mubr.msk.f32.gmra.mxu0 %vm5125_vm0, %v5334_v33  ;;  %v5307_v48 = vpop.f32.mrf.mxu1 }
 0x435   : > { %5454 = vmatprep.mubr.f32.mxu0 %v8736_v3  ;;  %v5308_v54 = vadd.f32 %v5307_v48, %v5118_v31  ;;  %v5326_v45 = vmax.f32 %v5306_v11, 0.0 }
 0x436   : > { %v5311_v57 = vpop.f32.mrf.mxu1 }
 0x437   : > { %v5312_v12 = vadd.f32 %v5311_v57, %v5123_v21  ;;  %v5327_v26 = vmax.f32 %v5308_v54, 0.0 }
 0x438   : > { %6008 = vmatmul.mubr.msk.f32.gmra.mxu0 %vm5125_vm0, %v5335_v52  ;;  %v5313_v30 = vpop.f32.mrf.mxu1 }
 0x439   : > { %5640 = vmatprep.mubr.f32.mxu0 %v8736_v3  ;;  %v5314_v55 = vadd.f32 %v5313_v30, %v5123_v21  ;;  %v5330_v14 = vmax.f32 %v5312_v12, 0.0 }
 0x43b   : > { %v5331_v62 = vmax.f32 %v5314_v55, 0.0 }
 0x43d   : > { %5485 = vmatprep.subr.mxu1 %v5331_v62 }
 0x43e   : > { %5486 = vmatpush1.msra.mxu1 %v5330_v14 }
 0x43f   : > { %5487 = vmatprep.subr.mxu1 %v5327_v26 }
 0x440   : > { %5488 = vmatpush1.msra.mxu1 %v5326_v45 }
 0x441   : > { %5489 = vmatprep.subr.mxu1 %v5323_v2 }
 0x442   : > { %5490 = vmatpush1.msra.mxu1 %v5322_v40 }
 0x443   : > { %5491 = vmatprep.subr.mxu1 %v5319_v27 }
 0x444   : > { %5492 = vmatpush1.msra.mxu1 %v5318_v63 }
 0x445   : > { %6009 = vmatmul.mubr.msk.f32.vlgmr.msra.gmra.mxu1 %vm5125_vm0, %v5332_v46 }
 0x446   : > { %5531 = vmatprep.mubr.f32.mxu1 %v8736_v3 }
 0x449   : > { %6010 = vmatmul.mubr.msk.f32.gmra.mxu1 %vm5125_vm0, %v5333_v38 }
 0x44a   : > { %5537 = vmatprep.mubr.f32.mxu1 %v8736_v3 }
 0x44d   : > { %6011 = vmatmul.mubr.msk.f32.gmra.mxu1 %vm5125_vm0, %v5334_v33 }
 0x44e   : > { %5543 = vmatprep.mubr.f32.mxu1 %v8736_v3 }
 0x451   : > { %6012 = vmatmul.mubr.msk.f32.gmra.mxu1 %vm5125_vm0, %v5335_v52 }
 0x452   : > { %5711 = vmatprep.mubr.f32.mxu1 %v8736_v3 }
 0x4ec   : > { %v5438_v18 = vpop.f32.mrf.mxu0 }
 0x4ed   : > { %v5439_v53 = vadd.f32 %v5438_v18, %v5343_v19 }
 0x4ee   : > { %v5440_v0 = vpop.f32.mrf.mxu0 }
 0x4ef   : > { %v5441_v28 = vadd.f32 %v5440_v0, %v5343_v19  ;;  %v5550_v56 = vmax.f32 %v5439_v53, 0.0 }
 0x4f0   : > { %v5444_v6 = vpop.f32.mrf.mxu0 }
 0x4f1   : > { %v5445_v20 = vadd.f32 %v5444_v6, %v5348_v10  ;;  %v5551_v61 = vmax.f32 %v5441_v28, 0.0 }
 0x4f2   : > { %v5446_v8 = vpop.f32.mrf.mxu0 }
 0x4f3   : > { %v5447_v24 = vadd.f32 %v5446_v8, %v5348_v10  ;;  %v5554_v58 = vmax.f32 %v5445_v20, 0.0 }
 0x4f4   : > { %v5450_v1 = vpop.f32.mrf.mxu0 }
 0x4f5   : > { %v5451_v31 = vadd.f32 %v5450_v1, %v5353_v4  ;;  %v5555_v41 = vmax.f32 %v5447_v24, 0.0 }
 0x4f6   : > { %v5452_v49 = vpop.f32.mrf.mxu0 }
 0x4f7   : > { %v5453_v22 = vadd.f32 %v5452_v49, %v5353_v4  ;;  %v5558_v29 = vmax.f32 %v5451_v31, 0.0 }
 0x4f8   : > { %v5456_v9 = vpop.f32.mrf.mxu0 }
 0x4f9   : > { %v5457_v51 = vadd.f32 %v5456_v9, %v5358_v34  ;;  %v5559_v43 = vmax.f32 %v5453_v22, 0.0 }
 0x4fa   : > { %v5458_v16 = vpop.f32.mrf.mxu0 }
 0x4fb   : > { %v5459_v21 = vadd.f32 %v5458_v16, %v5358_v34  ;;  %v5562_v3 = vmax.f32 %v5457_v51, 0.0 }
 0x4fd   : > { %v5563_v59 = vmax.f32 %v5459_v21, 0.0 }
 0x4ff   : > { %5600 = vmatprep.subr.mxu0 %v5563_v59 }
 0x500   : > { %5601 = vmatpush1.msra.mxu0 %v5562_v3 }
 0x501   : > { %5602 = vmatprep.subr.mxu0 %v5559_v43 }
 0x502   : > { %5603 = vmatpush1.msra.mxu0 %v5558_v29 }
 0x503   : > { %5604 = vmatprep.subr.mxu0 %v5555_v41 }
 0x504   : > { %5605 = vmatpush1.msra.mxu0 %v5554_v58 }
 0x505   : > { %5606 = vmatprep.subr.mxu0 %v5551_v61  ;;  %v5527_v32 = vpop.f32.mrf.mxu1 }
 0x506   : > { %5607 = vmatpush1.msra.mxu0 %v5550_v56  ;;  %v5528_v12 = vadd.f32 %v5527_v32, %v5343_v19 }
 0x507   : > { %6013 = vmatmul.mubr.msk.f32.vlgmr.msra.gmra.mxu0 %vm5125_vm0, %v5566_v47  ;;  %v5529_v42 = vpop.f32.mrf.mxu1 }
 0x508   : > { %v5530_v52 = vadd.f32 %v5529_v42, %v5343_v19  ;;  %v5552_v44 = vmax.f32 %v5528_v12, 0.0 }
 0x509   : > { %v5533_v13 = vpop.f32.mrf.mxu1 }
 0x50a   : > { %v5534_v60 = vadd.f32 %v5533_v13, %v5348_v10  ;;  %v5553_v11 = vmax.f32 %v5530_v52, 0.0 }
 0x50b   : > { %v5535_v23 = vpop.f32.mrf.mxu1 }
 0x50c   : > { %v5536_v15 = vadd.f32 %v5535_v23, %v5348_v10  ;;  %v5556_v55 = vmax.f32 %v5534_v60, 0.0 }
 0x50d   : > { %v5539_v39 = vpop.f32.mrf.mxu1 }
 0x50e   : > { %v5540_v17 = vadd.f32 %v5539_v39, %v5353_v4  ;;  %v5557_v54 = vmax.f32 %v5536_v15, 0.0 }
 0x50f   : > { %v5541_v5 = vpop.f32.mrf.mxu1 }
 0x510   : > { %v5542_v35 = vadd.f32 %v5541_v5, %v5353_v4  ;;  %v5560_v30 = vmax.f32 %v5540_v17, 0.0 }
 0x511   : > { %v5545_v50 = vpop.f32.mrf.mxu1 }
 0x512   : > { %v5546_v46 = vadd.f32 %v5545_v50, %v5358_v34  ;;  %v5561_v57 = vmax.f32 %v5542_v35, 0.0 }
 0x513   : > { %v5547_v36 = vpop.f32.mrf.mxu1 }
 0x514   : > { %v5548_v38 = vadd.f32 %v5547_v36, %v5358_v34  ;;  %v5564_v48 = vmax.f32 %v5546_v46, 0.0 }
 0x516   : > { %v5565_v33 = vmax.f32 %v5548_v38, 0.0 }
 0x518   : > { %5671 = vmatprep.subr.mxu1 %v5565_v33 }
 0x519   : > { %5672 = vmatpush1.msra.mxu1 %v5564_v48 }
 0x51a   : > { %5673 = vmatprep.subr.mxu1 %v5561_v57 }
 0x51b   : > { %5674 = vmatpush1.msra.mxu1 %v5560_v30 }
 0x51c   : > { %5675 = vmatprep.subr.mxu1 %v5557_v54 }
 0x51d   : > { %5676 = vmatpush1.msra.mxu1 %v5556_v55 }
 0x51e   : > { %5677 = vmatprep.subr.mxu1 %v5553_v11 }
 0x51f   : > { %5678 = vmatpush1.msra.mxu1 %v5552_v44 }
 0x520   : > { %6014 = vmatmul.mubr.msk.f32.vlgmr.msra.gmra.mxu1 %vm5125_vm0, %v5566_v47 }
 0x5c7   : > { %v5642_v62 = vpop.f32.mrf.mxu0 }
 0x5c8   : > { %v5643_v37 = vadd.f32 %v5642_v62, %v5571_v25 }
 0x5c9   : > { %v5644_v14 = vpop.f32.mrf.mxu0 }
 0x5ca   : > { %v5645_v26 = vadd.f32 %v5644_v14, %v5571_v25 }
 0x5cc   : > { %v5722_v7 = vcombine.low %v5643_v37, %v5645_v26 }
 0x5ce   : > { %5726 = vst [vmem:[%s461_s15] sm:$0x77] %v5722_v7 }
 0x5e0   : > { %v5713_v45 = vpop.f32.mrf.mxu1 }
 0x5e1   : > { %v5714_v40 = vadd.f32 %v5713_v45, %v5571_v25 }
 0x5e2   : > { %v5715_v2 = vpop.f32.mrf.mxu1 }
 0x5e3   : > { %v5716_v27 = vadd.f32 %v5715_v2, %v5571_v25 }
 0x5e5   : > { %v5723_v63 = vcombine.low %v5714_v40, %v5716_v27 }
 0x5e7   : > { %5727 = vst [vmem:[%s461_s15 + $0x8] sm:$0x77] %v5723_v63 }
 0x5e8   : > { %6214 = shalt.err (!%p6211_p3)
}
 0x5e9   : > { %s6215_s2 = scalar_lea.hbm %s5741_s28, 256  ;;  %s6219_s22 = scalar_lea.hbm %s8670_s14, 512 }
 0x5ea   : > { %p6216_p4 = scmp.ne.s32.totalorder %s5741_s28, %s6215_s2  ;;  %p6220_p9 = scmp.lt.s32.totalorder %s5741_s28, %s8670_s14 }
 0x5eb   : > { %p6221_p10 = scmp.lt.s32.totalorder %s6219_s22, %s6215_s2 }
 0x5ec   : > { %p6217_p7 = pnand %p6216_p4, %p6386_p5 }
 0x5ed   : > { %p6222_p11 = por %p6221_p10, %p6220_p9 }
 0x5ee   : > { %p6218_p8 = pneg %p6217_p7 }
 0x5f0   : > { %p6223_p12 = pnand %p6222_p11, %p6218_p8 }
 0x5f2   : > { %6226 = shalt.err (!%p6223_p12)
}
 0x5f3   : > { %6085 = dma.vmem_to_hbm [thread:$0]  (%p6386_p5), %s5744_s21, 256, %s5741_s28, %s5729_s26  }
 0x5f4 PF: > { %p6091_p13 = scmp.ge.s32.totalorder %s6261_s16, 2  ;;  %s5755_s0 = sand.u32 1, %s6249_s29  }
 0x5f5   : > { %s5756_s1 = scalar_lea.sflag [#allocation3], %s5755_s0 }
 0x5f6   : > { %p6088_p0 = pnand %p6091_p13, %p6390_p6 }
 0x5f8   : > { %p6089_p1 = pneg %p6088_p0 }
 0x5fa   : > { %6244 = dma.done.wait (%p6089_p1), %s5756_s1, 256  }
 0x5fb   : > { %6246 = vsyncadd (%p6089_p1), %s5756_s1, 4294967040  ;;  %s8782_s2 = sld [smem:[#allocation5_spill]]  ;;  %p24_p2 = scmp.ge.s32.totalorder %s6373_s19, 4  }
 0x5fc   : > { %s8783_s15 = sld [smem:[#allocation6_spill]]  ;;  %s8784_s29 = smov %s6253_s30 }
 0x5fd   : > { %s8786_s16 = smov %s6373_s19  ;;  %26 = sbr.rel (!%p24_p2) target bundleno = 7 (0x7), region = 111 }
 0x601   : > { %s8785_s30 = smov %s8782_s2 }
 0x602   :  { %5761 = vsyncpa [#allocation3], 1 }
 0x603   :  { %5763 = vsyncpa [#allocation3 + $0x1], 1 }

</bundles_post_ra>
